<compile_context>
chip_gen: v6e
topology: v6e:2x2x1
jax: 0.10.0
libtpu: 0.0.40
codegen_flags: <defaults>
</compile_context>

<pallas_src>
import jax
import jax.numpy as jnp
from jax import lax
from jax.experimental import pallas as pl
from jax.experimental.pallas import tpu as pltpu


def _convblock_kernel(xs_ref, wt_ref, shift_ref, o_ref, patch_ref):
    """Fused Conv3x3(+folded BN/bias) -> MaxPool(pool) -> +shift -> ReLU.

    xs_ref:    (1, pool, H+2, Wo+2, cin)  compute dtype; pool-phase-split padded input
    wt_ref:    (9*cin, cout)              compute dtype; BN-scale-folded conv weights
    shift_ref: (1, cout)                  f32; folded conv-bias / BN shift
    o_ref:     (1, rows_blk, Wo, cout)    output row chunk, NHWC orientation
    patch_ref: (pool*pool*Wo, 9*cin)      VMEM scratch; im2col tile for one pooled row
    """
    pool = xs_ref.shape[1]
    cin = xs_ref.shape[4]
    Wo = xs_ref.shape[3] - 2
    rows_blk = o_ref.shape[1]
    R = pool * pool
    row_chunk = pl.program_id(1)

    def one_row(j, carry):
        ho = row_chunk * rows_blk + j                      # global pooled output row
        # ---- in-kernel im2col: 9 taps x pool^2 phases, all contiguous slices ----
        for py in range(pool):
            for px in range(pool):
                r = py * pool + px
                for ky in range(3):
                    for kx in range(3):
                        t = ky * 3 + kx
                        q = px + kx - 1                    # raw col offset inside pool cell
                        phase = q % pool                   # pool phase holding that column
                        dwo = q // pool                    # pooled-column shift in {-1,0,1}
                        row = ho * pool + py + ky          # padded raw-row index
                        patch_ref[pl.ds(r * Wo, Wo), pl.ds(t * cin, cin)] = (
                            xs_ref[0, phase, row, pl.ds(1 + dwo, Wo), :])
        # ---- one big-K MXU matmul, f32 accumulation ----
        y = jnp.dot(patch_ref[...], wt_ref[...],
                    preferred_element_type=jnp.float32)    # (R*Wo, cout)
        # ---- max-pool over the pool^2 phase groups (commutes with shift/ReLU) ----
        m = y[0:Wo, :]
        for r in range(1, R):
            m = jnp.maximum(m, y[r * Wo:(r + 1) * Wo, :])
        m = jnp.maximum(m + shift_ref[...], 0.0)           # folded BN/bias + ReLU
        o_ref[0, j, :, :] = m.astype(o_ref.dtype)
        return carry

    lax.fori_loop(0, rows_blk, one_row, 0)


def conv_block(x_nchw, weight, bias, gamma, beta, run_mean, run_var,
               pool=2, eps=1e-5, compute_dtype=jnp.bfloat16):
    N, cin, H, W = x_nchw.shape
    cout = weight.shape[0]
    assert H % pool == 0 and W % pool == 0, "H, W must be divisible by pool"
    Ho, Wo = H // pool, W // pool
    K, R = 9 * cin, pool * pool

    # ---- Fold BN (running stats) + conv bias into the conv weights:
    #   BN(conv(x, w) + b) = conv(x, w * scale) + shift
    scale = gamma / jnp.sqrt(run_var + eps)
    w_fold = weight * scale[:, None, None, None]                   # (cout, cin, 3, 3)
    # wt[(ky*3+kx)*cin + c, o] = w_fold[o, c, ky, kx]  (matches in-kernel patch order)
    wt = w_fold.transpose(2, 3, 1, 0).reshape(K, cout).astype(compute_dtype)
    shift = (scale * (bias - run_mean) + beta).reshape(1, cout).astype(jnp.float32)

    # ---- Pool-phase split of the padded input (1x the input size, not 9x):
    # xs[n, px, 1+h, 1+wo, c] = x[n, c, h, wo*pool + px]
    xs = x_nchw.reshape(N, cin, H, Wo, pool).transpose(0, 4, 2, 3, 1)
    xs = jnp.pad(xs, ((0, 0), (0, 0), (1, 1), (1, 1), (0, 0)))
    xs = xs.astype(compute_dtype)                                  # (N, pool, H+2, Wo+2, cin)

    # ---- Work split: one image per outer grid step; also split rows when the
    # batch alone cannot feed both v7x TensorCores.
    if N >= 2 or Ho < 2:
        n_chunks = 1
    else:
        n_chunks = 2 if Ho % 2 == 0 else 1
    rows_blk = Ho // n_chunks

    # ---- VMEM budget -> vmem_limit_bytes (64 MiB v7x cap).
    csize = jnp.dtype(compute_dtype).itemsize
    osize = jnp.dtype(x_nchw.dtype).itemsize
    xs_blk = pool * (H + 2) * (Wo + 2) * cin * csize
    out_blk = rows_blk * Wo * cout * osize
    est = (2 * xs_blk + K * cout * csize + cout * 4
           + 2 * out_blk + R * Wo * K * csize)
    vmem_limit = int(min(max(2 * est, 32 * 2**20), 64 * 2**20))
    # TODO(synk): if `est` ever exceeds the 64 MiB v7x budget (huge H*W*cin),
    # switch xs to halo row-strips with manual make_async_copy double-buffering.

    def call(single_buffer_weights):
        wkw = dict(pipeline_mode=pl.Buffered(1)) if single_buffer_weights else {}
        out = pl.pallas_call(
            _convblock_kernel,
            out_shape=jax.ShapeDtypeStruct((N, Ho, Wo, cout), x_nchw.dtype),
            grid=(N, n_chunks),
            in_specs=[
                pl.BlockSpec((1, pool, H + 2, Wo + 2, cin),
                             lambda n, r: (n, 0, 0, 0, 0)),
                pl.BlockSpec((K, cout), lambda n, r: (0, 0), **wkw),
                pl.BlockSpec((1, cout), lambda n, r: (0, 0), **wkw),
            ],
            out_specs=pl.BlockSpec((1, rows_blk, Wo, cout),
                                   lambda n, r: (n, r, 0, 0)),
            scratch_shapes=[pltpu.VMEM((R * Wo, K), compute_dtype)],
            compiler_params=pltpu.CompilerParams(
                dimension_semantics=("parallel", "parallel"),
                vmem_limit_bytes=vmem_limit),
        )(xs, wt, shift)
        return jax.block_until_ready(out)

    try:
        out_nhwc = call(True)      # grid-invariant weights single-buffered
    except Exception:              # fallback if BlockSpec pipeline_mode is unavailable
        out_nhwc = call(False)

    # NHWC -> NCHW to match the PyTorch module.  When chaining ConvBlocks (VGG),
    # keep NHWC between layers and transpose only at network boundaries.
    return out_nhwc.transpose(0, 3, 1, 2)


def _reference(x, weight, bias, gamma, beta, mean, var, pool=2, eps=1e-5):
    # Conv2d -> BatchNorm2d(running stats) -> ReLU -> MaxPool2d, f32 reference.
    scale = gamma / jnp.sqrt(var + eps)
    w_f = weight * scale[:, None, None, None]
    shift = scale * (bias - mean) + beta
    y = lax.conv_general_dilated(x, w_f, (1, 1), ((1, 1), (1, 1)),
                                 dimension_numbers=("NCHW", "OIHW", "NCHW"))
    y = y + shift[None, :, None, None]
    y = jnp.maximum(y, 0.0)
    if pool > 1:
        y = lax.reduce_window(y, -jnp.inf, lax.max,
                              (1, 1, pool, pool), (1, 1, pool, pool), "VALID")
    return y


if __name__ == "__main__":
    # conv_params = (input_channels=4, output_channels=8, max_pool_size=2, batch_norm=True)
    N, cin, H, W = 2, 4, 16, 16
    cout, pool = 8, 2

    key = jax.random.PRNGKey(0)
    kx, kw, kb, kg, kbeta, km, kv = jax.random.split(key, 7)

    x = jax.random.normal(kx, (N, cin, H, W), jnp.float32)
    fan_in = cin * 3 * 3
    bound = 1.0 / (fan_in ** 0.5)
    weight = jax.random.uniform(kw, (cout, cin, 3, 3), jnp.float32, -bound, bound)
    bias = jax.random.uniform(kb, (cout,), jnp.float32, -bound, bound)
    gamma = 1.0 + 0.1 * jax.random.normal(kg, (cout,), jnp.float32)
    beta = 0.1 * jax.random.normal(kbeta, (cout,), jnp.float32)
    run_mean = 0.1 * jax.random.normal(km, (cout,), jnp.float32)
    run_var = 1.0 + 0.1 * jax.random.uniform(kv, (cout,), jnp.float32)

    out = conv_block(x, weight, bias, gamma, beta, run_mean, run_var, pool=pool)
    out = jax.block_until_ready(out)

    ref = _reference(x, weight, bias, gamma, beta, run_mean, run_var, pool=pool)
    assert out.shape == (N, cout, H // pool, W // pool), out.shape
    # bf16 MXU operands with f32 accumulation: compare against the f32 reference
    # with a tolerance consistent with bf16 input rounding (~1e-3 here).
    assert jnp.allclose(out, ref, atol=3e-2, rtol=3e-2), (
        float(jnp.max(jnp.abs(out - ref))))

    print("KERNEL_OK")
</pallas_src>

<mosaic_0001>
module attributes {stable_mosaic.version = 11 : i64} {
  func.func @_convblock_kernel(%arg0: i32, %arg1: i32, %arg2: memref<1x2x18x10x4xbf16, #tpu.memory_space<vmem>>, %arg3: memref<36x8xbf16, #tpu.memory_space<vmem>>, %arg4: memref<1x8xf32, #tpu.memory_space<vmem>>, %arg5: memref<1x8x8x8xf32, #tpu.memory_space<vmem>>, %arg6: memref<32x36xbf16, #tpu.memory_space<vmem>>) attributes {dimension_semantics = [#tpu.dimension_semantics<parallel>, #tpu.dimension_semantics<parallel>], iteration_bounds = array<i64: 2, 1>, scalar_prefetch = 0 : i64, scratch_operands = 1 : i64, tpu.core_type = #tpu.core_type<tc>, window_params = [{transform_indices = @transform_0, window_bounds = array<i64: 1, 2, 18, 10, 4>}, {pipeline_mode = #tpu.pipeline_mode<synchronous>, transform_indices = @transform_1, window_bounds = array<i64: 36, 8>}, {pipeline_mode = #tpu.pipeline_mode<synchronous>, transform_indices = @transform_2, window_bounds = array<i64: 1, 8>}, {transform_indices = @transform_3, window_bounds = array<i64: 1, 8, 8, 8>}]} {
    %c0_i32 = arith.constant 0 : i32
    %c8_i32 = arith.constant 8 : i32
    %0 = arith.addi %c0_i32, %c8_i32 : i32
    %c1_i32 = arith.constant 1 : i32
    scf.for %arg7 = %c0_i32 to %0 step %c1_i32  : i32 {
      %c8_i32_1 = arith.constant 8 : i32
      %1 = arith.muli %arg1, %c8_i32_1 : i32
      %2 = arith.addi %1, %arg7 : i32
      %c2_i32 = arith.constant 2 : i32
      %3 = arith.muli %2, %c2_i32 : i32
      %c0_i32_2 = arith.constant 0 : i32
      %4 = arith.addi %3, %c0_i32_2 : i32
      %c0_i32_3 = arith.constant 0 : i32
      %5 = arith.addi %4, %c0_i32_3 : i32
      %c0 = arith.constant 0 : index
      %c1 = arith.constant 1 : index
      %6 = arith.index_cast %5 : i32 to index
      %c0_4 = arith.constant 0 : index
      %c0_5 = arith.constant 0 : index
      %7 = vector.load %arg2[%c0, %c1, %6, %c0_4, %c0_5] : memref<1x2x18x10x4xbf16, #tpu.memory_space<vmem>>, vector<1x1x1x8x4xbf16>
      %8 = vector.shape_cast %7 : vector<1x1x1x8x4xbf16> to vector<8x4xbf16>
      %c0_6 = arith.constant 0 : index
      %c0_7 = arith.constant 0 : index
      %9 = vector.load %arg6[%c0_6, %c0_7] : memref<32x36xbf16, #tpu.memory_space<vmem>>, vector<8x4xbf16>
      tpu.vector_store %arg6[%c0_6, %c0_7], %8 {strides = array<i32>} : memref<32x36xbf16, #tpu.memory_space<vmem>>, vector<8x4xbf16>,
      %c2_i32_8 = arith.constant 2 : i32
      %10 = arith.muli %2, %c2_i32_8 : i32
      %c0_i32_9 = arith.constant 0 : i32
      %11 = arith.addi %10, %c0_i32_9 : i32
      %c0_i32_10 = arith.constant 0 : i32
      %12 = arith.addi %11, %c0_i32_10 : i32
      %c0_11 = arith.constant 0 : index
      %c0_12 = arith.constant 0 : index
      %13 = arith.index_cast %12 : i32 to index
      %c1_13 = arith.constant 1 : index
      %c0_14 = arith.constant 0 : index
      %14 = vector.load %arg2[%c0_11, %c0_12, %13, %c1_13, %c0_14] : memref<1x2x18x10x4xbf16, #tpu.memory_space<vmem>>, vector<1x1x1x8x4xbf16>
      %15 = vector.shape_cast %14 : vector<1x1x1x8x4xbf16> to vector<8x4xbf16>
      %c0_15 = arith.constant 0 : index
      %c4 = arith.constant 4 : index
      %16 = vector.load %arg6[%c0_15, %c4] : memref<32x36xbf16, #tpu.memory_space<vmem>>, vector<8x4xbf16>
      tpu.vector_store %arg6[%c0_15, %c4], %15 {strides = array<i32>} : memref<32x36xbf16, #tpu.memory_space<vmem>>, vector<8x4xbf16>,
      %c2_i32_16 = arith.constant 2 : i32
      %17 = arith.muli %2, %c2_i32_16 : i32
      %c0_i32_17 = arith.constant 0 : i32
      %18 = arith.addi %17, %c0_i32_17 : i32
      %c0_i32_18 = arith.constant 0 : i32
      %19 = arith.addi %18, %c0_i32_18 : i32
      %c0_19 = arith.constant 0 : index
      %c1_20 = arith.constant 1 : index
      %20 = arith.index_cast %19 : i32 to index
      %c1_21 = arith.constant 1 : index
      %c0_22 = arith.constant 0 : index
      %21 = vector.load %arg2[%c0_19, %c1_20, %20, %c1_21, %c0_22] : memref<1x2x18x10x4xbf16, #tpu.memory_space<vmem>>, vector<1x1x1x8x4xbf16>
      %22 = vector.shape_cast %21 : vector<1x1x1x8x4xbf16> to vector<8x4xbf16>
      %c0_23 = arith.constant 0 : index
      %c8 = arith.constant 8 : index
      %23 = vector.load %arg6[%c0_23, %c8] : memref<32x36xbf16, #tpu.memory_space<vmem>>, vector<8x4xbf16>
      tpu.vector_store %arg6[%c0_23, %c8], %22 {strides = array<i32>} : memref<32x36xbf16, #tpu.memory_space<vmem>>, vector<8x4xbf16>,
      %c2_i32_24 = arith.constant 2 : i32
      %24 = arith.muli %2, %c2_i32_24 : i32
      %c0_i32_25 = arith.constant 0 : i32
      %25 = arith.addi %24, %c0_i32_25 : i32
      %c1_i32_26 = arith.constant 1 : i32
      %26 = arith.addi %25, %c1_i32_26 : i32
      %c0_27 = arith.constant 0 : index
      %c1_28 = arith.constant 1 : index
      %27 = arith.index_cast %26 : i32 to index
      %c0_29 = arith.constant 0 : index
      %c0_30 = arith.constant 0 : index
      %28 = vector.load %arg2[%c0_27, %c1_28, %27, %c0_29, %c0_30] : memref<1x2x18x10x4xbf16, #tpu.memory_space<vmem>>, vector<1x1x1x8x4xbf16>
      %29 = vector.shape_cast %28 : vector<1x1x1x8x4xbf16> to vector<8x4xbf16>
      %c0_31 = arith.constant 0 : index
      %c12 = arith.constant 12 : index
      %30 = vector.load %arg6[%c0_31, %c12] : memref<32x36xbf16, #tpu.memory_space<vmem>>, vector<8x4xbf16>
      tpu.vector_store %arg6[%c0_31, %c12], %29 {strides = array<i32>} : memref<32x36xbf16, #tpu.memory_space<vmem>>, vector<8x4xbf16>,
      %c2_i32_32 = arith.constant 2 : i32
      %31 = arith.muli %2, %c2_i32_32 : i32
      %c0_i32_33 = arith.constant 0 : i32
      %32 = arith.addi %31, %c0_i32_33 : i32
      %c1_i32_34 = arith.constant 1 : i32
      %33 = arith.addi %32, %c1_i32_34 : i32
      %c0_35 = arith.constant 0 : index
      %c0_36 = arith.constant 0 : index
      %34 = arith.index_cast %33 : i32 to index
      %c1_37 = arith.constant 1 : index
      %c0_38 = arith.constant 0 : index
      %35 = vector.load %arg2[%c0_35, %c0_36, %34, %c1_37, %c0_38] : memref<1x2x18x10x4xbf16, #tpu.memory_space<vmem>>, vector<1x1x1x8x4xbf16>
      %36 = vector.shape_cast %35 : vector<1x1x1x8x4xbf16> to vector<8x4xbf16>
      %c0_39 = arith.constant 0 : index
      %c16 = arith.constant 16 : index
      %37 = vector.load %arg6[%c0_39, %c16] : memref<32x36xbf16, #tpu.memory_space<vmem>>, vector<8x4xbf16>
      tpu.vector_store %arg6[%c0_39, %c16], %36 {strides = array<i32>} : memref<32x36xbf16, #tpu.memory_space<vmem>>, vector<8x4xbf16>,
      %c2_i32_40 = arith.constant 2 : i32
      %38 = arith.muli %2, %c2_i32_40 : i32
      %c0_i32_41 = arith.constant 0 : i32
      %39 = arith.addi %38, %c0_i32_41 : i32
      %c1_i32_42 = arith.constant 1 : i32
      %40 = arith.addi %39, %c1_i32_42 : i32
      %c0_43 = arith.constant 0 : index
      %c1_44 = arith.constant 1 : index
      %41 = arith.index_cast %40 : i32 to index
      %c1_45 = arith.constant 1 : index
      %c0_46 = arith.constant 0 : index
      %42 = vector.load %arg2[%c0_43, %c1_44, %41, %c1_45, %c0_46] : memref<1x2x18x10x4xbf16, #tpu.memory_space<vmem>>, vector<1x1x1x8x4xbf16>
      %43 = vector.shape_cast %42 : vector<1x1x1x8x4xbf16> to vector<8x4xbf16>
      %c0_47 = arith.constant 0 : index
      %c20 = arith.constant 20 : index
      %44 = vector.load %arg6[%c0_47, %c20] : memref<32x36xbf16, #tpu.memory_space<vmem>>, vector<8x4xbf16>
      tpu.vector_store %arg6[%c0_47, %c20], %43 {strides = array<i32>} : memref<32x36xbf16, #tpu.memory_space<vmem>>, vector<8x4xbf16>,
      %c2_i32_48 = arith.constant 2 : i32
      %45 = arith.muli %2, %c2_i32_48 : i32
      %c0_i32_49 = arith.constant 0 : i32
      %46 = arith.addi %45, %c0_i32_49 : i32
      %c2_i32_50 = arith.constant 2 : i32
      %47 = arith.addi %46, %c2_i32_50 : i32
      %c0_51 = arith.constant 0 : index
      %c1_52 = arith.constant 1 : index
      %48 = arith.index_cast %47 : i32 to index
      %c0_53 = arith.constant 0 : index
      %c0_54 = arith.constant 0 : index
      %49 = vector.load %arg2[%c0_51, %c1_52, %48, %c0_53, %c0_54] : memref<1x2x18x10x4xbf16, #tpu.memory_space<vmem>>, vector<1x1x1x8x4xbf16>
      %50 = vector.shape_cast %49 : vector<1x1x1x8x4xbf16> to vector<8x4xbf16>
      %c0_55 = arith.constant 0 : index
      %c24 = arith.constant 24 : index
      %51 = vector.load %arg6[%c0_55, %c24] : memref<32x36xbf16, #tpu.memory_space<vmem>>, vector<8x4xbf16>
      tpu.vector_store %arg6[%c0_55, %c24], %50 {strides = array<i32>} : memref<32x36xbf16, #tpu.memory_space<vmem>>, vector<8x4xbf16>,
      %c2_i32_56 = arith.constant 2 : i32
      %52 = arith.muli %2, %c2_i32_56 : i32
      %c0_i32_57 = arith.constant 0 : i32
      %53 = arith.addi %52, %c0_i32_57 : i32
      %c2_i32_58 = arith.constant 2 : i32
      %54 = arith.addi %53, %c2_i32_58 : i32
      %c0_59 = arith.constant 0 : index
      %c0_60 = arith.constant 0 : index
      %55 = arith.index_cast %54 : i32 to index
      %c1_61 = arith.constant 1 : index
      %c0_62 = arith.constant 0 : index
      %56 = vector.load %arg2[%c0_59, %c0_60, %55, %c1_61, %c0_62] : memref<1x2x18x10x4xbf16, #tpu.memory_space<vmem>>, vector<1x1x1x8x4xbf16>
      %57 = vector.shape_cast %56 : vector<1x1x1x8x4xbf16> to vector<8x4xbf16>
      %c0_63 = arith.constant 0 : index
      %c28 = arith.constant 28 : index
      %58 = vector.load %arg6[%c0_63, %c28] : memref<32x36xbf16, #tpu.memory_space<vmem>>, vector<8x4xbf16>
      tpu.vector_store %arg6[%c0_63, %c28], %57 {strides = array<i32>} : memref<32x36xbf16, #tpu.memory_space<vmem>>, vector<8x4xbf16>,
      %c2_i32_64 = arith.constant 2 : i32
      %59 = arith.muli %2, %c2_i32_64 : i32
      %c0_i32_65 = arith.constant 0 : i32
      %60 = arith.addi %59, %c0_i32_65 : i32
      %c2_i32_66 = arith.constant 2 : i32
      %61 = arith.addi %60, %c2_i32_66 : i32
      %c0_67 = arith.constant 0 : index
      %c1_68 = arith.constant 1 : index
      %62 = arith.index_cast %61 : i32 to index
      %c1_69 = arith.constant 1 : index
      %c0_70 = arith.constant 0 : index
      %63 = vector.load %arg2[%c0_67, %c1_68, %62, %c1_69, %c0_70] : memref<1x2x18x10x4xbf16, #tpu.memory_space<vmem>>, vector<1x1x1x8x4xbf16>
      %64 = vector.shape_cast %63 : vector<1x1x1x8x4xbf16> to vector<8x4xbf16>
      %c0_71 = arith.constant 0 : index
      %c32 = arith.constant 32 : index
      %65 = vector.load %arg6[%c0_71, %c32] : memref<32x36xbf16, #tpu.memory_space<vmem>>, vector<8x4xbf16>
      tpu.vector_store %arg6[%c0_71, %c32], %64 {strides = array<i32>} : memref<32x36xbf16, #tpu.memory_space<vmem>>, vector<8x4xbf16>,
      %c2_i32_72 = arith.constant 2 : i32
      %66 = arith.muli %2, %c2_i32_72 : i32
      %c0_i32_73 = arith.constant 0 : i32
      %67 = arith.addi %66, %c0_i32_73 : i32
      %c0_i32_74 = arith.constant 0 : i32
      %68 = arith.addi %67, %c0_i32_74 : i32
      %c0_75 = arith.constant 0 : index
      %c0_76 = arith.constant 0 : index
      %69 = arith.index_cast %68 : i32 to index
      %c1_77 = arith.constant 1 : index
      %c0_78 = arith.constant 0 : index
      %70 = vector.load %arg2[%c0_75, %c0_76, %69, %c1_77, %c0_78] : memref<1x2x18x10x4xbf16, #tpu.memory_space<vmem>>, vector<1x1x1x8x4xbf16>
      %71 = vector.shape_cast %70 : vector<1x1x1x8x4xbf16> to vector<8x4xbf16>
      %c8_79 = arith.constant 8 : index
      %c0_80 = arith.constant 0 : index
      %72 = vector.load %arg6[%c8_79, %c0_80] : memref<32x36xbf16, #tpu.memory_space<vmem>>, vector<8x4xbf16>
      tpu.vector_store %arg6[%c8_79, %c0_80], %71 {strides = array<i32>} : memref<32x36xbf16, #tpu.memory_space<vmem>>, vector<8x4xbf16>,
      %c2_i32_81 = arith.constant 2 : i32
      %73 = arith.muli %2, %c2_i32_81 : i32
      %c0_i32_82 = arith.constant 0 : i32
      %74 = arith.addi %73, %c0_i32_82 : i32
      %c0_i32_83 = arith.constant 0 : i32
      %75 = arith.addi %74, %c0_i32_83 : i32
      %c0_84 = arith.constant 0 : index
      %c1_85 = arith.constant 1 : index
      %76 = arith.index_cast %75 : i32 to index
      %c1_86 = arith.constant 1 : index
      %c0_87 = arith.constant 0 : index
      %77 = vector.load %arg2[%c0_84, %c1_85, %76, %c1_86, %c0_87] : memref<1x2x18x10x4xbf16, #tpu.memory_space<vmem>>, vector<1x1x1x8x4xbf16>
      %78 = vector.shape_cast %77 : vector<1x1x1x8x4xbf16> to vector<8x4xbf16>
      %c8_88 = arith.constant 8 : index
      %c4_89 = arith.constant 4 : index
      %79 = vector.load %arg6[%c8_88, %c4_89] : memref<32x36xbf16, #tpu.memory_space<vmem>>, vector<8x4xbf16>
      tpu.vector_store %arg6[%c8_88, %c4_89], %78 {strides = array<i32>} : memref<32x36xbf16, #tpu.memory_space<vmem>>, vector<8x4xbf16>,
      %c2_i32_90 = arith.constant 2 : i32
      %80 = arith.muli %2, %c2_i32_90 : i32
      %c0_i32_91 = arith.constant 0 : i32
      %81 = arith.addi %80, %c0_i32_91 : i32
      %c0_i32_92 = arith.constant 0 : i32
      %82 = arith.addi %81, %c0_i32_92 : i32
      %c0_93 = arith.constant 0 : index
      %c0_94 = arith.constant 0 : index
      %83 = arith.index_cast %82 : i32 to index
      %c2 = arith.constant 2 : index
      %c0_95 = arith.constant 0 : index
      %84 = vector.load %arg2[%c0_93, %c0_94, %83, %c2, %c0_95] : memref<1x2x18x10x4xbf16, #tpu.memory_space<vmem>>, vector<1x1x1x8x4xbf16>
      %85 = vector.shape_cast %84 : vector<1x1x1x8x4xbf16> to vector<8x4xbf16>
      %c8_96 = arith.constant 8 : index
      %c8_97 = arith.constant 8 : index
      %86 = vector.load %arg6[%c8_96, %c8_97] : memref<32x36xbf16, #tpu.memory_space<vmem>>, vector<8x4xbf16>
      tpu.vector_store %arg6[%c8_96, %c8_97], %85 {strides = array<i32>} : memref<32x36xbf16, #tpu.memory_space<vmem>>, vector<8x4xbf16>,
      %c2_i32_98 = arith.constant 2 : i32
      %87 = arith.muli %2, %c2_i32_98 : i32
      %c0_i32_99 = arith.constant 0 : i32
      %88 = arith.addi %87, %c0_i32_99 : i32
      %c1_i32_100 = arith.constant 1 : i32
      %89 = arith.addi %88, %c1_i32_100 : i32
      %c0_101 = arith.constant 0 : index
      %c0_102 = arith.constant 0 : index
      %90 = arith.index_cast %89 : i32 to index
      %c1_103 = arith.constant 1 : index
      %c0_104 = arith.constant 0 : index
      %91 = vector.load %arg2[%c0_101, %c0_102, %90, %c1_103, %c0_104] : memref<1x2x18x10x4xbf16, #tpu.memory_space<vmem>>, vector<1x1x1x8x4xbf16>
      %92 = vector.shape_cast %91 : vector<1x1x1x8x4xbf16> to vector<8x4xbf16>
      %c8_105 = arith.constant 8 : index
      %c12_106 = arith.constant 12 : index
      %93 = vector.load %arg6[%c8_105, %c12_106] : memref<32x36xbf16, #tpu.memory_space<vmem>>, vector<8x4xbf16>
      tpu.vector_store %arg6[%c8_105, %c12_106], %92 {strides = array<i32>} : memref<32x36xbf16, #tpu.memory_space<vmem>>, vector<8x4xbf16>,
      %c2_i32_107 = arith.constant 2 : i32
      %94 = arith.muli %2, %c2_i32_107 : i32
      %c0_i32_108 = arith.constant 0 : i32
      %95 = arith.addi %94, %c0_i32_108 : i32
      %c1_i32_109 = arith.constant 1 : i32
      %96 = arith.addi %95, %c1_i32_109 : i32
      %c0_110 = arith.constant 0 : index
      %c1_111 = arith.constant 1 : index
      %97 = arith.index_cast %96 : i32 to index
      %c1_112 = arith.constant 1 : index
      %c0_113 = arith.constant 0 : index
      %98 = vector.load %arg2[%c0_110, %c1_111, %97, %c1_112, %c0_113] : memref<1x2x18x10x4xbf16, #tpu.memory_space<vmem>>, vector<1x1x1x8x4xbf16>
      %99 = vector.shape_cast %98 : vector<1x1x1x8x4xbf16> to vector<8x4xbf16>
      %c8_114 = arith.constant 8 : index
      %c16_115 = arith.constant 16 : index
      %100 = vector.load %arg6[%c8_114, %c16_115] : memref<32x36xbf16, #tpu.memory_space<vmem>>, vector<8x4xbf16>
      tpu.vector_store %arg6[%c8_114, %c16_115], %99 {strides = array<i32>} : memref<32x36xbf16, #tpu.memory_space<vmem>>, vector<8x4xbf16>,
      %c2_i32_116 = arith.constant 2 : i32
      %101 = arith.muli %2, %c2_i32_116 : i32
      %c0_i32_117 = arith.constant 0 : i32
      %102 = arith.addi %101, %c0_i32_117 : i32
      %c1_i32_118 = arith.constant 1 : i32
      %103 = arith.addi %102, %c1_i32_118 : i32
      %c0_119 = arith.constant 0 : index
      %c0_120 = arith.constant 0 : index
      %104 = arith.index_cast %103 : i32 to index
      %c2_121 = arith.constant 2 : index
      %c0_122 = arith.constant 0 : index
      %105 = vector.load %arg2[%c0_119, %c0_120, %104, %c2_121, %c0_122] : memref<1x2x18x10x4xbf16, #tpu.memory_space<vmem>>, vector<1x1x1x8x4xbf16>
      %106 = vector.shape_cast %105 : vector<1x1x1x8x4xbf16> to vector<8x4xbf16>
      %c8_123 = arith.constant 8 : index
      %c20_124 = arith.constant 20 : index
      %107 = vector.load %arg6[%c8_123, %c20_124] : memref<32x36xbf16, #tpu.memory_space<vmem>>, vector<8x4xbf16>
      tpu.vector_store %arg6[%c8_123, %c20_124], %106 {strides = array<i32>} : memref<32x36xbf16, #tpu.memory_space<vmem>>, vector<8x4xbf16>,
      %c2_i32_125 = arith.constant 2 : i32
      %108 = arith.muli %2, %c2_i32_125 : i32
      %c0_i32_126 = arith.constant 0 : i32
      %109 = arith.addi %108, %c0_i32_126 : i32
      %c2_i32_127 = arith.constant 2 : i32
      %110 = arith.addi %109, %c2_i32_127 : i32
      %c0_128 = arith.constant 0 : index
      %c0_129 = arith.constant 0 : index
      %111 = arith.index_cast %110 : i32 to index
      %c1_130 = arith.constant 1 : index
      %c0_131 = arith.constant 0 : index
      %112 = vector.load %arg2[%c0_128, %c0_129, %111, %c1_130, %c0_131] : memref<1x2x18x10x4xbf16, #tpu.memory_space<vmem>>, vector<1x1x1x8x4xbf16>
      %113 = vector.shape_cast %112 : vector<1x1x1x8x4xbf16> to vector<8x4xbf16>
      %c8_132 = arith.constant 8 : index
      %c24_133 = arith.constant 24 : index
      %114 = vector.load %arg6[%c8_132, %c24_133] : memref<32x36xbf16, #tpu.memory_space<vmem>>, vector<8x4xbf16>
      tpu.vector_store %arg6[%c8_132, %c24_133], %113 {strides = array<i32>} : memref<32x36xbf16, #tpu.memory_space<vmem>>, vector<8x4xbf16>,
      %c2_i32_134 = arith.constant 2 : i32
      %115 = arith.muli %2, %c2_i32_134 : i32
      %c0_i32_135 = arith.constant 0 : i32
      %116 = arith.addi %115, %c0_i32_135 : i32
      %c2_i32_136 = arith.constant 2 : i32
      %117 = arith.addi %116, %c2_i32_136 : i32
      %c0_137 = arith.constant 0 : index
      %c1_138 = arith.constant 1 : index
      %118 = arith.index_cast %117 : i32 to index
      %c1_139 = arith.constant 1 : index
      %c0_140 = arith.constant 0 : index
      %119 = vector.load %arg2[%c0_137, %c1_138, %118, %c1_139, %c0_140] : memref<1x2x18x10x4xbf16, #tpu.memory_space<vmem>>, vector<1x1x1x8x4xbf16>
      %120 = vector.shape_cast %119 : vector<1x1x1x8x4xbf16> to vector<8x4xbf16>
      %c8_141 = arith.constant 8 : index
      %c28_142 = arith.constant 28 : index
      %121 = vector.load %arg6[%c8_141, %c28_142] : memref<32x36xbf16, #tpu.memory_space<vmem>>, vector<8x4xbf16>
      tpu.vector_store %arg6[%c8_141, %c28_142], %120 {strides = array<i32>} : memref<32x36xbf16, #tpu.memory_space<vmem>>, vector<8x4xbf16>,
      %c2_i32_143 = arith.constant 2 : i32
      %122 = arith.muli %2, %c2_i32_143 : i32
      %c0_i32_144 = arith.constant 0 : i32
      %123 = arith.addi %122, %c0_i32_144 : i32
      %c2_i32_145 = arith.constant 2 : i32
      %124 = arith.addi %123, %c2_i32_145 : i32
      %c0_146 = arith.constant 0 : index
      %c0_147 = arith.constant 0 : index
      %125 = arith.index_cast %124 : i32 to index
      %c2_148 = arith.constant 2 : index
      %c0_149 = arith.constant 0 : index
      %126 = vector.load %arg2[%c0_146, %c0_147, %125, %c2_148, %c0_149] : memref<1x2x18x10x4xbf16, #tpu.memory_space<vmem>>, vector<1x1x1x8x4xbf16>
      %127 = vector.shape_cast %126 : vector<1x1x1x8x4xbf16> to vector<8x4xbf16>
      %c8_150 = arith.constant 8 : index
      %c32_151 = arith.constant 32 : index
      %128 = vector.load %arg6[%c8_150, %c32_151] : memref<32x36xbf16, #tpu.memory_space<vmem>>, vector<8x4xbf16>
      tpu.vector_store %arg6[%c8_150, %c32_151], %127 {strides = array<i32>} : memref<32x36xbf16, #tpu.memory_space<vmem>>, vector<8x4xbf16>,
      %c2_i32_152 = arith.constant 2 : i32
      %129 = arith.muli %2, %c2_i32_152 : i32
      %c1_i32_153 = arith.constant 1 : i32
      %130 = arith.addi %129, %c1_i32_153 : i32
      %c0_i32_154 = arith.constant 0 : i32
      %131 = arith.addi %130, %c0_i32_154 : i32
      %c0_155 = arith.constant 0 : index
      %c1_156 = arith.constant 1 : index
      %132 = arith.index_cast %131 : i32 to index
      %c0_157 = arith.constant 0 : index
      %c0_158 = arith.constant 0 : index
      %133 = vector.load %arg2[%c0_155, %c1_156, %132, %c0_157, %c0_158] : memref<1x2x18x10x4xbf16, #tpu.memory_space<vmem>>, vector<1x1x1x8x4xbf16>
      %134 = vector.shape_cast %133 : vector<1x1x1x8x4xbf16> to vector<8x4xbf16>
      %c16_159 = arith.constant 16 : index
      %c0_160 = arith.constant 0 : index
      %135 = vector.load %arg6[%c16_159, %c0_160] : memref<32x36xbf16, #tpu.memory_space<vmem>>, vector<8x4xbf16>
      tpu.vector_store %arg6[%c16_159, %c0_160], %134 {strides = array<i32>} : memref<32x36xbf16, #tpu.memory_space<vmem>>, vector<8x4xbf16>,
      %c2_i32_161 = arith.constant 2 : i32
      %136 = arith.muli %2, %c2_i32_161 : i32
      %c1_i32_162 = arith.constant 1 : i32
      %137 = arith.addi %136, %c1_i32_162 : i32
      %c0_i32_163 = arith.constant 0 : i32
      %138 = arith.addi %137, %c0_i32_163 : i32
      %c0_164 = arith.constant 0 : index
      %c0_165 = arith.constant 0 : index
      %139 = arith.index_cast %138 : i32 to index
      %c1_166 = arith.constant 1 : index
      %c0_167 = arith.constant 0 : index
      %140 = vector.load %arg2[%c0_164, %c0_165, %139, %c1_166, %c0_167] : memref<1x2x18x10x4xbf16, #tpu.memory_space<vmem>>, vector<1x1x1x8x4xbf16>
      %141 = vector.shape_cast %140 : vector<1x1x1x8x4xbf16> to vector<8x4xbf16>
      %c16_168 = arith.constant 16 : index
      %c4_169 = arith.constant 4 : index
      %142 = vector.load %arg6[%c16_168, %c4_169] : memref<32x36xbf16, #tpu.memory_space<vmem>>, vector<8x4xbf16>
      tpu.vector_store %arg6[%c16_168, %c4_169], %141 {strides = array<i32>} : memref<32x36xbf16, #tpu.memory_space<vmem>>, vector<8x4xbf16>,
      %c2_i32_170 = arith.constant 2 : i32
      %143 = arith.muli %2, %c2_i32_170 : i32
      %c1_i32_171 = arith.constant 1 : i32
      %144 = arith.addi %143, %c1_i32_171 : i32
      %c0_i32_172 = arith.constant 0 : i32
      %145 = arith.addi %144, %c0_i32_172 : i32
      %c0_173 = arith.constant 0 : index
      %c1_174 = arith.constant 1 : index
      %146 = arith.index_cast %145 : i32 to index
      %c1_175 = arith.constant 1 : index
      %c0_176 = arith.constant 0 : index
      %147 = vector.load %arg2[%c0_173, %c1_174, %146, %c1_175, %c0_176] : memref<1x2x18x10x4xbf16, #tpu.memory_space<vmem>>, vector<1x1x1x8x4xbf16>
      %148 = vector.shape_cast %147 : vector<1x1x1x8x4xbf16> to vector<8x4xbf16>
      %c16_177 = arith.constant 16 : index
      %c8_178 = arith.constant 8 : index
      %149 = vector.load %arg6[%c16_177, %c8_178] : memref<32x36xbf16, #tpu.memory_space<vmem>>, vector<8x4xbf16>
      tpu.vector_store %arg6[%c16_177, %c8_178], %148 {strides = array<i32>} : memref<32x36xbf16, #tpu.memory_space<vmem>>, vector<8x4xbf16>,
      %c2_i32_179 = arith.constant 2 : i32
      %150 = arith.muli %2, %c2_i32_179 : i32
      %c1_i32_180 = arith.constant 1 : i32
      %151 = arith.addi %150, %c1_i32_180 : i32
      %c1_i32_181 = arith.constant 1 : i32
      %152 = arith.addi %151, %c1_i32_181 : i32
      %c0_182 = arith.constant 0 : index
      %c1_183 = arith.constant 1 : index
      %153 = arith.index_cast %152 : i32 to index
      %c0_184 = arith.constant 0 : index
      %c0_185 = arith.constant 0 : index
      %154 = vector.load %arg2[%c0_182, %c1_183, %153, %c0_184, %c0_185] : memref<1x2x18x10x4xbf16, #tpu.memory_space<vmem>>, vector<1x1x1x8x4xbf16>
      %155 = vector.shape_cast %154 : vector<1x1x1x8x4xbf16> to vector<8x4xbf16>
      %c16_186 = arith.constant 16 : index
      %c12_187 = arith.constant 12 : index
      %156 = vector.load %arg6[%c16_186, %c12_187] : memref<32x36xbf16, #tpu.memory_space<vmem>>, vector<8x4xbf16>
      tpu.vector_store %arg6[%c16_186, %c12_187], %155 {strides = array<i32>} : memref<32x36xbf16, #tpu.memory_space<vmem>>, vector<8x4xbf16>,
      %c2_i32_188 = arith.constant 2 : i32
      %157 = arith.muli %2, %c2_i32_188 : i32
      %c1_i32_189 = arith.constant 1 : i32
      %158 = arith.addi %157, %c1_i32_189 : i32
      %c1_i32_190 = arith.constant 1 : i32
      %159 = arith.addi %158, %c1_i32_190 : i32
      %c0_191 = arith.constant 0 : index
      %c0_192 = arith.constant 0 : index
      %160 = arith.index_cast %159 : i32 to index
      %c1_193 = arith.constant 1 : index
      %c0_194 = arith.constant 0 : index
      %161 = vector.load %arg2[%c0_191, %c0_192, %160, %c1_193, %c0_194] : memref<1x2x18x10x4xbf16, #tpu.memory_space<vmem>>, vector<1x1x1x8x4xbf16>
      %162 = vector.shape_cast %161 : vector<1x1x1x8x4xbf16> to vector<8x4xbf16>
      %c16_195 = arith.constant 16 : index
      %c16_196 = arith.constant 16 : index
      %163 = vector.load %arg6[%c16_195, %c16_196] : memref<32x36xbf16, #tpu.memory_space<vmem>>, vector<8x4xbf16>
      tpu.vector_store %arg6[%c16_195, %c16_196], %162 {strides = array<i32>} : memref<32x36xbf16, #tpu.memory_space<vmem>>, vector<8x4xbf16>,
      %c2_i32_197 = arith.constant 2 : i32
      %164 = arith.muli %2, %c2_i32_197 : i32
      %c1_i32_198 = arith.constant 1 : i32
      %165 = arith.addi %164, %c1_i32_198 : i32
      %c1_i32_199 = arith.constant 1 : i32
      %166 = arith.addi %165, %c1_i32_199 : i32
      %c0_200 = arith.constant 0 : index
      %c1_201 = arith.constant 1 : index
      %167 = arith.index_cast %166 : i32 to index
      %c1_202 = arith.constant 1 : index
      %c0_203 = arith.constant 0 : index
      %168 = vector.load %arg2[%c0_200, %c1_201, %167, %c1_202, %c0_203] : memref<1x2x18x10x4xbf16, #tpu.memory_space<vmem>>, vector<1x1x1x8x4xbf16>
      %169 = vector.shape_cast %168 : vector<1x1x1x8x4xbf16> to vector<8x4xbf16>
      %c16_204 = arith.constant 16 : index
      %c20_205 = arith.constant 20 : index
      %170 = vector.load %arg6[%c16_204, %c20_205] : memref<32x36xbf16, #tpu.memory_space<vmem>>, vector<8x4xbf16>
      tpu.vector_store %arg6[%c16_204, %c20_205], %169 {strides = array<i32>} : memref<32x36xbf16, #tpu.memory_space<vmem>>, vector<8x4xbf16>,
      %c2_i32_206 = arith.constant 2 : i32
      %171 = arith.muli %2, %c2_i32_206 : i32
      %c1_i32_207 = arith.constant 1 : i32
      %172 = arith.addi %171, %c1_i32_207 : i32
      %c2_i32_208 = arith.constant 2 : i32
      %173 = arith.addi %172, %c2_i32_208 : i32
      %c0_209 = arith.constant 0 : index
      %c1_210 = arith.constant 1 : index
      %174 = arith.index_cast %173 : i32 to index
      %c0_211 = arith.constant 0 : index
      %c0_212 = arith.constant 0 : index
      %175 = vector.load %arg2[%c0_209, %c1_210, %174, %c0_211, %c0_212] : memref<1x2x18x10x4xbf16, #tpu.memory_space<vmem>>, vector<1x1x1x8x4xbf16>
      %176 = vector.shape_cast %175 : vector<1x1x1x8x4xbf16> to vector<8x4xbf16>
      %c16_213 = arith.constant 16 : index
      %c24_214 = arith.constant 24 : index
      %177 = vector.load %arg6[%c16_213, %c24_214] : memref<32x36xbf16, #tpu.memory_space<vmem>>, vector<8x4xbf16>
      tpu.vector_store %arg6[%c16_213, %c24_214], %176 {strides = array<i32>} : memref<32x36xbf16, #tpu.memory_space<vmem>>, vector<8x4xbf16>,
      %c2_i32_215 = arith.constant 2 : i32
      %178 = arith.muli %2, %c2_i32_215 : i32
      %c1_i32_216 = arith.constant 1 : i32
      %179 = arith.addi %178, %c1_i32_216 : i32
      %c2_i32_217 = arith.constant 2 : i32
      %180 = arith.addi %179, %c2_i32_217 : i32
      %c0_218 = arith.constant 0 : index
      %c0_219 = arith.constant 0 : index
      %181 = arith.index_cast %180 : i32 to index
      %c1_220 = arith.constant 1 : index
      %c0_221 = arith.constant 0 : index
      %182 = vector.load %arg2[%c0_218, %c0_219, %181, %c1_220, %c0_221] : memref<1x2x18x10x4xbf16, #tpu.memory_space<vmem>>, vector<1x1x1x8x4xbf16>
      %183 = vector.shape_cast %182 : vector<1x1x1x8x4xbf16> to vector<8x4xbf16>
      %c16_222 = arith.constant 16 : index
      %c28_223 = arith.constant 28 : index
      %184 = vector.load %arg6[%c16_222, %c28_223] : memref<32x36xbf16, #tpu.memory_space<vmem>>, vector<8x4xbf16>
      tpu.vector_store %arg6[%c16_222, %c28_223], %183 {strides = array<i32>} : memref<32x36xbf16, #tpu.memory_space<vmem>>, vector<8x4xbf16>,
      %c2_i32_224 = arith.constant 2 : i32
      %185 = arith.muli %2, %c2_i32_224 : i32
      %c1_i32_225 = arith.constant 1 : i32
      %186 = arith.addi %185, %c1_i32_225 : i32
      %c2_i32_226 = arith.constant 2 : i32
      %187 = arith.addi %186, %c2_i32_226 : i32
      %c0_227 = arith.constant 0 : index
      %c1_228 = arith.constant 1 : index
      %188 = arith.index_cast %187 : i32 to index
      %c1_229 = arith.constant 1 : index
      %c0_230 = arith.constant 0 : index
      %189 = vector.load %arg2[%c0_227, %c1_228, %188, %c1_229, %c0_230] : memref<1x2x18x10x4xbf16, #tpu.memory_space<vmem>>, vector<1x1x1x8x4xbf16>
      %190 = vector.shape_cast %189 : vector<1x1x1x8x4xbf16> to vector<8x4xbf16>
      %c16_231 = arith.constant 16 : index
      %c32_232 = arith.constant 32 : index
      %191 = vector.load %arg6[%c16_231, %c32_232] : memref<32x36xbf16, #tpu.memory_space<vmem>>, vector<8x4xbf16>
      tpu.vector_store %arg6[%c16_231, %c32_232], %190 {strides = array<i32>} : memref<32x36xbf16, #tpu.memory_space<vmem>>, vector<8x4xbf16>,
      %c2_i32_233 = arith.constant 2 : i32
      %192 = arith.muli %2, %c2_i32_233 : i32
      %c1_i32_234 = arith.constant 1 : i32
      %193 = arith.addi %192, %c1_i32_234 : i32
      %c0_i32_235 = arith.constant 0 : i32
      %194 = arith.addi %193, %c0_i32_235 : i32
      %c0_236 = arith.constant 0 : index
      %c0_237 = arith.constant 0 : index
      %195 = arith.index_cast %194 : i32 to index
      %c1_238 = arith.constant 1 : index
      %c0_239 = arith.constant 0 : index
      %196 = vector.load %arg2[%c0_236, %c0_237, %195, %c1_238, %c0_239] : memref<1x2x18x10x4xbf16, #tpu.memory_space<vmem>>, vector<1x1x1x8x4xbf16>
      %197 = vector.shape_cast %196 : vector<1x1x1x8x4xbf16> to vector<8x4xbf16>
      %c24_240 = arith.constant 24 : index
      %c0_241 = arith.constant 0 : index
      %198 = vector.load %arg6[%c24_240, %c0_241] : memref<32x36xbf16, #tpu.memory_space<vmem>>, vector<8x4xbf16>
      tpu.vector_store %arg6[%c24_240, %c0_241], %197 {strides = array<i32>} : memref<32x36xbf16, #tpu.memory_space<vmem>>, vector<8x4xbf16>,
      %c2_i32_242 = arith.constant 2 : i32
      %199 = arith.muli %2, %c2_i32_242 : i32
      %c1_i32_243 = arith.constant 1 : i32
      %200 = arith.addi %199, %c1_i32_243 : i32
      %c0_i32_244 = arith.constant 0 : i32
      %201 = arith.addi %200, %c0_i32_244 : i32
      %c0_245 = arith.constant 0 : index
      %c1_246 = arith.constant 1 : index
      %202 = arith.index_cast %201 : i32 to index
      %c1_247 = arith.constant 1 : index
      %c0_248 = arith.constant 0 : index
      %203 = vector.load %arg2[%c0_245, %c1_246, %202, %c1_247, %c0_248] : memref<1x2x18x10x4xbf16, #tpu.memory_space<vmem>>, vector<1x1x1x8x4xbf16>
      %204 = vector.shape_cast %203 : vector<1x1x1x8x4xbf16> to vector<8x4xbf16>
      %c24_249 = arith.constant 24 : index
      %c4_250 = arith.constant 4 : index
      %205 = vector.load %arg6[%c24_249, %c4_250] : memref<32x36xbf16, #tpu.memory_space<vmem>>, vector<8x4xbf16>
      tpu.vector_store %arg6[%c24_249, %c4_250], %204 {strides = array<i32>} : memref<32x36xbf16, #tpu.memory_space<vmem>>, vector<8x4xbf16>,
      %c2_i32_251 = arith.constant 2 : i32
      %206 = arith.muli %2, %c2_i32_251 : i32
      %c1_i32_252 = arith.constant 1 : i32
      %207 = arith.addi %206, %c1_i32_252 : i32
      %c0_i32_253 = arith.constant 0 : i32
      %208 = arith.addi %207, %c0_i32_253 : i32
      %c0_254 = arith.constant 0 : index
      %c0_255 = arith.constant 0 : index
      %209 = arith.index_cast %208 : i32 to index
      %c2_256 = arith.constant 2 : index
      %c0_257 = arith.constant 0 : index
      %210 = vector.load %arg2[%c0_254, %c0_255, %209, %c2_256, %c0_257] : memref<1x2x18x10x4xbf16, #tpu.memory_space<vmem>>, vector<1x1x1x8x4xbf16>
      %211 = vector.shape_cast %210 : vector<1x1x1x8x4xbf16> to vector<8x4xbf16>
      %c24_258 = arith.constant 24 : index
      %c8_259 = arith.constant 8 : index
      %212 = vector.load %arg6[%c24_258, %c8_259] : memref<32x36xbf16, #tpu.memory_space<vmem>>, vector<8x4xbf16>
      tpu.vector_store %arg6[%c24_258, %c8_259], %211 {strides = array<i32>} : memref<32x36xbf16, #tpu.memory_space<vmem>>, vector<8x4xbf16>,
      %c2_i32_260 = arith.constant 2 : i32
      %213 = arith.muli %2, %c2_i32_260 : i32
      %c1_i32_261 = arith.constant 1 : i32
      %214 = arith.addi %213, %c1_i32_261 : i32
      %c1_i32_262 = arith.constant 1 : i32
      %215 = arith.addi %214, %c1_i32_262 : i32
      %c0_263 = arith.constant 0 : index
      %c0_264 = arith.constant 0 : index
      %216 = arith.index_cast %215 : i32 to index
      %c1_265 = arith.constant 1 : index
      %c0_266 = arith.constant 0 : index
      %217 = vector.load %arg2[%c0_263, %c0_264, %216, %c1_265, %c0_266] : memref<1x2x18x10x4xbf16, #tpu.memory_space<vmem>>, vector<1x1x1x8x4xbf16>
      %218 = vector.shape_cast %217 : vector<1x1x1x8x4xbf16> to vector<8x4xbf16>
      %c24_267 = arith.constant 24 : index
      %c12_268 = arith.constant 12 : index
      %219 = vector.load %arg6[%c24_267, %c12_268] : memref<32x36xbf16, #tpu.memory_space<vmem>>, vector<8x4xbf16>
      tpu.vector_store %arg6[%c24_267, %c12_268], %218 {strides = array<i32>} : memref<32x36xbf16, #tpu.memory_space<vmem>>, vector<8x4xbf16>,
      %c2_i32_269 = arith.constant 2 : i32
      %220 = arith.muli %2, %c2_i32_269 : i32
      %c1_i32_270 = arith.constant 1 : i32
      %221 = arith.addi %220, %c1_i32_270 : i32
      %c1_i32_271 = arith.constant 1 : i32
      %222 = arith.addi %221, %c1_i32_271 : i32
      %c0_272 = arith.constant 0 : index
      %c1_273 = arith.constant 1 : index
      %223 = arith.index_cast %222 : i32 to index
      %c1_274 = arith.constant 1 : index
      %c0_275 = arith.constant 0 : index
      %224 = vector.load %arg2[%c0_272, %c1_273, %223, %c1_274, %c0_275] : memref<1x2x18x10x4xbf16, #tpu.memory_space<vmem>>, vector<1x1x1x8x4xbf16>
      %225 = vector.shape_cast %224 : vector<1x1x1x8x4xbf16> to vector<8x4xbf16>
      %c24_276 = arith.constant 24 : index
      %c16_277 = arith.constant 16 : index
      %226 = vector.load %arg6[%c24_276, %c16_277] : memref<32x36xbf16, #tpu.memory_space<vmem>>, vector<8x4xbf16>
      tpu.vector_store %arg6[%c24_276, %c16_277], %225 {strides = array<i32>} : memref<32x36xbf16, #tpu.memory_space<vmem>>, vector<8x4xbf16>,
      %c2_i32_278 = arith.constant 2 : i32
      %227 = arith.muli %2, %c2_i32_278 : i32
      %c1_i32_279 = arith.constant 1 : i32
      %228 = arith.addi %227, %c1_i32_279 : i32
      %c1_i32_280 = arith.constant 1 : i32
      %229 = arith.addi %228, %c1_i32_280 : i32
      %c0_281 = arith.constant 0 : index
      %c0_282 = arith.constant 0 : index
      %230 = arith.index_cast %229 : i32 to index
      %c2_283 = arith.constant 2 : index
      %c0_284 = arith.constant 0 : index
      %231 = vector.load %arg2[%c0_281, %c0_282, %230, %c2_283, %c0_284] : memref<1x2x18x10x4xbf16, #tpu.memory_space<vmem>>, vector<1x1x1x8x4xbf16>
      %232 = vector.shape_cast %231 : vector<1x1x1x8x4xbf16> to vector<8x4xbf16>
      %c24_285 = arith.constant 24 : index
      %c20_286 = arith.constant 20 : index
      %233 = vector.load %arg6[%c24_285, %c20_286] : memref<32x36xbf16, #tpu.memory_space<vmem>>, vector<8x4xbf16>
      tpu.vector_store %arg6[%c24_285, %c20_286], %232 {strides = array<i32>} : memref<32x36xbf16, #tpu.memory_space<vmem>>, vector<8x4xbf16>,
      %c2_i32_287 = arith.constant 2 : i32
      %234 = arith.muli %2, %c2_i32_287 : i32
      %c1_i32_288 = arith.constant 1 : i32
      %235 = arith.addi %234, %c1_i32_288 : i32
      %c2_i32_289 = arith.constant 2 : i32
      %236 = arith.addi %235, %c2_i32_289 : i32
      %c0_290 = arith.constant 0 : index
      %c0_291 = arith.constant 0 : index
      %237 = arith.index_cast %236 : i32 to index
      %c1_292 = arith.constant 1 : index
      %c0_293 = arith.constant 0 : index
      %238 = vector.load %arg2[%c0_290, %c0_291, %237, %c1_292, %c0_293] : memref<1x2x18x10x4xbf16, #tpu.memory_space<vmem>>, vector<1x1x1x8x4xbf16>
      %239 = vector.shape_cast %238 : vector<1x1x1x8x4xbf16> to vector<8x4xbf16>
      %c24_294 = arith.constant 24 : index
      %c24_295 = arith.constant 24 : index
      %240 = vector.load %arg6[%c24_294, %c24_295] : memref<32x36xbf16, #tpu.memory_space<vmem>>, vector<8x4xbf16>
      tpu.vector_store %arg6[%c24_294, %c24_295], %239 {strides = array<i32>} : memref<32x36xbf16, #tpu.memory_space<vmem>>, vector<8x4xbf16>,
      %c2_i32_296 = arith.constant 2 : i32
      %241 = arith.muli %2, %c2_i32_296 : i32
      %c1_i32_297 = arith.constant 1 : i32
      %242 = arith.addi %241, %c1_i32_297 : i32
      %c2_i32_298 = arith.constant 2 : i32
      %243 = arith.addi %242, %c2_i32_298 : i32
      %c0_299 = arith.constant 0 : index
      %c1_300 = arith.constant 1 : index
      %244 = arith.index_cast %243 : i32 to index
      %c1_301 = arith.constant 1 : index
      %c0_302 = arith.constant 0 : index
      %245 = vector.load %arg2[%c0_299, %c1_300, %244, %c1_301, %c0_302] : memref<1x2x18x10x4xbf16, #tpu.memory_space<vmem>>, vector<1x1x1x8x4xbf16>
      %246 = vector.shape_cast %245 : vector<1x1x1x8x4xbf16> to vector<8x4xbf16>
      %c24_303 = arith.constant 24 : index
      %c28_304 = arith.constant 28 : index
      %247 = vector.load %arg6[%c24_303, %c28_304] : memref<32x36xbf16, #tpu.memory_space<vmem>>, vector<8x4xbf16>
      tpu.vector_store %arg6[%c24_303, %c28_304], %246 {strides = array<i32>} : memref<32x36xbf16, #tpu.memory_space<vmem>>, vector<8x4xbf16>,
      %c2_i32_305 = arith.constant 2 : i32
      %248 = arith.muli %2, %c2_i32_305 : i32
      %c1_i32_306 = arith.constant 1 : i32
      %249 = arith.addi %248, %c1_i32_306 : i32
      %c2_i32_307 = arith.constant 2 : i32
      %250 = arith.addi %249, %c2_i32_307 : i32
      %c0_308 = arith.constant 0 : index
      %c0_309 = arith.constant 0 : index
      %251 = arith.index_cast %250 : i32 to index
      %c2_310 = arith.constant 2 : index
      %c0_311 = arith.constant 0 : index
      %252 = vector.load %arg2[%c0_308, %c0_309, %251, %c2_310, %c0_311] : memref<1x2x18x10x4xbf16, #tpu.memory_space<vmem>>, vector<1x1x1x8x4xbf16>
      %253 = vector.shape_cast %252 : vector<1x1x1x8x4xbf16> to vector<8x4xbf16>
      %c24_312 = arith.constant 24 : index
      %c32_313 = arith.constant 32 : index
      %254 = vector.load %arg6[%c24_312, %c32_313] : memref<32x36xbf16, #tpu.memory_space<vmem>>, vector<8x4xbf16>
      tpu.vector_store %arg6[%c24_312, %c32_313], %253 {strides = array<i32>} : memref<32x36xbf16, #tpu.memory_space<vmem>>, vector<8x4xbf16>,
      %c0_314 = arith.constant 0 : index
      %c0_315 = arith.constant 0 : index
      %255 = vector.load %arg6[%c0_314, %c0_315] : memref<32x36xbf16, #tpu.memory_space<vmem>>, vector<32x36xbf16>
      %c0_316 = arith.constant 0 : index
      %c0_317 = arith.constant 0 : index
      %256 = vector.load %arg3[%c0_316, %c0_317] : memref<36x8xbf16, #tpu.memory_space<vmem>>, vector<36x8xbf16>
      %cst = arith.constant dense<0.000000e+00> : vector<32x8xf32>
      %257 = tpu.matmul %255, %256, %cst {dimension_numbers = #tpu.dot_dimension_numbers<[1], [0], [0], [1], [0, 0, 1, 1], [], []>} : vector<32x36xbf16>, vector<36x8xbf16>, vector<32x8xf32> -> vector<32x8xf32>
      %258 = vector.extract_strided_slice %257 {offsets = [0, 0], sizes = [8, 8], strides = [1, 1]} : vector<32x8xf32> to vector<8x8xf32>
      %259 = vector.extract_strided_slice %257 {offsets = [8, 0], sizes = [8, 8], strides = [1, 1]} : vector<32x8xf32> to vector<8x8xf32>
      %260 = arith.maximumf %258, %259 : vector<8x8xf32>
      %261 = vector.extract_strided_slice %257 {offsets = [16, 0], sizes = [8, 8], strides = [1, 1]} : vector<32x8xf32> to vector<8x8xf32>
      %262 = arith.maximumf %260, %261 : vector<8x8xf32>
      %263 = vector.extract_strided_slice %257 {offsets = [24, 0], sizes = [8, 8], strides = [1, 1]} : vector<32x8xf32> to vector<8x8xf32>
      %264 = arith.maximumf %262, %263 : vector<8x8xf32>
      %c0_318 = arith.constant 0 : index
      %c0_319 = arith.constant 0 : index
      %265 = vector.load %arg4[%c0_318, %c0_319] : memref<1x8xf32, #tpu.memory_space<vmem>>, vector<1x8xf32>
      %266 = vector.broadcast %265 : vector<1x8xf32> to vector<8x8xf32>
      %267 = arith.addf %264, %266 : vector<8x8xf32>
      %cst_320 = arith.constant 0.000000e+00 : f32
      %268 = vector.broadcast %cst_320 : f32 to vector<8x8xf32>
      %269 = arith.maximumf %267, %268 : vector<8x8xf32>
      %c0_321 = arith.constant 0 : index
      %270 = arith.index_cast %arg7 : i32 to index
      %c0_322 = arith.constant 0 : index
      %c0_323 = arith.constant 0 : index
      %271 = vector.load %arg5[%c0_321, %270, %c0_322, %c0_323] : memref<1x8x8x8xf32, #tpu.memory_space<vmem>>, vector<1x1x8x8xf32>
      %272 = vector.shape_cast %271 : vector<1x1x8x8xf32> to vector<8x8xf32>
      %273 = vector.shape_cast %269 : vector<8x8xf32> to vector<1x1x8x8xf32>
      tpu.vector_store %arg5[%c0_321, %270, %c0_322, %c0_323], %273 {strides = array<i32>} : memref<1x8x8x8xf32, #tpu.memory_space<vmem>>, vector<1x1x8x8xf32>,
    }
    %c8_i32_0 = arith.constant 8 : i32
    return
  }
  func.func @transform_0(%arg0: i32, %arg1: i32) -> (i32, i32, i32, i32, i32) {
    %c0_i32 = arith.constant 0 : i32
    %c0_i32_0 = arith.constant 0 : i32
    %c0_i32_1 = arith.constant 0 : i32
    %c0_i32_2 = arith.constant 0 : i32
    %c0_i32_3 = arith.constant 0 : i32
    return %arg0, %c0_i32, %c0_i32_0, %c0_i32_1, %c0_i32_2 : i32, i32, i32, i32, i32
  }
  func.func @transform_1(%arg0: i32, %arg1: i32) -> (i32, i32) {
    %c0_i32 = arith.constant 0 : i32
    %c0_i32_0 = arith.constant 0 : i32
    %c0_i32_1 = arith.constant 0 : i32
    return %c0_i32, %c0_i32_0 : i32, i32
  }
  func.func @transform_2(%arg0: i32, %arg1: i32) -> (i32, i32) {
    %c0_i32 = arith.constant 0 : i32
    %c0_i32_0 = arith.constant 0 : i32
    %c0_i32_1 = arith.constant 0 : i32
    return %c0_i32, %c0_i32_0 : i32, i32
  }
  func.func @transform_3(%arg0: i32, %arg1: i32) -> (i32, i32, i32, i32) {
    %c0_i32 = arith.constant 0 : i32
    %c0_i32_0 = arith.constant 0 : i32
    %c0_i32_1 = arith.constant 0 : i32
    return %arg0, %arg1, %c0_i32, %c0_i32_0 : i32, i32, i32, i32
  }
}

module attributes {stable_mosaic.version = 11 : i64} {
  func.func @_convblock_kernel(%arg0: i32, %arg1: i32, %arg2: memref<1x2x18x10x4xbf16, #tpu.memory_space<vmem>>, %arg3: memref<36x8xbf16, #tpu.memory_space<vmem>>, %arg4: memref<1x8xf32, #tpu.memory_space<vmem>>, %arg5: memref<1x8x8x8xf32, #tpu.memory_space<vmem>>, %arg6: memref<32x36xbf16, #tpu.memory_space<vmem>>) attributes {dimension_semantics = [#tpu.dimension_semantics<parallel>, #tpu.dimension_semantics<parallel>], iteration_bounds = array<i64: 2, 1>, scalar_prefetch = 0 : i64, scratch_operands = 1 : i64, tpu.core_type = #tpu.core_type<tc>, window_params = [{transform_indices = @transform_0, window_bounds = array<i64: 1, 2, 18, 10, 4>}, {pipeline_mode = #tpu.pipeline_mode<synchronous>, transform_indices = @transform_1, window_bounds = array<i64: 36, 8>}, {pipeline_mode = #tpu.pipeline_mode<synchronous>, transform_indices = @transform_2, window_bounds = array<i64: 1, 8>}, {transform_indices = @transform_3, window_bounds = array<i64: 1, 8, 8, 8>}]} {
    %c0_i32 = arith.constant 0 : i32
    %c8_i32 = arith.constant 8 : i32
    %0 = arith.addi %c0_i32, %c8_i32 : i32
    %c1_i32 = arith.constant 1 : i32
    scf.for %arg7 = %c0_i32 to %0 step %c1_i32  : i32 {
      %c8_i32_1 = arith.constant 8 : i32
      %1 = arith.muli %arg1, %c8_i32_1 : i32
      %2 = arith.addi %1, %arg7 : i32
      %c2_i32 = arith.constant 2 : i32
      %3 = arith.muli %2, %c2_i32 : i32
      %c0_i32_2 = arith.constant 0 : i32
      %4 = arith.addi %3, %c0_i32_2 : i32
      %c0_i32_3 = arith.constant 0 : i32
      %5 = arith.addi %4, %c0_i32_3 : i32
      %c0 = arith.constant 0 : index
      %c1 = arith.constant 1 : index
      %6 = arith.index_cast %5 : i32 to index
      %c0_4 = arith.constant 0 : index
      %c0_5 = arith.constant 0 : index
      %7 = vector.load %arg2[%c0, %c1, %6, %c0_4, %c0_5] : memref<1x2x18x10x4xbf16, #tpu.memory_space<vmem>>, vector<1x1x1x8x4xbf16>
      %8 = vector.shape_cast %7 : vector<1x1x1x8x4xbf16> to vector<8x4xbf16>
      %c0_6 = arith.constant 0 : index
      %c0_7 = arith.constant 0 : index
      %9 = vector.load %arg6[%c0_6, %c0_7] : memref<32x36xbf16, #tpu.memory_space<vmem>>, vector<8x4xbf16>
      tpu.vector_store %arg6[%c0_6, %c0_7], %8 {strides = array<i32>} : memref<32x36xbf16, #tpu.memory_space<vmem>>, vector<8x4xbf16>,
      %c2_i32_8 = arith.constant 2 : i32
      %10 = arith.muli %2, %c2_i32_8 : i32
      %c0_i32_9 = arith.constant 0 : i32
      %11 = arith.addi %10, %c0_i32_9 : i32
      %c0_i32_10 = arith.constant 0 : i32
      %12 = arith.addi %11, %c0_i32_10 : i32
      %c0_11 = arith.constant 0 : index
      %c0_12 = arith.constant 0 : index
      %13 = arith.index_cast %12 : i32 to index
      %c1_13 = arith.constant 1 : index
      %c0_14 = arith.constant 0 : index
      %14 = vector.load %arg2[%c0_11, %c0_12, %13, %c1_13, %c0_14] : memref<1x2x18x10x4xbf16, #tpu.memory_space<vmem>>, vector<1x1x1x8x4xbf16>
      %15 = vector.shape_cast %14 : vector<1x1x1x8x4xbf16> to vector<8x4xbf16>
      %c0_15 = arith.constant 0 : index
      %c4 = arith.constant 4 : index
      %16 = vector.load %arg6[%c0_15, %c4] : memref<32x36xbf16, #tpu.memory_space<vmem>>, vector<8x4xbf16>
      tpu.vector_store %arg6[%c0_15, %c4], %15 {strides = array<i32>} : memref<32x36xbf16, #tpu.memory_space<vmem>>, vector<8x4xbf16>,
      %c2_i32_16 = arith.constant 2 : i32
      %17 = arith.muli %2, %c2_i32_16 : i32
      %c0_i32_17 = arith.constant 0 : i32
      %18 = arith.addi %17, %c0_i32_17 : i32
      %c0_i32_18 = arith.constant 0 : i32
      %19 = arith.addi %18, %c0_i32_18 : i32
      %c0_19 = arith.constant 0 : index
      %c1_20 = arith.constant 1 : index
      %20 = arith.index_cast %19 : i32 to index
      %c1_21 = arith.constant 1 : index
      %c0_22 = arith.constant 0 : index
      %21 = vector.load %arg2[%c0_19, %c1_20, %20, %c1_21, %c0_22] : memref<1x2x18x10x4xbf16, #tpu.memory_space<vmem>>, vector<1x1x1x8x4xbf16>
      %22 = vector.shape_cast %21 : vector<1x1x1x8x4xbf16> to vector<8x4xbf16>
      %c0_23 = arith.constant 0 : index
      %c8 = arith.constant 8 : index
      %23 = vector.load %arg6[%c0_23, %c8] : memref<32x36xbf16, #tpu.memory_space<vmem>>, vector<8x4xbf16>
      tpu.vector_store %arg6[%c0_23, %c8], %22 {strides = array<i32>} : memref<32x36xbf16, #tpu.memory_space<vmem>>, vector<8x4xbf16>,
      %c2_i32_24 = arith.constant 2 : i32
      %24 = arith.muli %2, %c2_i32_24 : i32
      %c0_i32_25 = arith.constant 0 : i32
      %25 = arith.addi %24, %c0_i32_25 : i32
      %c1_i32_26 = arith.constant 1 : i32
      %26 = arith.addi %25, %c1_i32_26 : i32
      %c0_27 = arith.constant 0 : index
      %c1_28 = arith.constant 1 : index
      %27 = arith.index_cast %26 : i32 to index
      %c0_29 = arith.constant 0 : index
      %c0_30 = arith.constant 0 : index
      %28 = vector.load %arg2[%c0_27, %c1_28, %27, %c0_29, %c0_30] : memref<1x2x18x10x4xbf16, #tpu.memory_space<vmem>>, vector<1x1x1x8x4xbf16>
      %29 = vector.shape_cast %28 : vector<1x1x1x8x4xbf16> to vector<8x4xbf16>
      %c0_31 = arith.constant 0 : index
      %c12 = arith.constant 12 : index
      %30 = vector.load %arg6[%c0_31, %c12] : memref<32x36xbf16, #tpu.memory_space<vmem>>, vector<8x4xbf16>
      tpu.vector_store %arg6[%c0_31, %c12], %29 {strides = array<i32>} : memref<32x36xbf16, #tpu.memory_space<vmem>>, vector<8x4xbf16>,
      %c2_i32_32 = arith.constant 2 : i32
      %31 = arith.muli %2, %c2_i32_32 : i32
      %c0_i32_33 = arith.constant 0 : i32
      %32 = arith.addi %31, %c0_i32_33 : i32
      %c1_i32_34 = arith.constant 1 : i32
      %33 = arith.addi %32, %c1_i32_34 : i32
      %c0_35 = arith.constant 0 : index
      %c0_36 = arith.constant 0 : index
      %34 = arith.index_cast %33 : i32 to index
      %c1_37 = arith.constant 1 : index
      %c0_38 = arith.constant 0 : index
      %35 = vector.load %arg2[%c0_35, %c0_36, %34, %c1_37, %c0_38] : memref<1x2x18x10x4xbf16, #tpu.memory_space<vmem>>, vector<1x1x1x8x4xbf16>
      %36 = vector.shape_cast %35 : vector<1x1x1x8x4xbf16> to vector<8x4xbf16>
      %c0_39 = arith.constant 0 : index
      %c16 = arith.constant 16 : index
      %37 = vector.load %arg6[%c0_39, %c16] : memref<32x36xbf16, #tpu.memory_space<vmem>>, vector<8x4xbf16>
      tpu.vector_store %arg6[%c0_39, %c16], %36 {strides = array<i32>} : memref<32x36xbf16, #tpu.memory_space<vmem>>, vector<8x4xbf16>,
      %c2_i32_40 = arith.constant 2 : i32
      %38 = arith.muli %2, %c2_i32_40 : i32
      %c0_i32_41 = arith.constant 0 : i32
      %39 = arith.addi %38, %c0_i32_41 : i32
      %c1_i32_42 = arith.constant 1 : i32
      %40 = arith.addi %39, %c1_i32_42 : i32
      %c0_43 = arith.constant 0 : index
      %c1_44 = arith.constant 1 : index
      %41 = arith.index_cast %40 : i32 to index
      %c1_45 = arith.constant 1 : index
      %c0_46 = arith.constant 0 : index
      %42 = vector.load %arg2[%c0_43, %c1_44, %41, %c1_45, %c0_46] : memref<1x2x18x10x4xbf16, #tpu.memory_space<vmem>>, vector<1x1x1x8x4xbf16>
      %43 = vector.shape_cast %42 : vector<1x1x1x8x4xbf16> to vector<8x4xbf16>
      %c0_47 = arith.constant 0 : index
      %c20 = arith.constant 20 : index
      %44 = vector.load %arg6[%c0_47, %c20] : memref<32x36xbf16, #tpu.memory_space<vmem>>, vector<8x4xbf16>
      tpu.vector_store %arg6[%c0_47, %c20], %43 {strides = array<i32>} : memref<32x36xbf16, #tpu.memory_space<vmem>>, vector<8x4xbf16>,
      %c2_i32_48 = arith.constant 2 : i32
      %45 = arith.muli %2, %c2_i32_48 : i32
      %c0_i32_49 = arith.constant 0 : i32
      %46 = arith.addi %45, %c0_i32_49 : i32
      %c2_i32_50 = arith.constant 2 : i32
      %47 = arith.addi %46, %c2_i32_50 : i32
      %c0_51 = arith.constant 0 : index
      %c1_52 = arith.constant 1 : index
      %48 = arith.index_cast %47 : i32 to index
      %c0_53 = arith.constant 0 : index
      %c0_54 = arith.constant 0 : index
      %49 = vector.load %arg2[%c0_51, %c1_52, %48, %c0_53, %c0_54] : memref<1x2x18x10x4xbf16, #tpu.memory_space<vmem>>, vector<1x1x1x8x4xbf16>
      %50 = vector.shape_cast %49 : vector<1x1x1x8x4xbf16> to vector<8x4xbf16>
      %c0_55 = arith.constant 0 : index
      %c24 = arith.constant 24 : index
      %51 = vector.load %arg6[%c0_55, %c24] : memref<32x36xbf16, #tpu.memory_space<vmem>>, vector<8x4xbf16>
      tpu.vector_store %arg6[%c0_55, %c24], %50 {strides = array<i32>} : memref<32x36xbf16, #tpu.memory_space<vmem>>, vector<8x4xbf16>,
      %c2_i32_56 = arith.constant 2 : i32
      %52 = arith.muli %2, %c2_i32_56 : i32
      %c0_i32_57 = arith.constant 0 : i32
      %53 = arith.addi %52, %c0_i32_57 : i32
      %c2_i32_58 = arith.constant 2 : i32
      %54 = arith.addi %53, %c2_i32_58 : i32
      %c0_59 = arith.constant 0 : index
      %c0_60 = arith.constant 0 : index
      %55 = arith.index_cast %54 : i32 to index
      %c1_61 = arith.constant 1 : index
      %c0_62 = arith.constant 0 : index
      %56 = vector.load %arg2[%c0_59, %c0_60, %55, %c1_61, %c0_62] : memref<1x2x18x10x4xbf16, #tpu.memory_space<vmem>>, vector<1x1x1x8x4xbf16>
      %57 = vector.shape_cast %56 : vector<1x1x1x8x4xbf16> to vector<8x4xbf16>
      %c0_63 = arith.constant 0 : index
      %c28 = arith.constant 28 : index
      %58 = vector.load %arg6[%c0_63, %c28] : memref<32x36xbf16, #tpu.memory_space<vmem>>, vector<8x4xbf16>
      tpu.vector_store %arg6[%c0_63, %c28], %57 {strides = array<i32>} : memref<32x36xbf16, #tpu.memory_space<vmem>>, vector<8x4xbf16>,
      %c2_i32_64 = arith.constant 2 : i32
      %59 = arith.muli %2, %c2_i32_64 : i32
      %c0_i32_65 = arith.constant 0 : i32
      %60 = arith.addi %59, %c0_i32_65 : i32
      %c2_i32_66 = arith.constant 2 : i32
      %61 = arith.addi %60, %c2_i32_66 : i32
      %c0_67 = arith.constant 0 : index
      %c1_68 = arith.constant 1 : index
      %62 = arith.index_cast %61 : i32 to index
      %c1_69 = arith.constant 1 : index
      %c0_70 = arith.constant 0 : index
      %63 = vector.load %arg2[%c0_67, %c1_68, %62, %c1_69, %c0_70] : memref<1x2x18x10x4xbf16, #tpu.memory_space<vmem>>, vector<1x1x1x8x4xbf16>
      %64 = vector.shape_cast %63 : vector<1x1x1x8x4xbf16> to vector<8x4xbf16>
      %c0_71 = arith.constant 0 : index
      %c32 = arith.constant 32 : index
      %65 = vector.load %arg6[%c0_71, %c32] : memref<32x36xbf16, #tpu.memory_space<vmem>>, vector<8x4xbf16>
      tpu.vector_store %arg6[%c0_71, %c32], %64 {strides = array<i32>} : memref<32x36xbf16, #tpu.memory_space<vmem>>, vector<8x4xbf16>,
      %c2_i32_72 = arith.constant 2 : i32
      %66 = arith.muli %2, %c2_i32_72 : i32
      %c0_i32_73 = arith.constant 0 : i32
      %67 = arith.addi %66, %c0_i32_73 : i32
      %c0_i32_74 = arith.constant 0 : i32
      %68 = arith.addi %67, %c0_i32_74 : i32
      %c0_75 = arith.constant 0 : index
      %c0_76 = arith.constant 0 : index
      %69 = arith.index_cast %68 : i32 to index
      %c1_77 = arith.constant 1 : index
      %c0_78 = arith.constant 0 : index
      %70 = vector.load %arg2[%c0_75, %c0_76, %69, %c1_77, %c0_78] : memref<1x2x18x10x4xbf16, #tpu.memory_space<vmem>>, vector<1x1x1x8x4xbf16>
      %71 = vector.shape_cast %70 : vector<1x1x1x8x4xbf16> to vector<8x4xbf16>
      %c8_79 = arith.constant 8 : index
      %c0_80 = arith.constant 0 : index
      %72 = vector.load %arg6[%c8_79, %c0_80] : memref<32x36xbf16, #tpu.memory_space<vmem>>, vector<8x4xbf16>
      tpu.vector_store %arg6[%c8_79, %c0_80], %71 {strides = array<i32>} : memref<32x36xbf16, #tpu.memory_space<vmem>>, vector<8x4xbf16>,
      %c2_i32_81 = arith.constant 2 : i32
      %73 = arith.muli %2, %c2_i32_81 : i32
      %c0_i32_82 = arith.constant 0 : i32
      %74 = arith.addi %73, %c0_i32_82 : i32
      %c0_i32_83 = arith.constant 0 : i32
      %75 = arith.addi %74, %c0_i32_83 : i32
      %c0_84 = arith.constant 0 : index
      %c1_85 = arith.constant 1 : index
      %76 = arith.index_cast %75 : i32 to index
      %c1_86 = arith.constant 1 : index
      %c0_87 = arith.constant 0 : index
      %77 = vector.load %arg2[%c0_84, %c1_85, %76, %c1_86, %c0_87] : memref<1x2x18x10x4xbf16, #tpu.memory_space<vmem>>, vector<1x1x1x8x4xbf16>
      %78 = vector.shape_cast %77 : vector<1x1x1x8x4xbf16> to vector<8x4xbf16>
      %c8_88 = arith.constant 8 : index
      %c4_89 = arith.constant 4 : index
      %79 = vector.load %arg6[%c8_88, %c4_89] : memref<32x36xbf16, #tpu.memory_space<vmem>>, vector<8x4xbf16>
      tpu.vector_store %arg6[%c8_88, %c4_89], %78 {strides = array<i32>} : memref<32x36xbf16, #tpu.memory_space<vmem>>, vector<8x4xbf16>,
      %c2_i32_90 = arith.constant 2 : i32
      %80 = arith.muli %2, %c2_i32_90 : i32
      %c0_i32_91 = arith.constant 0 : i32
      %81 = arith.addi %80, %c0_i32_91 : i32
      %c0_i32_92 = arith.constant 0 : i32
      %82 = arith.addi %81, %c0_i32_92 : i32
      %c0_93 = arith.constant 0 : index
      %c0_94 = arith.constant 0 : index
      %83 = arith.index_cast %82 : i32 to index
      %c2 = arith.constant 2 : index
      %c0_95 = arith.constant 0 : index
      %84 = vector.load %arg2[%c0_93, %c0_94, %83, %c2, %c0_95] : memref<1x2x18x10x4xbf16, #tpu.memory_space<vmem>>, vector<1x1x1x8x4xbf16>
      %85 = vector.shape_cast %84 : vector<1x1x1x8x4xbf16> to vector<8x4xbf16>
      %c8_96 = arith.constant 8 : index
      %c8_97 = arith.constant 8 : index
      %86 = vector.load %arg6[%c8_96, %c8_97] : memref<32x36xbf16, #tpu.memory_space<vmem>>, vector<8x4xbf16>
      tpu.vector_store %arg6[%c8_96, %c8_97], %85 {strides = array<i32>} : memref<32x36xbf16, #tpu.memory_space<vmem>>, vector<8x4xbf16>,
      %c2_i32_98 = arith.constant 2 : i32
      %87 = arith.muli %2, %c2_i32_98 : i32
      %c0_i32_99 = arith.constant 0 : i32
      %88 = arith.addi %87, %c0_i32_99 : i32
      %c1_i32_100 = arith.constant 1 : i32
      %89 = arith.addi %88, %c1_i32_100 : i32
      %c0_101 = arith.constant 0 : index
      %c0_102 = arith.constant 0 : index
      %90 = arith.index_cast %89 : i32 to index
      %c1_103 = arith.constant 1 : index
      %c0_104 = arith.constant 0 : index
      %91 = vector.load %arg2[%c0_101, %c0_102, %90, %c1_103, %c0_104] : memref<1x2x18x10x4xbf16, #tpu.memory_space<vmem>>, vector<1x1x1x8x4xbf16>
      %92 = vector.shape_cast %91 : vector<1x1x1x8x4xbf16> to vector<8x4xbf16>
      %c8_105 = arith.constant 8 : index
      %c12_106 = arith.constant 12 : index
      %93 = vector.load %arg6[%c8_105, %c12_106] : memref<32x36xbf16, #tpu.memory_space<vmem>>, vector<8x4xbf16>
      tpu.vector_store %arg6[%c8_105, %c12_106], %92 {strides = array<i32>} : memref<32x36xbf16, #tpu.memory_space<vmem>>, vector<8x4xbf16>,
      %c2_i32_107 = arith.constant 2 : i32
      %94 = arith.muli %2, %c2_i32_107 : i32
      %c0_i32_108 = arith.constant 0 : i32
      %95 = arith.addi %94, %c0_i32_108 : i32
      %c1_i32_109 = arith.constant 1 : i32
      %96 = arith.addi %95, %c1_i32_109 : i32
      %c0_110 = arith.constant 0 : index
      %c1_111 = arith.constant 1 : index
      %97 = arith.index_cast %96 : i32 to index
      %c1_112 = arith.constant 1 : index
      %c0_113 = arith.constant 0 : index
      %98 = vector.load %arg2[%c0_110, %c1_111, %97, %c1_112, %c0_113] : memref<1x2x18x10x4xbf16, #tpu.memory_space<vmem>>, vector<1x1x1x8x4xbf16>
      %99 = vector.shape_cast %98 : vector<1x1x1x8x4xbf16> to vector<8x4xbf16>
      %c8_114 = arith.constant 8 : index
      %c16_115 = arith.constant 16 : index
      %100 = vector.load %arg6[%c8_114, %c16_115] : memref<32x36xbf16, #tpu.memory_space<vmem>>, vector<8x4xbf16>
      tpu.vector_store %arg6[%c8_114, %c16_115], %99 {strides = array<i32>} : memref<32x36xbf16, #tpu.memory_space<vmem>>, vector<8x4xbf16>,
      %c2_i32_116 = arith.constant 2 : i32
      %101 = arith.muli %2, %c2_i32_116 : i32
      %c0_i32_117 = arith.constant 0 : i32
      %102 = arith.addi %101, %c0_i32_117 : i32
      %c1_i32_118 = arith.constant 1 : i32
      %103 = arith.addi %102, %c1_i32_118 : i32
      %c0_119 = arith.constant 0 : index
      %c0_120 = arith.constant 0 : index
      %104 = arith.index_cast %103 : i32 to index
      %c2_121 = arith.constant 2 : index
      %c0_122 = arith.constant 0 : index
      %105 = vector.load %arg2[%c0_119, %c0_120, %104, %c2_121, %c0_122] : memref<1x2x18x10x4xbf16, #tpu.memory_space<vmem>>, vector<1x1x1x8x4xbf16>
      %106 = vector.shape_cast %105 : vector<1x1x1x8x4xbf16> to vector<8x4xbf16>
      %c8_123 = arith.constant 8 : index
      %c20_124 = arith.constant 20 : index
      %107 = vector.load %arg6[%c8_123, %c20_124] : memref<32x36xbf16, #tpu.memory_space<vmem>>, vector<8x4xbf16>
      tpu.vector_store %arg6[%c8_123, %c20_124], %106 {strides = array<i32>} : memref<32x36xbf16, #tpu.memory_space<vmem>>, vector<8x4xbf16>,
      %c2_i32_125 = arith.constant 2 : i32
      %108 = arith.muli %2, %c2_i32_125 : i32
      %c0_i32_126 = arith.constant 0 : i32
      %109 = arith.addi %108, %c0_i32_126 : i32
      %c2_i32_127 = arith.constant 2 : i32
      %110 = arith.addi %109, %c2_i32_127 : i32
      %c0_128 = arith.constant 0 : index
      %c0_129 = arith.constant 0 : index
      %111 = arith.index_cast %110 : i32 to index
      %c1_130 = arith.constant 1 : index
      %c0_131 = arith.constant 0 : index
      %112 = vector.load %arg2[%c0_128, %c0_129, %111, %c1_130, %c0_131] : memref<1x2x18x10x4xbf16, #tpu.memory_space<vmem>>, vector<1x1x1x8x4xbf16>
      %113 = vector.shape_cast %112 : vector<1x1x1x8x4xbf16> to vector<8x4xbf16>
      %c8_132 = arith.constant 8 : index
      %c24_133 = arith.constant 24 : index
      %114 = vector.load %arg6[%c8_132, %c24_133] : memref<32x36xbf16, #tpu.memory_space<vmem>>, vector<8x4xbf16>
      tpu.vector_store %arg6[%c8_132, %c24_133], %113 {strides = array<i32>} : memref<32x36xbf16, #tpu.memory_space<vmem>>, vector<8x4xbf16>,
      %c2_i32_134 = arith.constant 2 : i32
      %115 = arith.muli %2, %c2_i32_134 : i32
      %c0_i32_135 = arith.constant 0 : i32
      %116 = arith.addi %115, %c0_i32_135 : i32
      %c2_i32_136 = arith.constant 2 : i32
      %117 = arith.addi %116, %c2_i32_136 : i32
      %c0_137 = arith.constant 0 : index
      %c1_138 = arith.constant 1 : index
      %118 = arith.index_cast %117 : i32 to index
      %c1_139 = arith.constant 1 : index
      %c0_140 = arith.constant 0 : index
      %119 = vector.load %arg2[%c0_137, %c1_138, %118, %c1_139, %c0_140] : memref<1x2x18x10x4xbf16, #tpu.memory_space<vmem>>, vector<1x1x1x8x4xbf16>
      %120 = vector.shape_cast %119 : vector<1x1x1x8x4xbf16> to vector<8x4xbf16>
      %c8_141 = arith.constant 8 : index
      %c28_142 = arith.constant 28 : index
      %121 = vector.load %arg6[%c8_141, %c28_142] : memref<32x36xbf16, #tpu.memory_space<vmem>>, vector<8x4xbf16>
      tpu.vector_store %arg6[%c8_141, %c28_142], %120 {strides = array<i32>} : memref<32x36xbf16, #tpu.memory_space<vmem>>, vector<8x4xbf16>,
      %c2_i32_143 = arith.constant 2 : i32
      %122 = arith.muli %2, %c2_i32_143 : i32
      %c0_i32_144 = arith.constant 0 : i32
      %123 = arith.addi %122, %c0_i32_144 : i32
      %c2_i32_145 = arith.constant 2 : i32
      %124 = arith.addi %123, %c2_i32_145 : i32
      %c0_146 = arith.constant 0 : index
      %c0_147 = arith.constant 0 : index
      %125 = arith.index_cast %124 : i32 to index
      %c2_148 = arith.constant 2 : index
      %c0_149 = arith.constant 0 : index
      %126 = vector.load %arg2[%c0_146, %c0_147, %125, %c2_148, %c0_149] : memref<1x2x18x10x4xbf16, #tpu.memory_space<vmem>>, vector<1x1x1x8x4xbf16>
      %127 = vector.shape_cast %126 : vector<1x1x1x8x4xbf16> to vector<8x4xbf16>
      %c8_150 = arith.constant 8 : index
      %c32_151 = arith.constant 32 : index
      %128 = vector.load %arg6[%c8_150, %c32_151] : memref<32x36xbf16, #tpu.memory_space<vmem>>, vector<8x4xbf16>
      tpu.vector_store %arg6[%c8_150, %c32_151], %127 {strides = array<i32>} : memref<32x36xbf16, #tpu.memory_space<vmem>>, vector<8x4xbf16>,
      %c2_i32_152 = arith.constant 2 : i32
      %129 = arith.muli %2, %c2_i32_152 : i32
      %c1_i32_153 = arith.constant 1 : i32
      %130 = arith.addi %129, %c1_i32_153 : i32
      %c0_i32_154 = arith.constant 0 : i32
      %131 = arith.addi %130, %c0_i32_154 : i32
      %c0_155 = arith.constant 0 : index
      %c1_156 = arith.constant 1 : index
      %132 = arith.index_cast %131 : i32 to index
      %c0_157 = arith.constant 0 : index
      %c0_158 = arith.constant 0 : index
      %133 = vector.load %arg2[%c0_155, %c1_156, %132, %c0_157, %c0_158] : memref<1x2x18x10x4xbf16, #tpu.memory_space<vmem>>, vector<1x1x1x8x4xbf16>
      %134 = vector.shape_cast %133 : vector<1x1x1x8x4xbf16> to vector<8x4xbf16>
      %c16_159 = arith.constant 16 : index
      %c0_160 = arith.constant 0 : index
      %135 = vector.load %arg6[%c16_159, %c0_160] : memref<32x36xbf16, #tpu.memory_space<vmem>>, vector<8x4xbf16>
      tpu.vector_store %arg6[%c16_159, %c0_160], %134 {strides = array<i32>} : memref<32x36xbf16, #tpu.memory_space<vmem>>, vector<8x4xbf16>,
      %c2_i32_161 = arith.constant 2 : i32
      %136 = arith.muli %2, %c2_i32_161 : i32
      %c1_i32_162 = arith.constant 1 : i32
      %137 = arith.addi %136, %c1_i32_162 : i32
      %c0_i32_163 = arith.constant 0 : i32
      %138 = arith.addi %137, %c0_i32_163 : i32
      %c0_164 = arith.constant 0 : index
      %c0_165 = arith.constant 0 : index
      %139 = arith.index_cast %138 : i32 to index
      %c1_166 = arith.constant 1 : index
      %c0_167 = arith.constant 0 : index
      %140 = vector.load %arg2[%c0_164, %c0_165, %139, %c1_166, %c0_167] : memref<1x2x18x10x4xbf16, #tpu.memory_space<vmem>>, vector<1x1x1x8x4xbf16>
      %141 = vector.shape_cast %140 : vector<1x1x1x8x4xbf16> to vector<8x4xbf16>
      %c16_168 = arith.constant 16 : index
      %c4_169 = arith.constant 4 : index
      %142 = vector.load %arg6[%c16_168, %c4_169] : memref<32x36xbf16, #tpu.memory_space<vmem>>, vector<8x4xbf16>
      tpu.vector_store %arg6[%c16_168, %c4_169], %141 {strides = array<i32>} : memref<32x36xbf16, #tpu.memory_space<vmem>>, vector<8x4xbf16>,
      %c2_i32_170 = arith.constant 2 : i32
      %143 = arith.muli %2, %c2_i32_170 : i32
      %c1_i32_171 = arith.constant 1 : i32
      %144 = arith.addi %143, %c1_i32_171 : i32
      %c0_i32_172 = arith.constant 0 : i32
      %145 = arith.addi %144, %c0_i32_172 : i32
      %c0_173 = arith.constant 0 : index
      %c1_174 = arith.constant 1 : index
      %146 = arith.index_cast %145 : i32 to index
      %c1_175 = arith.constant 1 : index
      %c0_176 = arith.constant 0 : index
      %147 = vector.load %arg2[%c0_173, %c1_174, %146, %c1_175, %c0_176] : memref<1x2x18x10x4xbf16, #tpu.memory_space<vmem>>, vector<1x1x1x8x4xbf16>
      %148 = vector.shape_cast %147 : vector<1x1x1x8x4xbf16> to vector<8x4xbf16>
      %c16_177 = arith.constant 16 : index
      %c8_178 = arith.constant 8 : index
      %149 = vector.load %arg6[%c16_177, %c8_178] : memref<32x36xbf16, #tpu.memory_space<vmem>>, vector<8x4xbf16>
      tpu.vector_store %arg6[%c16_177, %c8_178], %148 {strides = array<i32>} : memref<32x36xbf16, #tpu.memory_space<vmem>>, vector<8x4xbf16>,
      %c2_i32_179 = arith.constant 2 : i32
      %150 = arith.muli %2, %c2_i32_179 : i32
      %c1_i32_180 = arith.constant 1 : i32
      %151 = arith.addi %150, %c1_i32_180 : i32
      %c1_i32_181 = arith.constant 1 : i32
      %152 = arith.addi %151, %c1_i32_181 : i32
      %c0_182 = arith.constant 0 : index
      %c1_183 = arith.constant 1 : index
      %153 = arith.index_cast %152 : i32 to index
      %c0_184 = arith.constant 0 : index
      %c0_185 = arith.constant 0 : index
      %154 = vector.load %arg2[%c0_182, %c1_183, %153, %c0_184, %c0_185] : memref<1x2x18x10x4xbf16, #tpu.memory_space<vmem>>, vector<1x1x1x8x4xbf16>
      %155 = vector.shape_cast %154 : vector<1x1x1x8x4xbf16> to vector<8x4xbf16>
      %c16_186 = arith.constant 16 : index
      %c12_187 = arith.constant 12 : index
      %156 = vector.load %arg6[%c16_186, %c12_187] : memref<32x36xbf16, #tpu.memory_space<vmem>>, vector<8x4xbf16>
      tpu.vector_store %arg6[%c16_186, %c12_187], %155 {strides = array<i32>} : memref<32x36xbf16, #tpu.memory_space<vmem>>, vector<8x4xbf16>,
      %c2_i32_188 = arith.constant 2 : i32
      %157 = arith.muli %2, %c2_i32_188 : i32
      %c1_i32_189 = arith.constant 1 : i32
      %158 = arith.addi %157, %c1_i32_189 : i32
      %c1_i32_190 = arith.constant 1 : i32
      %159 = arith.addi %158, %c1_i32_190 : i32
      %c0_191 = arith.constant 0 : index
      %c0_192 = arith.constant 0 : index
      %160 = arith.index_cast %159 : i32 to index
      %c1_193 = arith.constant 1 : index
      %c0_194 = arith.constant 0 : index
      %161 = vector.load %arg2[%c0_191, %c0_192, %160, %c1_193, %c0_194] : memref<1x2x18x10x4xbf16, #tpu.memory_space<vmem>>, vector<1x1x1x8x4xbf16>
      %162 = vector.shape_cast %161 : vector<1x1x1x8x4xbf16> to vector<8x4xbf16>
      %c16_195 = arith.constant 16 : index
      %c16_196 = arith.constant 16 : index
      %163 = vector.load %arg6[%c16_195, %c16_196] : memref<32x36xbf16, #tpu.memory_space<vmem>>, vector<8x4xbf16>
      tpu.vector_store %arg6[%c16_195, %c16_196], %162 {strides = array<i32>} : memref<32x36xbf16, #tpu.memory_space<vmem>>, vector<8x4xbf16>,
      %c2_i32_197 = arith.constant 2 : i32
      %164 = arith.muli %2, %c2_i32_197 : i32
      %c1_i32_198 = arith.constant 1 : i32
      %165 = arith.addi %164, %c1_i32_198 : i32
      %c1_i32_199 = arith.constant 1 : i32
      %166 = arith.addi %165, %c1_i32_199 : i32
      %c0_200 = arith.constant 0 : index
      %c1_201 = arith.constant 1 : index
      %167 = arith.index_cast %166 : i32 to index
      %c1_202 = arith.constant 1 : index
      %c0_203 = arith.constant 0 : index
      %168 = vector.load %arg2[%c0_200, %c1_201, %167, %c1_202, %c0_203] : memref<1x2x18x10x4xbf16, #tpu.memory_space<vmem>>, vector<1x1x1x8x4xbf16>
      %169 = vector.shape_cast %168 : vector<1x1x1x8x4xbf16> to vector<8x4xbf16>
      %c16_204 = arith.constant 16 : index
      %c20_205 = arith.constant 20 : index
      %170 = vector.load %arg6[%c16_204, %c20_205] : memref<32x36xbf16, #tpu.memory_space<vmem>>, vector<8x4xbf16>
      tpu.vector_store %arg6[%c16_204, %c20_205], %169 {strides = array<i32>} : memref<32x36xbf16, #tpu.memory_space<vmem>>, vector<8x4xbf16>,
      %c2_i32_206 = arith.constant 2 : i32
      %171 = arith.muli %2, %c2_i32_206 : i32
      %c1_i32_207 = arith.constant 1 : i32
      %172 = arith.addi %171, %c1_i32_207 : i32
      %c2_i32_208 = arith.constant 2 : i32
      %173 = arith.addi %172, %c2_i32_208 : i32
      %c0_209 = arith.constant 0 : index
      %c1_210 = arith.constant 1 : index
      %174 = arith.index_cast %173 : i32 to index
      %c0_211 = arith.constant 0 : index
      %c0_212 = arith.constant 0 : index
      %175 = vector.load %arg2[%c0_209, %c1_210, %174, %c0_211, %c0_212] : memref<1x2x18x10x4xbf16, #tpu.memory_space<vmem>>, vector<1x1x1x8x4xbf16>
      %176 = vector.shape_cast %175 : vector<1x1x1x8x4xbf16> to vector<8x4xbf16>
      %c16_213 = arith.constant 16 : index
      %c24_214 = arith.constant 24 : index
      %177 = vector.load %arg6[%c16_213, %c24_214] : memref<32x36xbf16, #tpu.memory_space<vmem>>, vector<8x4xbf16>
      tpu.vector_store %arg6[%c16_213, %c24_214], %176 {strides = array<i32>} : memref<32x36xbf16, #tpu.memory_space<vmem>>, vector<8x4xbf16>,
      %c2_i32_215 = arith.constant 2 : i32
      %178 = arith.muli %2, %c2_i32_215 : i32
      %c1_i32_216 = arith.constant 1 : i32
      %179 = arith.addi %178, %c1_i32_216 : i32
      %c2_i32_217 = arith.constant 2 : i32
      %180 = arith.addi %179, %c2_i32_217 : i32
      %c0_218 = arith.constant 0 : index
      %c0_219 = arith.constant 0 : index
      %181 = arith.index_cast %180 : i32 to index
      %c1_220 = arith.constant 1 : index
      %c0_221 = arith.constant 0 : index
      %182 = vector.load %arg2[%c0_218, %c0_219, %181, %c1_220, %c0_221] : memref<1x2x18x10x4xbf16, #tpu.memory_space<vmem>>, vector<1x1x1x8x4xbf16>
      %183 = vector.shape_cast %182 : vector<1x1x1x8x4xbf16> to vector<8x4xbf16>
      %c16_222 = arith.constant 16 : index
      %c28_223 = arith.constant 28 : index
      %184 = vector.load %arg6[%c16_222, %c28_223] : memref<32x36xbf16, #tpu.memory_space<vmem>>, vector<8x4xbf16>
      tpu.vector_store %arg6[%c16_222, %c28_223], %183 {strides = array<i32>} : memref<32x36xbf16, #tpu.memory_space<vmem>>, vector<8x4xbf16>,
      %c2_i32_224 = arith.constant 2 : i32
      %185 = arith.muli %2, %c2_i32_224 : i32
      %c1_i32_225 = arith.constant 1 : i32
      %186 = arith.addi %185, %c1_i32_225 : i32
      %c2_i32_226 = arith.constant 2 : i32
      %187 = arith.addi %186, %c2_i32_226 : i32
      %c0_227 = arith.constant 0 : index
      %c1_228 = arith.constant 1 : index
      %188 = arith.index_cast %187 : i32 to index
      %c1_229 = arith.constant 1 : index
      %c0_230 = arith.constant 0 : index
      %189 = vector.load %arg2[%c0_227, %c1_228, %188, %c1_229, %c0_230] : memref<1x2x18x10x4xbf16, #tpu.memory_space<vmem>>, vector<1x1x1x8x4xbf16>
      %190 = vector.shape_cast %189 : vector<1x1x1x8x4xbf16> to vector<8x4xbf16>
      %c16_231 = arith.constant 16 : index
      %c32_232 = arith.constant 32 : index
      %191 = vector.load %arg6[%c16_231, %c32_232] : memref<32x36xbf16, #tpu.memory_space<vmem>>, vector<8x4xbf16>
      tpu.vector_store %arg6[%c16_231, %c32_232], %190 {strides = array<i32>} : memref<32x36xbf16, #tpu.memory_space<vmem>>, vector<8x4xbf16>,
      %c2_i32_233 = arith.constant 2 : i32
      %192 = arith.muli %2, %c2_i32_233 : i32
      %c1_i32_234 = arith.constant 1 : i32
      %193 = arith.addi %192, %c1_i32_234 : i32
      %c0_i32_235 = arith.constant 0 : i32
      %194 = arith.addi %193, %c0_i32_235 : i32
      %c0_236 = arith.constant 0 : index
      %c0_237 = arith.constant 0 : index
      %195 = arith.index_cast %194 : i32 to index
      %c1_238 = arith.constant 1 : index
      %c0_239 = arith.constant 0 : index
      %196 = vector.load %arg2[%c0_236, %c0_237, %195, %c1_238, %c0_239] : memref<1x2x18x10x4xbf16, #tpu.memory_space<vmem>>, vector<1x1x1x8x4xbf16>
      %197 = vector.shape_cast %196 : vector<1x1x1x8x4xbf16> to vector<8x4xbf16>
      %c24_240 = arith.constant 24 : index
      %c0_241 = arith.constant 0 : index
      %198 = vector.load %arg6[%c24_240, %c0_241] : memref<32x36xbf16, #tpu.memory_space<vmem>>, vector<8x4xbf16>
      tpu.vector_store %arg6[%c24_240, %c0_241], %197 {strides = array<i32>} : memref<32x36xbf16, #tpu.memory_space<vmem>>, vector<8x4xbf16>,
      %c2_i32_242 = arith.constant 2 : i32
      %199 = arith.muli %2, %c2_i32_242 : i32
      %c1_i32_243 = arith.constant 1 : i32
      %200 = arith.addi %199, %c1_i32_243 : i32
      %c0_i32_244 = arith.constant 0 : i32
      %201 = arith.addi %200, %c0_i32_244 : i32
      %c0_245 = arith.constant 0 : index
      %c1_246 = arith.constant 1 : index
      %202 = arith.index_cast %201 : i32 to index
      %c1_247 = arith.constant 1 : index
      %c0_248 = arith.constant 0 : index
      %203 = vector.load %arg2[%c0_245, %c1_246, %202, %c1_247, %c0_248] : memref<1x2x18x10x4xbf16, #tpu.memory_space<vmem>>, vector<1x1x1x8x4xbf16>
      %204 = vector.shape_cast %203 : vector<1x1x1x8x4xbf16> to vector<8x4xbf16>
      %c24_249 = arith.constant 24 : index
      %c4_250 = arith.constant 4 : index
      %205 = vector.load %arg6[%c24_249, %c4_250] : memref<32x36xbf16, #tpu.memory_space<vmem>>, vector<8x4xbf16>
      tpu.vector_store %arg6[%c24_249, %c4_250], %204 {strides = array<i32>} : memref<32x36xbf16, #tpu.memory_space<vmem>>, vector<8x4xbf16>,
      %c2_i32_251 = arith.constant 2 : i32
      %206 = arith.muli %2, %c2_i32_251 : i32
      %c1_i32_252 = arith.constant 1 : i32
      %207 = arith.addi %206, %c1_i32_252 : i32
      %c0_i32_253 = arith.constant 0 : i32
      %208 = arith.addi %207, %c0_i32_253 : i32
      %c0_254 = arith.constant 0 : index
      %c0_255 = arith.constant 0 : index
      %209 = arith.index_cast %208 : i32 to index
      %c2_256 = arith.constant 2 : index
      %c0_257 = arith.constant 0 : index
      %210 = vector.load %arg2[%c0_254, %c0_255, %209, %c2_256, %c0_257] : memref<1x2x18x10x4xbf16, #tpu.memory_space<vmem>>, vector<1x1x1x8x4xbf16>
      %211 = vector.shape_cast %210 : vector<1x1x1x8x4xbf16> to vector<8x4xbf16>
      %c24_258 = arith.constant 24 : index
      %c8_259 = arith.constant 8 : index
      %212 = vector.load %arg6[%c24_258, %c8_259] : memref<32x36xbf16, #tpu.memory_space<vmem>>, vector<8x4xbf16>
      tpu.vector_store %arg6[%c24_258, %c8_259], %211 {strides = array<i32>} : memref<32x36xbf16, #tpu.memory_space<vmem>>, vector<8x4xbf16>,
      %c2_i32_260 = arith.constant 2 : i32
      %213 = arith.muli %2, %c2_i32_260 : i32
      %c1_i32_261 = arith.constant 1 : i32
      %214 = arith.addi %213, %c1_i32_261 : i32
      %c1_i32_262 = arith.constant 1 : i32
      %215 = arith.addi %214, %c1_i32_262 : i32
      %c0_263 = arith.constant 0 : index
      %c0_264 = arith.constant 0 : index
      %216 = arith.index_cast %215 : i32 to index
      %c1_265 = arith.constant 1 : index
      %c0_266 = arith.constant 0 : index
      %217 = vector.load %arg2[%c0_263, %c0_264, %216, %c1_265, %c0_266] : memref<1x2x18x10x4xbf16, #tpu.memory_space<vmem>>, vector<1x1x1x8x4xbf16>
      %218 = vector.shape_cast %217 : vector<1x1x1x8x4xbf16> to vector<8x4xbf16>
      %c24_267 = arith.constant 24 : index
      %c12_268 = arith.constant 12 : index
      %219 = vector.load %arg6[%c24_267, %c12_268] : memref<32x36xbf16, #tpu.memory_space<vmem>>, vector<8x4xbf16>
      tpu.vector_store %arg6[%c24_267, %c12_268], %218 {strides = array<i32>} : memref<32x36xbf16, #tpu.memory_space<vmem>>, vector<8x4xbf16>,
      %c2_i32_269 = arith.constant 2 : i32
      %220 = arith.muli %2, %c2_i32_269 : i32
      %c1_i32_270 = arith.constant 1 : i32
      %221 = arith.addi %220, %c1_i32_270 : i32
      %c1_i32_271 = arith.constant 1 : i32
      %222 = arith.addi %221, %c1_i32_271 : i32
      %c0_272 = arith.constant 0 : index
      %c1_273 = arith.constant 1 : index
      %223 = arith.index_cast %222 : i32 to index
      %c1_274 = arith.constant 1 : index
      %c0_275 = arith.constant 0 : index
      %224 = vector.load %arg2[%c0_272, %c1_273, %223, %c1_274, %c0_275] : memref<1x2x18x10x4xbf16, #tpu.memory_space<vmem>>, vector<1x1x1x8x4xbf16>
      %225 = vector.shape_cast %224 : vector<1x1x1x8x4xbf16> to vector<8x4xbf16>
      %c24_276 = arith.constant 24 : index
      %c16_277 = arith.constant 16 : index
      %226 = vector.load %arg6[%c24_276, %c16_277] : memref<32x36xbf16, #tpu.memory_space<vmem>>, vector<8x4xbf16>
      tpu.vector_store %arg6[%c24_276, %c16_277], %225 {strides = array<i32>} : memref<32x36xbf16, #tpu.memory_space<vmem>>, vector<8x4xbf16>,
      %c2_i32_278 = arith.constant 2 : i32
      %227 = arith.muli %2, %c2_i32_278 : i32
      %c1_i32_279 = arith.constant 1 : i32
      %228 = arith.addi %227, %c1_i32_279 : i32
      %c1_i32_280 = arith.constant 1 : i32
      %229 = arith.addi %228, %c1_i32_280 : i32
      %c0_281 = arith.constant 0 : index
      %c0_282 = arith.constant 0 : index
      %230 = arith.index_cast %229 : i32 to index
      %c2_283 = arith.constant 2 : index
      %c0_284 = arith.constant 0 : index
      %231 = vector.load %arg2[%c0_281, %c0_282, %230, %c2_283, %c0_284] : memref<1x2x18x10x4xbf16, #tpu.memory_space<vmem>>, vector<1x1x1x8x4xbf16>
      %232 = vector.shape_cast %231 : vector<1x1x1x8x4xbf16> to vector<8x4xbf16>
      %c24_285 = arith.constant 24 : index
      %c20_286 = arith.constant 20 : index
      %233 = vector.load %arg6[%c24_285, %c20_286] : memref<32x36xbf16, #tpu.memory_space<vmem>>, vector<8x4xbf16>
      tpu.vector_store %arg6[%c24_285, %c20_286], %232 {strides = array<i32>} : memref<32x36xbf16, #tpu.memory_space<vmem>>, vector<8x4xbf16>,
      %c2_i32_287 = arith.constant 2 : i32
      %234 = arith.muli %2, %c2_i32_287 : i32
      %c1_i32_288 = arith.constant 1 : i32
      %235 = arith.addi %234, %c1_i32_288 : i32
      %c2_i32_289 = arith.constant 2 : i32
      %236 = arith.addi %235, %c2_i32_289 : i32
      %c0_290 = arith.constant 0 : index
      %c0_291 = arith.constant 0 : index
      %237 = arith.index_cast %236 : i32 to index
      %c1_292 = arith.constant 1 : index
      %c0_293 = arith.constant 0 : index
      %238 = vector.load %arg2[%c0_290, %c0_291, %237, %c1_292, %c0_293] : memref<1x2x18x10x4xbf16, #tpu.memory_space<vmem>>, vector<1x1x1x8x4xbf16>
      %239 = vector.shape_cast %238 : vector<1x1x1x8x4xbf16> to vector<8x4xbf16>
      %c24_294 = arith.constant 24 : index
      %c24_295 = arith.constant 24 : index
      %240 = vector.load %arg6[%c24_294, %c24_295] : memref<32x36xbf16, #tpu.memory_space<vmem>>, vector<8x4xbf16>
      tpu.vector_store %arg6[%c24_294, %c24_295], %239 {strides = array<i32>} : memref<32x36xbf16, #tpu.memory_space<vmem>>, vector<8x4xbf16>,
      %c2_i32_296 = arith.constant 2 : i32
      %241 = arith.muli %2, %c2_i32_296 : i32
      %c1_i32_297 = arith.constant 1 : i32
      %242 = arith.addi %241, %c1_i32_297 : i32
      %c2_i32_298 = arith.constant 2 : i32
      %243 = arith.addi %242, %c2_i32_298 : i32
      %c0_299 = arith.constant 0 : index
      %c1_300 = arith.constant 1 : index
      %244 = arith.index_cast %243 : i32 to index
      %c1_301 = arith.constant 1 : index
      %c0_302 = arith.constant 0 : index
      %245 = vector.load %arg2[%c0_299, %c1_300, %244, %c1_301, %c0_302] : memref<1x2x18x10x4xbf16, #tpu.memory_space<vmem>>, vector<1x1x1x8x4xbf16>
      %246 = vector.shape_cast %245 : vector<1x1x1x8x4xbf16> to vector<8x4xbf16>
      %c24_303 = arith.constant 24 : index
      %c28_304 = arith.constant 28 : index
      %247 = vector.load %arg6[%c24_303, %c28_304] : memref<32x36xbf16, #tpu.memory_space<vmem>>, vector<8x4xbf16>
      tpu.vector_store %arg6[%c24_303, %c28_304], %246 {strides = array<i32>} : memref<32x36xbf16, #tpu.memory_space<vmem>>, vector<8x4xbf16>,
      %c2_i32_305 = arith.constant 2 : i32
      %248 = arith.muli %2, %c2_i32_305 : i32
      %c1_i32_306 = arith.constant 1 : i32
      %249 = arith.addi %248, %c1_i32_306 : i32
      %c2_i32_307 = arith.constant 2 : i32
      %250 = arith.addi %249, %c2_i32_307 : i32
      %c0_308 = arith.constant 0 : index
      %c0_309 = arith.constant 0 : index
      %251 = arith.index_cast %250 : i32 to index
      %c2_310 = arith.constant 2 : index
      %c0_311 = arith.constant 0 : index
      %252 = vector.load %arg2[%c0_308, %c0_309, %251, %c2_310, %c0_311] : memref<1x2x18x10x4xbf16, #tpu.memory_space<vmem>>, vector<1x1x1x8x4xbf16>
      %253 = vector.shape_cast %252 : vector<1x1x1x8x4xbf16> to vector<8x4xbf16>
      %c24_312 = arith.constant 24 : index
      %c32_313 = arith.constant 32 : index
      %254 = vector.load %arg6[%c24_312, %c32_313] : memref<32x36xbf16, #tpu.memory_space<vmem>>, vector<8x4xbf16>
      tpu.vector_store %arg6[%c24_312, %c32_313], %253 {strides = array<i32>} : memref<32x36xbf16, #tpu.memory_space<vmem>>, vector<8x4xbf16>,
      %c0_314 = arith.constant 0 : index
      %c0_315 = arith.constant 0 : index
      %255 = vector.load %arg6[%c0_314, %c0_315] : memref<32x36xbf16, #tpu.memory_space<vmem>>, vector<32x36xbf16>
      %c0_316 = arith.constant 0 : index
      %c0_317 = arith.constant 0 : index
      %256 = vector.load %arg3[%c0_316, %c0_317] : memref<36x8xbf16, #tpu.memory_space<vmem>>, vector<36x8xbf16>
      %cst = arith.constant dense<0.000000e+00> : vector<32x8xf32>
      %257 = tpu.matmul %255, %256, %cst {dimension_numbers = #tpu.dot_dimension_numbers<[1], [0], [0], [1], [0, 0, 1, 1], [], []>} : vector<32x36xbf16>, vector<36x8xbf16>, vector<32x8xf32> -> vector<32x8xf32>
      %258 = vector.extract_strided_slice %257 {offsets = [0, 0], sizes = [8, 8], strides = [1, 1]} : vector<32x8xf32> to vector<8x8xf32>
      %259 = vector.extract_strided_slice %257 {offsets = [8, 0], sizes = [8, 8], strides = [1, 1]} : vector<32x8xf32> to vector<8x8xf32>
      %260 = arith.maximumf %258, %259 : vector<8x8xf32>
      %261 = vector.extract_strided_slice %257 {offsets = [16, 0], sizes = [8, 8], strides = [1, 1]} : vector<32x8xf32> to vector<8x8xf32>
      %262 = arith.maximumf %260, %261 : vector<8x8xf32>
      %263 = vector.extract_strided_slice %257 {offsets = [24, 0], sizes = [8, 8], strides = [1, 1]} : vector<32x8xf32> to vector<8x8xf32>
      %264 = arith.maximumf %262, %263 : vector<8x8xf32>
      %c0_318 = arith.constant 0 : index
      %c0_319 = arith.constant 0 : index
      %265 = vector.load %arg4[%c0_318, %c0_319] : memref<1x8xf32, #tpu.memory_space<vmem>>, vector<1x8xf32>
      %266 = vector.broadcast %265 : vector<1x8xf32> to vector<8x8xf32>
      %267 = arith.addf %264, %266 : vector<8x8xf32>
      %cst_320 = arith.constant 0.000000e+00 : f32
      %268 = vector.broadcast %cst_320 : f32 to vector<8x8xf32>
      %269 = arith.maximumf %267, %268 : vector<8x8xf32>
      %c0_321 = arith.constant 0 : index
      %270 = arith.index_cast %arg7 : i32 to index
      %c0_322 = arith.constant 0 : index
      %c0_323 = arith.constant 0 : index
      %271 = vector.load %arg5[%c0_321, %270, %c0_322, %c0_323] : memref<1x8x8x8xf32, #tpu.memory_space<vmem>>, vector<1x1x8x8xf32>
      %272 = vector.shape_cast %271 : vector<1x1x8x8xf32> to vector<8x8xf32>
      %273 = vector.shape_cast %269 : vector<8x8xf32> to vector<1x1x8x8xf32>
      tpu.vector_store %arg5[%c0_321, %270, %c0_322, %c0_323], %273 {strides = array<i32>} : memref<1x8x8x8xf32, #tpu.memory_space<vmem>>, vector<1x1x8x8xf32>,
    }
    %c8_i32_0 = arith.constant 8 : i32
    return
  }
  func.func @transform_0(%arg0: i32, %arg1: i32) -> (i32, i32, i32, i32, i32) {
    %c0_i32 = arith.constant 0 : i32
    %c0_i32_0 = arith.constant 0 : i32
    %c0_i32_1 = arith.constant 0 : i32
    %c0_i32_2 = arith.constant 0 : i32
    %c0_i32_3 = arith.constant 0 : i32
    return %arg0, %c0_i32, %c0_i32_0, %c0_i32_1, %c0_i32_2 : i32, i32, i32, i32, i32
  }
  func.func @transform_1(%arg0: i32, %arg1: i32) -> (i32, i32) {
    %c0_i32 = arith.constant 0 : i32
    %c0_i32_0 = arith.constant 0 : i32
    %c0_i32_1 = arith.constant 0 : i32
    return %c0_i32, %c0_i32_0 : i32, i32
  }
  func.func @transform_2(%arg0: i32, %arg1: i32) -> (i32, i32) {
    %c0_i32 = arith.constant 0 : i32
    %c0_i32_0 = arith.constant 0 : i32
    %c0_i32_1 = arith.constant 0 : i32
    return %c0_i32, %c0_i32_0 : i32, i32
  }
  func.func @transform_3(%arg0: i32, %arg1: i32) -> (i32, i32, i32, i32) {
    %c0_i32 = arith.constant 0 : i32
    %c0_i32_0 = arith.constant 0 : i32
    %c0_i32_1 = arith.constant 0 : i32
    return %arg0, %arg1, %c0_i32, %c0_i32_0 : i32, i32, i32, i32
  }
}

</mosaic_0001>

<bundles_post_ra>
// kernel: tpu_custom_call.1
= control target key start
LH: loop header
LB: loop body
LE: loop exit
PB: predicated region body
PF: predicated region fallthrough
CT: control target
= control target key end

     0   :  { %8 = vsyncpa [#allocation4], 0  ;;  %s1757_s0 = inlined_call_operand.vmem [shape: bf16[2,2,18,10,4], index: 0, kind: input, shape index: {}]   ;;  %s1758_s1 = inlined_call_operand.vmem [shape: bf16[36,8], index: 1, kind: input, shape index: {}]   ;;  %s1759_s2 = inlined_call_operand.vmem [shape: f32[1,8], index: 2, kind: input, shape index: {}]   ;;  %s1760_s3 = inlined_call_operand.hbm [shape: f32[2,8,8,8], index: 3, kind: output, shape index: {}]  }
   0x1   :  { %10 = vsyncpa [#allocation4 + $0x1], 0  ;;  %s1399_s12 = smov 0   ;;  %s1401_s13 = smov 0  }
   0x2   :  { %s1403_s14 = smov 0   ;;  %s1405_s15 = smov 0  }
   0x3   :  { %s1407_s16 = smov 0   ;;  %s1409_s17 = smov 0  }
   0x4 LB: > { %s1067_s18 = sadd.s32 4294967295, %s1362_s17   ;;  %s1068_s19 = sadd.s32 4294967294, %s1362_s17   ;;  %s1362_s17 = sphi %s1409_s17, %s16_s17   ;;  %s1358_s16 = sphi %s1407_s16, %s1771_s16   ;;  %s1354_s15 = sphi %s1405_s15, %s1770_s15   ;;  %s1350_s14 = sphi %s1403_s14, %s1769_s14   ;;  %s1346_s13 = sphi %s1401_s13, %s1768_s13   ;;  %s1342_s12 = sphi %s1399_s12, %s1767_s12  }
   0x5   : > { %s28_s20 = sadd.s32 1, %s1358_s16  ;;  %s105_s21 = sadd.s32 1, %s1350_s14 }
   0x6   : > { %p30_p0 = scmp.ge.s32.totalorder %s28_s20, 2  ;;  %p115_p1 = scmp.ne.s32.totalorder %s1350_s14, %s1346_s13 }
   0x7   : > { %p116_p2 = scmp.eq.s32.totalorder %s1067_s18, 1  ;;  %p121_p3 = scmp.ne.s32.totalorder %s1346_s13, %s1342_s12 }
   0x8   : > { %s1773_s20 = smov (%p30_p0, %s28_s20), 0  ;;  %p122_p5 = scmp.eq.s32.totalorder %s1068_s19, 1 }
   0x9   : > { %p1439_p4 = por %p116_p2, %p115_p1  ;;  %s100_s23 = ssub.s32 %s1358_s16, %s1773_s20 }
   0xa   : > { %p1071_p6 = scmp.ge.s32.totalorder %s1362_s17, 1  ;;  %p103_p7 = scmp.eq.s32.totalorder %s100_s23, 0 }
   0xb   : > { %p1446_p8 = por %p122_p5, %p121_p3  ;;  %p154_p9 = scmp.lt.s32.totalorder %s1362_s17, 3 }
   0xc   : > { %s1452_s25 = scalar_select %p103_p7, %s1350_s14, %s105_s21  }
   0xd   : > { %p155_p10 = pnand %p1071_p6, %p154_p9 }
   0xe   : > { %s175_s26 = sand.u32 (!%p155_p10), 1, %s1346_s13   ;;  %p178_p11 = scmp.lt.s32.totalorder (!%p155_p10), %s1354_s15, 1 }
   0xf   : > { %158 = sbr.rel (%p155_p10) target bundleno = 442 (0x1ba), region = 32  ;;  %s1458_s27 = sshll.u32 (!%p155_p10), %s175_s26, 6 }
  0x10   : > { %s177_s6 = scalar_lea.vmem (!%p155_p10), [#allocation3], %s1458_s27  ;;  %s1467_s7 = smov (!%p155_p10), 0  }
  0x14   : > { %s179_s28 = scalar_select %p178_p11, %s1354_s15, 1 }
  0x16   : > { %s1203_s29 = smul.u32 288, %s179_s28 }
  0x18   : > { %s1464_s5 = scalar_lea.vmem %s1757_s0, %s1203_s29 }
  0x19 LB: >> { %vm402_vm0 = vcmask 1042432   ;;  %vm403_vm1 = vcmask 1046532   ;;  %vm205_vm2 = vsmask.f32 3328  ;;  %s1175_s8 = sshll.u32 %s1366_s7, 4  ;;  %s1368_s10 = smov 12   ;;  %s1366_s7 = sphi %s1467_s7, %s190_s7  }
  0x1a   : >> { %s1474_s9 = scalar_lea.vmem %s1464_s5, %s1175_s8  ;;  %vm1476_vm3 = vmor %vm402_vm0, %vm403_vm1  ;;  %vm206_vm4 = vsmask.f32 7440  ;;  %s1369_s11 = smov 8   ;;  %vm199_vm6 = vcmask 27648   ;;  %vm853_vm7 = vcmask 1041408   ;;  %vm225_vm8 = vcmask 60448  }
  0x1b   : >> { %v398_v1 = vld [vmem:[%s1474_s9] sm:$0xe]  ;;  %v399_v2 = vld [vmem:[%s1474_s9 + $0x4] sm:$0x1]  ;;  %v1085_v3 = vld [vmem:[%s1474_s9 + $0x98] sm:$0xf] }
  0x1c   : >> { %v1104_v4 = vrot.slane %v398_v1, 9  ;;  %v407_v5 = vrot.slane %v399_v2, 5  ;;  %255 = vrot.lane.b32.xlu0 %v1085_v3, %s1368_s10  ;;  %v1080_v6 = vld [vmem:[%s1474_s9 + $0x90] sm:$0xf]  ;;  %v1081_v7 = vld [vmem:[%s1474_s9 + $0x94] sm:$0x1]  ;;  %vm1497_vm5 = vmor %vm205_vm2, %vm206_vm4 }
  0x1d   : >> { %v230_v8 = vshrl.u32 %v1080_v6, 16  ;;  %v233_v9 = vshll.u32 %v1080_v6, 16  ;;  %v239_v10 = vshll.u32 %v1081_v7, 16  ;;  %v203_v11 = vld [vmem:[%s1474_s9] sm:$0xf]  ;;  %s1370_s18 = smov 4  }
  0x1e   : >> { %v408_v12 = vsel %vm1476_vm3, %v1104_v4, %v407_v5  ;;  %v204_v13 = vld [vmem:[%s1474_s9 + $0x4] sm:$0x1]  ;;  %v209_v14 = vshrl.u32 %v203_v11, 16  ;;  %v212_v15 = vshll.u32 %v203_v11, 16  ;;  %v1141_v16 = vld [vmem:[%s1474_s9 + $0x98] sm:$0xf] }
  0x1f   : >> { %409 = vrot.lane.b32.xlu1 %v408_v12, %s1369_s11  ;;  %v232_v17 = vrot.slane %v230_v8, 4  ;;  %v235_v18 = vrot.slane %v233_v9, 5  ;;  %v241_v19 = vrot.slane %v239_v10, 5  ;;  %v218_v20 = vshll.u32 %v204_v13, 16  ;;  %v1142_v21 = vld [vmem:[%s1474_s9 + $0x9c] sm:$0x1] }
  0x20   : >> { %v211_v22 = vrot.slane %v209_v14, 4  ;;  %v214_v23 = vrot.slane %v212_v15, 5  ;;  %v679_v24 = vshrl.u32 %v1141_v16, 16  ;;  %v682_v25 = vshll.u32 %v1141_v16, 16  ;;  %v1102_v26 = vld [vmem:[%s1474_s9 + $0x90] sm:$0xf] }
  0x21   : >> { %v236_v27 = vor.u32 %v235_v18, %v232_v17  ;;  %v220_v28 = vrot.slane %v218_v20, 5  ;;  %v688_v29 = vshll.u32 %v1142_v21, 16  ;;  %v1103_v30 = vld [vmem:[%s1474_s9 + $0x94] sm:$0x1]  ;;  %v381_v31 = vshrl.u32 %v1102_v26, 16  ;;  %s1371_s19 = smov 16  }
  0x22   : >> { %v215_v33 = vor.u32 %v214_v23, %v211_v22  ;;  %v681_v34 = vrot.slane %v679_v24, 4  ;;  %v684_v35 = vrot.slane %v682_v25, 5  ;;  %v384_v36 = vshll.u32 %v1102_v26, 16  ;;  %v1105_v37 = vld [vmem:[%s1474_s9 + $0x8] sm:$0xf]  ;;  %s1372_s21 = smov 20  }
  0x23   : >> { %v237_v38 = vrot.slane %v236_v27, 4  ;;  %v690_v39 = vrot.slane %v688_v29, 5  ;;  %v383_v40 = vrot.slane %v381_v31, 4  ;;  %v390_v41 = vshll.u32 %v1103_v30, 16  ;;  %v1106_v42 = vld [vmem:[%s1474_s9 + $0xc] sm:$0x1] }
  0x24   : >> { %v216_v43 = vrot.slane %v215_v33, 4  ;;  %v685_v44 = vor.u32 %v684_v35, %v681_v34  ;;  %v386_v45 = vrot.slane %v384_v36, 5  ;;  %v416_v46 = vshrl.u32 %v1105_v37, 16  ;;  %v1120_v47 = vld [vmem:[%s1474_s9 + $0x8] sm:$0xf]  ;;  %s1373_s23 = smov 24  }
  0x25   : >> { %v242_v48 = vsel %vm1497_vm5, %v237_v38, %v241_v19  ;;  %v392_v49 = vrot.slane %v390_v41, 5  ;;  %v419_v50 = vshll.u32 %v1105_v37, 16  ;;  %v425_v51 = vshll.u32 %v1106_v42, 16  ;;  %v1121_v52 = vld [vmem:[%s1474_s9 + $0xc] sm:$0x1]  ;;  %s1374_s28 = smov 28  }
  0x26   : >> { %243 = vrot.lane.b32.xlu1 %v242_v48, %s1369_s11  ;;  %v221_v53 = vsel %vm1497_vm5, %v216_v43, %v220_v28  ;;  %v686_v54 = vrot.slane %v685_v44, 4  ;;  %v387_v55 = vor.u32 %v386_v45, %v383_v40  ;;  %v418_v56 = vrot.slane %v416_v46, 4  ;;  %v1143_v57 = vld [vmem:[%s1474_s9 + $0x8] sm:$0xe]  ;;  %v1144_v58 = vld [vmem:[%s1474_s9 + $0xc] sm:$0x1] }
  0x27   : >> { %222 = vrot.lane.b32.xlu0 %v221_v53, %s1370_s18  ;;  %v421_v59 = vrot.slane %v419_v50, 5  ;;  %v427_v60 = vrot.slane %v425_v51, 5  ;;  %v522_v61 = vshrl.u32 %v1120_v47, 16  ;;  %v525_v62 = vshll.u32 %v1120_v47, 16  ;;  %v1122_v63 = vld [vmem:[%s1474_s9 + $0x98] sm:$0xf] }
  0x28   : >> { %v691_v1 = vsel %vm1497_vm5, %v686_v54, %v690_v39  ;;  %v388_v2 = vrot.slane %v387_v55, 4  ;;  %v531_v3 = vshll.u32 %v1121_v52, 16  ;;  %v1145_v4 = vrot.slane %v1143_v57, 9  ;;  %v1123_v5 = vld [vmem:[%s1474_s9 + $0x9c] sm:$0x1]  ;;  %s1375_s4 = smov 32  }
  0x29   : >> { %v422_v6 = vor.u32 %v421_v59, %v418_v56  ;;  %v524_v7 = vrot.slane %v522_v61, 4  ;;  %v527_v8 = vrot.slane %v525_v62, 5  ;;  %v702_v9 = vrot.slane %v1144_v58, 5  ;;  %v1107_v10 = vld [vmem:[%s1474_s9 + $0x98] sm:$0xf] }
  0x2a   : >> { %692 = vrot.lane.b32.xlu1 %v691_v1, %s1370_s18  ;;  %v393_v11 = vsel %vm1497_vm5, %v388_v2, %v392_v49  ;;  %v533_v12 = vrot.slane %v531_v3, 5  ;;  %v542_v13 = vshrl.u32 %v1122_v63, 16  ;;  %v545_v14 = vshll.u32 %v1122_v63, 16  ;;  %v1108_v15 = vld [vmem:[%s1474_s9 + $0x9c] sm:$0x1] }
  0x2b   : >> { %394 = vrot.lane.b32.xlu0 %v393_v11, %s1370_s18  ;;  %v423_v16 = vrot.slane %v422_v6, 4  ;;  %v528_v17 = vor.u32 %v527_v8, %v524_v7  ;;  %v703_v18 = vsel %vm1476_vm3, %v1145_v4, %v702_v9  ;;  %v551_v19 = vshll.u32 %v1123_v5, 16  ;;  %v1088_v20 = vld [vmem:[%s1474_s9 + $0x8] sm:$0xf]  ;;  %v1089_v25 = vld [vmem:[%s1474_s9 + $0xc] sm:$0x1] }
  0x2c   : >> { %v544_v21 = vrot.slane %v542_v13, 4  ;;  %v547_v22 = vrot.slane %v545_v14, 5  ;;  %v436_v23 = vshrl.u32 %v1107_v10, 16  ;;  %v439_v24 = vshll.u32 %v1107_v10, 16  ;;  %v1146_v30 = vld [vmem:[%s1474_s9 + $0x10] sm:$0xf] }
  0x2d   : >> { %v428_v26 = vsel %vm1497_vm5, %v423_v16, %v427_v60  ;;  %v529_v27 = vrot.slane %v528_v17, 4  ;;  %v553_v28 = vrot.slane %v551_v19, 5  ;;  %v445_v29 = vshll.u32 %v1108_v15, 16  ;;  %v1147_v36 = vld [vmem:[%s1474_s9 + $0x14] sm:$0x1] }
  0x2e   : >> { %429 = vrot.lane.b32.xlu1 %v428_v26, %s1368_s10  ;;  %v548_v31 = vor.u32 %v547_v22, %v544_v21  ;;  %v438_v33 = vrot.slane %v436_v23, 4  ;;  %v441_v34 = vrot.slane %v439_v24, 5  ;;  %v265_v35 = vshrl.u32 %v1088_v20, 16  ;;  %v1535_v41 = vld [vmem:[%s1474_s9 + $0x8] sm:$0xe] }
  0x2f   : >> { %v534_v37 = vsel %vm1497_vm5, %v529_v27, %v533_v12  ;;  %v447_v38 = vrot.slane %v445_v29, 5  ;;  %v268_v39 = vshll.u32 %v1088_v20, 16  ;;  %v274_v40 = vshll.u32 %v1089_v25, 16  ;;  %v1110_v46 = vld [vmem:[%s1474_s9 + $0xc] sm:$0x1] }
  0x30   : >> { %535 = vrot.lane.b32.xlu0 %v534_v37, %s1370_s18  ;;  %v549_v42 = vrot.slane %v548_v31, 4  ;;  %v442_v43 = vor.u32 %v441_v34, %v438_v33  ;;  %v267_v44 = vrot.slane %v265_v35, 4  ;;  %v711_v45 = vshrl.u32 %v1146_v30, 16  ;;  %v1090_v51 = vld [vmem:[%s1474_s9 + $0x98] sm:$0xf] }
  0x31   : >> { %v270_v47 = vrot.slane %v268_v39, 5  ;;  %v276_v48 = vrot.slane %v274_v40, 5  ;;  %v714_v49 = vshll.u32 %v1146_v30, 16  ;;  %v720_v50 = vshll.u32 %v1147_v36, 16  ;;  %v1091_v56 = vld [vmem:[%s1474_s9 + $0x9c] sm:$0x1] }
  0x32   : >> { %704 = vrot.lane.b32.xlu1 %v703_v18, %s1369_s11  ;;  %v554_v52 = vsel %vm1497_vm5, %v549_v42, %v553_v28  ;;  %v443_v53 = vrot.slane %v442_v43, 4  ;;  %v713_v54 = vrot.slane %v711_v45, 4  ;;  %v1111_v55 = vrot.slane %v1535_v41, 9  ;;  %v1148_v61 = vld [vmem:[%s1474_s9 + $0xa0] sm:$0xf] }
  0x33   : >> { %v271_v57 = vor.u32 %v270_v47, %v267_v44  ;;  %v716_v58 = vrot.slane %v714_v49, 5  ;;  %v722_v59 = vrot.slane %v720_v50, 5  ;;  %v459_v60 = vrot.slane %v1110_v46, 5  ;;  %v1149_v3 = vld [vmem:[%s1474_s9 + $0xa4] sm:$0x1] }
  0x34   : >> { %555 = vrot.lane.b32.xlu0 %v554_v52, %s1369_s11  ;;  %v448_v62 = vsel %vm1497_vm5, %v443_v53, %v447_v38  ;;  %v286_v63 = vshrl.u32 %v1090_v51, 16  ;;  %v289_v1 = vshll.u32 %v1090_v51, 16  ;;  %v295_v2 = vshll.u32 %v1091_v56, 16  ;;  %v1125_v7 = vld [vmem:[%s1474_s9 + $0x10] sm:$0xf] }
  0x35   : >> { %v272_v4 = vrot.slane %v271_v57, 4  ;;  %v717_v5 = vor.u32 %v716_v58, %v713_v54  ;;  %v731_v6 = vshrl.u32 %v1148_v61, 16  ;;  %v1126_v8 = vld [vmem:[%s1474_s9 + $0x14] sm:$0x1]  ;;  %v734_v12 = vshll.u32 %v1148_v61, 16 }
  0x36   : >> { %449 = vrot.lane.b32.xlu1 %v448_v62, %s1371_s19  ;;  %v288_v9 = vrot.slane %v286_v63, 4  ;;  %v291_v10 = vrot.slane %v289_v1, 5  ;;  %v297_v11 = vrot.slane %v295_v2, 5  ;;  %v1112_v13 = vld [vmem:[%s1474_s9 + $0x10] sm:$0xf]  ;;  %v740_v18 = vshll.u32 %v1149_v3, 16 }
  0x37   : >> { %v277_v14 = vsel %vm1497_vm5, %v272_v4, %v276_v48  ;;  %v718_v15 = vrot.slane %v717_v5, 4  ;;  %v1124_v16 = vld [vmem:[%s1474_s9 + $0xa0] sm:$0xf]  ;;  %v733_v17 = vrot.slane %v731_v6, 4  ;;  %v736_v20 = vrot.slane %v734_v12, 5 }
  0x38   : >> { %278 = vrot.lane.b32.xlu0 %v277_v14, %s1371_s19  ;;  %v292_v19 = vor.u32 %v291_v10, %v288_v9  ;;  %v568_v21 = vshrl.u32 %v1125_v7, 16  ;;  %v571_v22 = vshll.u32 %v1125_v7, 16  ;;  %v1113_v23 = vld [vmem:[%s1474_s9 + $0x14] sm:$0x1]  ;;  %v742_v25 = vrot.slane %v740_v18, 5 }
  0x39   : >> { %v723_v24 = vsel %vm1497_vm5, %v718_v15, %v722_v59  ;;  %v577_v26 = vshll.u32 %v1126_v8, 16  ;;  %v468_v27 = vshrl.u32 %v1112_v13, 16  ;;  %v1562_v28 = vld [vmem:[%s1474_s9 + $0x10] sm:$0xe]  ;;  %v737_v30 = vor.u32 %v736_v20, %v733_v17  ;;  %v1151_v34 = vld [vmem:[%s1474_s9 + $0x14] sm:$0x1] }
  0x3a   : >> { %724 = vrot.lane.b32.xlu1 %v723_v24, %s1368_s10  ;;  %v293_v29 = vrot.slane %v292_v19, 4  ;;  %v570_v31 = vrot.slane %v568_v21, 4  ;;  %v573_v33 = vrot.slane %v571_v22, 5  ;;  %v460_v35 = vsel %vm1476_vm3, %v1111_v55, %v459_v60  ;;  %v1127_v39 = vld [vmem:[%s1474_s9 + $0xa0] sm:$0xf] }
  0x3b   : >> { %v470_v36 = vrot.slane %v468_v27, 4  ;;  %v471_v37 = vshll.u32 %v1112_v13, 16  ;;  %v477_v38 = vshll.u32 %v1113_v23, 16  ;;  %v738_v41 = vrot.slane %v737_v30, 4  ;;  %v1128_v44 = vld [vmem:[%s1474_s9 + $0xa4] sm:$0x1] }
  0x3c   : >> { %561 = vrot.lane.b32.xlu0 %v1124_v16, %s1368_s10  ;;  %v298_v40 = vsel %vm1497_vm5, %v293_v29, %v297_v11  ;;  %v574_v42 = vor.u32 %v573_v33, %v570_v31  ;;  %v579_v43 = vrot.slane %v577_v26, 5  ;;  %v1114_v45 = vld [vmem:[%s1474_s9 + $0xa0] sm:$0xf]  ;;  %v1152_v48 = vrot.slane %v1562_v28, 9  ;;  %v1098_v54 = vld [vmem:[%s1474_s9 + $0x10] sm:$0xf] }
  0x3d   : >> { %v473_v46 = vrot.slane %v471_v37, 5  ;;  %v479_v47 = vrot.slane %v477_v38, 5  ;;  %v588_v49 = vshrl.u32 %v1127_v39, 16  ;;  %v743_v50 = vsel %vm1497_vm5, %v738_v41, %v742_v25  ;;  %v1115_v58 = vld [vmem:[%s1474_s9 + $0xa4] sm:$0x1] }
  0x3e   : >> { %461 = vrot.lane.b32.xlu1 %v460_v35, %s1372_s21  ;;  %v575_v51 = vrot.slane %v574_v42, 4  ;;  %v754_v52 = vrot.slane %v1151_v34, 5  ;;  %v591_v53 = vshll.u32 %v1127_v39, 16  ;;  %v597_v57 = vshll.u32 %v1128_v44, 16  ;;  %v1099_v62 = vld [vmem:[%s1474_s9 + $0x14] sm:$0x1] }
  0x3f   : >> { %v474_v55 = vor.u32 %v473_v46, %v470_v36  ;;  %v590_v56 = vrot.slane %v588_v49, 4  ;;  %v488_v59 = vshrl.u32 %v1114_v45, 16  ;;  %v491_v61 = vshll.u32 %v1114_v45, 16  ;;  %v1153_v63 = vld [vmem:[%s1474_s9 + $0x18] sm:$0xf] }
  0x40   : >> { %299 = vrot.lane.b32.xlu0 %v298_v40, %s1372_s21  ;;  %v593_v60 = vrot.slane %v591_v53, 5  ;;  %v580_v1 = vsel %vm1497_vm5, %v575_v51, %v579_v43  ;;  %v321_v4 = vshrl.u32 %v1098_v54, 16  ;;  %v497_v7 = vshll.u32 %v1115_v58, 16  ;;  %v1095_v10 = vld [vmem:[%s1474_s9 + $0xa0] sm:$0xf] }
  0x41   : >> { %v475_v2 = vrot.slane %v474_v55, 4  ;;  %v490_v3 = vrot.slane %v488_v59, 4  ;;  %v493_v6 = vrot.slane %v491_v61, 5  ;;  %v324_v8 = vshll.u32 %v1098_v54, 16  ;;  %v1154_v13 = vld [vmem:[%s1474_s9 + $0x1c] sm:$0x1] }
  0x42   : >> { %744 = vrot.lane.b32.xlu1 %v743_v50, %s1371_s19  ;;  %v594_v5 = vor.u32 %v593_v60, %v590_v56  ;;  %v323_v11 = vrot.slane %v321_v4, 4  ;;  %v330_v12 = vshll.u32 %v1099_v62, 16  ;;  %v763_v14 = vshrl.u32 %v1153_v63, 16  ;;  %v1100_v19 = vld [vmem:[%s1474_s9 + $0xa0] sm:$0xf] }
  0x43   : >> { %v480_v9 = vsel %vm1497_vm5, %v475_v2, %v479_v47  ;;  %v599_v16 = vrot.slane %v597_v57, 5  ;;  %v494_v17 = vor.u32 %v493_v6, %v490_v3  ;;  %v326_v18 = vrot.slane %v324_v8, 5  ;;  %v1116_v23 = vld [vmem:[%s1474_s9 + $0x10] sm:$0xe]  ;;  %v1117_v24 = vld [vmem:[%s1474_s9 + $0x14] sm:$0x1] }
  0x44   : >> { %581 = vrot.lane.b32.xlu0 %v580_v1, %s1371_s19  ;;  %v595_v15 = vrot.slane %v594_v5, 4  ;;  %v755_v20 = vsel %vm1476_vm3, %v1152_v48, %v754_v52  ;;  %v765_v21 = vrot.slane %v763_v14, 4  ;;  %v766_v22 = vshll.u32 %v1153_v63, 16  ;;  %v1155_v29 = vld [vmem:[%s1474_s9 + $0xa8] sm:$0xf] }
  0x45   : >> { %v495_v25 = vrot.slane %v494_v17, 4  ;;  %v499_v26 = vrot.slane %v497_v7, 5  ;;  %v327_v27 = vor.u32 %v326_v18, %v323_v11  ;;  %v772_v28 = vshll.u32 %v1154_v13, 16  ;;  %v1101_v33 = vld [vmem:[%s1474_s9 + $0xa4] sm:$0x1] }
  0x46   : >> { %481 = vrot.lane.b32.xlu1 %v480_v9, %s1373_s23  ;;  %v332_v30 = vrot.slane %v330_v12, 5  ;;  %v768_v31 = vrot.slane %v766_v22, 5  ;;  %v342_v34 = vshrl.u32 %v1100_v19, 16  ;;  %v345_v35 = vshll.u32 %v1100_v19, 16  ;;  %v1135_v40 = vld [vmem:[%s1474_s9 + $0x18] sm:$0xf] }
  0x47   : >> { %v600_v36 = vsel %vm1497_vm5, %v595_v15, %v599_v16  ;;  %v328_v37 = vrot.slane %v327_v27, 4  ;;  %v1118_v38 = vrot.slane %v1116_v23, 9  ;;  %v511_v39 = vrot.slane %v1117_v24, 5  ;;  %v1156_v48 = vld [vmem:[%s1474_s9 + $0xac] sm:$0x1] }
  0x48   : >> { %311 = vrot.lane.b32.xlu0 %v1095_v10, %s1373_s23  ;;  %v769_v41 = vor.u32 %v768_v31, %v765_v21  ;;  %v344_v42 = vrot.slane %v342_v34, 4  ;;  %v347_v43 = vrot.slane %v345_v35, 5  ;;  %v783_v44 = vshrl.u32 %v1155_v29, 16  ;;  %v1136_v53 = vld [vmem:[%s1474_s9 + $0x1c] sm:$0x1] }
  0x49   : >> { %v500_v45 = vsel %vm1497_vm5, %v495_v25, %v499_v26  ;;  %v774_v46 = vrot.slane %v772_v28, 5  ;;  %v351_v47 = vshll.u32 %v1101_v33, 16  ;;  %v786_v49 = vshll.u32 %v1155_v29, 16  ;;  %v1137_v57 = vld [vmem:[%s1474_s9 + $0xa8] sm:$0xf] }
  0x4a   : >> { %756 = vrot.lane.b32.xlu1 %v755_v20, %s1372_s21  ;;  %v770_v50 = vrot.slane %v769_v41, 4  ;;  %v348_v51 = vor.u32 %v347_v43, %v344_v42  ;;  %v785_v52 = vrot.slane %v783_v44, 4  ;;  %v621_v54 = vshrl.u32 %v1135_v40, 16  ;;  %v1078_v58 = vld [vmem:[%s1474_s9 + $0x90] sm:$0xf] }
  0x4b   : >> { %v788_v55 = vrot.slane %v786_v49, 5  ;;  %v624_v56 = vshll.u32 %v1135_v40, 16  ;;  %v333_v59 = vsel %vm1497_vm5, %v328_v37, %v332_v30  ;;  %v792_v60 = vshll.u32 %v1156_v48, 16  ;;  %200 = vst.msk [vmem:[#allocation2] sm:$0xf] %vm199_vm6, %v1078_v58 }
  0x4c   : >> { %601 = vrot.lane.b32.xlu0 %v600_v36, %s1372_s21  ;;  %v623_v61 = vrot.slane %v621_v54, 4  ;;  %v1139_v62 = vld [vmem:[%s1474_s9 + $0x8] sm:$0xf]  ;;  %v349_v63 = vrot.slane %v348_v51, 4  ;;  %v353_v1 = vrot.slane %v351_v47, 5  ;;  %v630_v3 = vshll.u32 %v1136_v53, 16 }
  0x4d   : >> { %v626_v2 = vrot.slane %v624_v56, 5  ;;  %v775_v4 = vsel %vm1497_vm5, %v770_v50, %v774_v46  ;;  %v1132_v5 = vld [vmem:[%s1474_s9 + $0xa8] sm:$0xf]  ;;  %v789_v6 = vor.u32 %v788_v55, %v785_v52  ;;  %v1138_v7 = vld [vmem:[%s1474_s9 + $0xac] sm:$0x1]  ;;  %v641_v8 = vshrl.u32 %v1137_v57, 16 }
  0x4e   : >> { %501 = vrot.lane.b32.xlu1 %v500_v45, %s1374_s28  ;;  %v644_v9 = vshll.u32 %v1137_v57, 16  ;;  %v1140_v10 = vld [vmem:[%s1474_s9 + $0xc] sm:$0x1]  ;;  %v360_v11 = vld [vmem:[%s1474_s9] sm:$0xf]  ;;  %v512_v12 = vsel %vm1476_vm3, %v1118_v38, %v511_v39  ;;  %v661_v14 = vshrl.u32 %v1139_v62, 16  ;;  %v354_v21 = vsel %vm1497_vm5, %v349_v63, %v353_v1 }
  0x4f   : >> { %v627_v13 = vor.u32 %v626_v2, %v623_v61  ;;  %v361_v15 = vld [vmem:[%s1474_s9 + $0x4] sm:$0x1]  ;;  %v1119_v16 = vld [vmem:[%s1474_s9 + $0x98] sm:$0xf]  ;;  %v794_v17 = vrot.slane %v792_v60, 5  ;;  %v643_v18 = vrot.slane %v641_v8, 4 }
  0x50   : >> { %334 = vrot.lane.b32.xlu0 %v333_v59, %s1374_s28  ;;  %v646_v19 = vrot.slane %v644_v9, 5  ;;  %v664_v20 = vshll.u32 %v1139_v62, 16  ;;  %518 = vst.msk [vmem:[#allocation2 + $0x8] sm:$0xf] %vm199_vm6, %v1119_v16  ;;  %v632_v22 = vrot.slane %v630_v3, 5  ;;  %v663_v24 = vrot.slane %v661_v14, 4 }
  0x51   : >> { %v1157_v23 = vld [vmem:[%s1474_s9 + $0x18] sm:$0xe]  ;;  %v670_v25 = vshll.u32 %v1140_v10, 16  ;;  %v790_v26 = vrot.slane %v789_v6, 4  ;;  %v1158_v27 = vld [vmem:[%s1474_s9 + $0x1c] sm:$0x1] }
  0x52   : >> { %776 = vrot.lane.b32.xlu1 %v775_v4, %s1373_s23  ;;  %v666_v28 = vrot.slane %v664_v20, 5  ;;  %v363_v29 = vshrl.u32 %v360_v11, 16  ;;  %v366_v30 = vshll.u32 %v360_v11, 16  ;;  %v628_v31 = vrot.slane %v627_v13, 4  ;;  %v1278_v47 = vld [vmem:[%s1758_s1 + $0x8] sm:$0xff]   ;;  %v1280_v56 = vld [vmem:[%s1758_s1] sm:$0xff]  }
  0x53   : >> { %v647_v33 = vor.u32 %v646_v19, %v643_v18  ;;  %v650_v34 = vshll.u32 %v1138_v7, 16  ;;  %v372_v35 = vshll.u32 %v361_v15, 16  ;;  %v672_v37 = vrot.slane %v670_v25, 5  ;;  %v1277_v40 = vld [vmem:[%s1758_s1 + $0x10] ss:$0 sps:$4 sm:$0x33]  }
  0x54   : >> { %612 = vrot.lane.b32.xlu0 %v1132_v5, %s1373_s23  ;;  %v667_v36 = vor.u32 %v666_v28, %v663_v24  ;;  %v365_v38 = vrot.slane %v363_v29, 4  ;;  %v368_v39 = vrot.slane %v366_v30, 5  ;;  %v1159_v41 = vrot.slane %v1157_v23, 9  ;;  %1202 = vmatprep.subr.msk.bf16.mxu0 %vm853_vm7, %v1277_v40  ;;  %s1168_s21 = sshll.u32 %s1366_s7, 3  ;;  %s190_s7 = sadd.s32 1, %s1366_s7  }
  0x55   : >> { %v806_v42 = vrot.slane %v1158_v27, 5  ;;  %v795_v43 = vsel %vm1497_vm5, %v790_v26, %v794_v17  ;;  %v374_v46 = vrot.slane %v372_v35, 5  ;;  %v633_v48 = vsel %vm1497_vm5, %v628_v31, %v632_v22  ;;  %s919_s23 = scalar_lea.vmem %s177_s6, %s1168_s21 [#allocation3]  ;;  %p187_p12 = scmp.ge.s32.totalorder %s190_s7, 8  }
  0x56   : >> { %513 = vrot.lane.b32.xlu1 %v512_v12, %s1375_s4  ;;  %v668_v44 = vrot.slane %v667_v36, 4  ;;  %v369_v45 = vor.u32 %v368_v39, %v365_v38  ;;  %v652_v49 = vrot.slane %v650_v34, 5  ;;  %v648_v50 = vrot.slane %v647_v33, 4  ;;  %v1167_v34 = vld [vmem:[%s1759_s2] ss:$0 sm:$0xff]  ;;  %s938_s8 = sshll.u32 (%p187_p12), %s177_s6, 4  ;;  %s1708_s8 = int_to_ptr.vmem [resolvable:$true] %s938_s8 }
  0x57   : >> { %v855_v53 = vsel %vm853_vm7, %v1277_v40, 0  ;;  %v807_v54 = vsel %vm1476_vm3, %v1159_v41, %v806_v42  ;;  %vm246_vm9 = vcmask 93248   ;;  %vm258_vm10 = vcmask 126048   ;;  %s1712_s7 = scalar_lea.sflag (%p187_p12), [#allocation4], %s175_s26  ;;  %s1282_s5 = scalar_lea.vmem (%p187_p12), %s1708_s8, 1024 }
  0x58   : >> { %355 = vrot.lane.b32.xlu0 %v354_v21, %s1375_s4  ;;  %v673_v51 = vsel %vm1497_vm5, %v668_v44, %v672_v37  ;;  %v370_v52 = vrot.slane %v369_v45, 4  ;;  %1193 = vmatpush3.bf16.msra.mxu0 %v855_v53  ;;  %v653_v57 = vsel %vm1497_vm5, %v648_v50, %v652_v49  ;;  %vm281_vm11 = vcmask 158848   ;;  %p1283_p13 = scmp.ne.s32.totalorder (%p187_p12), %s1708_s8, %s1282_s5 }
  0x59   : >> { %675 = vst.msk [vmem:[#allocation2 + $0xc] sm:$0xf] %vm199_vm6, %v673_v51  ;;  %1194 = vmatprep.subr.bf16.mxu0 %v1278_v47  ;;  %vm302_vm12 = vcmask 191648   ;;  %vm314_vm13 = vcmask 224448   ;;  %vm337_vm14 = vcmask 257248   ;;  %vm358_vm15 = vcmask 290048  }
  0x5a   : >> { %796 = vrot.lane.b32.xlu1 %v795_v43, %s1374_s28  ;;  %v375_v55 = vsel %vm1497_vm5, %v370_v52, %v374_v46  ;;  %vm846_vm0 = vcmask 293888   ;;  %vm920_vm1 = vcmask 64512   ;;  %p1284_p0 = pnand (%p187_p12), %p1283_p13, %p1439_p4 }
  0x5b   : >> { %377 = vst.msk [vmem:[#allocation2 + $0x4] sm:$0xf] %vm199_vm6, %v375_v55 }
  0x5c   : >> { %634 = vrot.lane.b32.xlu0 %v633_v48, %s1374_s28  ;;  %1195 = vmatpush3.bf16.msra.mxu0 %v1278_v47  ;;  %s1186_s28 = sshll.u32 (%p187_p12), %s1354_s15, 10  ;;  %p1285_p1 = pneg (%p187_p12), %p1284_p0 }
  0x5d   : >> { %1196 = vmatprep.subr.bf16.mxu0 %v1280_v56  ;;  %s1376_s15 = smov (%p187_p12), [#allocation3]  }
  0x5e   : >> { %808 = vrot.lane.b32.xlu1 %v807_v54, %s1375_s4  ;;  %s1286_s9 = sshll.u32 (%p187_p12), %s1376_s15, 4  ;;  %s1287_s9 = int_to_ptr.vmem [resolvable:$false] %s1286_s9 }
  0x5f   : > { %s1288_s10 = scalar_lea.vmem (%p187_p12), %s1287_s9, 2048  ;;  %p1289_p2 = scmp.lt.s32.totalorder (%p187_p12), %s1708_s8, %s1287_s9 }
  0x60   : >> { %654 = vrot.lane.b32.xlu0 %v653_v57, %s1375_s4  ;;  %1197 = vmatpush3.bf16.msra.mxu0 %v1280_v56  ;;  %s1704_s4 = scalar_lea.hbm (%p187_p12), %s1760_s3, %s1186_s28  ;;  %p1290_p3 = scmp.lt.s32.totalorder (%p187_p12), %s1288_s10, %s1282_s5 }
  0x62   : > { %p1291_p5 = por (%p187_p12), %p1290_p3, %p1289_p2 }
  0x64   : > { %p1292_p6 = pnand (%p187_p12), %p1291_p5, %p1285_p1 }
  0x8e   : >> { %v256_v58 = vpop.permute.xlu0 %255 }
  0x91   : >> { %v410_v0 = vpop.permute.xlu1 %409 }
  0x98   : >> { %v244_v59 = vpop.permute.xlu1 %243 }
  0x99   : >> { %v223_v60 = vpop.permute.xlu0 %222 }
  0x9a   : >> { %226 = vst.msk [vmem:[#allocation2] sm:$0xf] %vm225_vm8, %v223_v60 }
  0x9b   : >> { %247 = vst.msk [vmem:[#allocation2] sm:$0xf] %vm246_vm9, %v244_v59 }
  0x9c   : >> { %v693_v32 = vpop.permute.xlu1 %692  ;;  %259 = vst.msk [vmem:[#allocation2] sm:$0xf] %vm258_vm10, %v256_v58 }
  0x9d   : >> { %695 = vst.msk [vmem:[#allocation2 + $0xc] sm:$0xf] %vm225_vm8, %v693_v32  ;;  %v395_v61 = vpop.permute.xlu0 %394 }
  0x9e   : >> { %397 = vst.msk [vmem:[#allocation2 + $0x4] sm:$0xf] %vm225_vm8, %v395_v61 }
  0x9f   : >> { %412 = vst.msk [vmem:[#allocation2 + $0x4] sm:$0xf] %vm246_vm9, %v410_v0 }
  0xa0   : >> { %v430_v62 = vpop.permute.xlu1 %429 }
  0xa1   : >> { %432 = vst.msk [vmem:[#allocation2 + $0x4] sm:$0xf] %vm258_vm10, %v430_v62 }
  0xa2   : >> { %v536_v63 = vpop.permute.xlu0 %535 }
  0xa3   : >> { %538 = vst.msk [vmem:[#allocation2 + $0x8] sm:$0xf] %vm225_vm8, %v536_v63 }
  0xa4   : >> { %v705_v1 = vpop.permute.xlu1 %704 }
  0xa5   : >> { %707 = vst.msk [vmem:[#allocation2 + $0xc] sm:$0xf] %vm246_vm9, %v705_v1 }
  0xa6   : >> { %v556_v2 = vpop.permute.xlu0 %555 }
  0xa7   : >> { %558 = vst.msk [vmem:[#allocation2 + $0x8] sm:$0xf] %vm246_vm9, %v556_v2 }
  0xa8   : >> { %v450_v3 = vpop.permute.xlu1 %449 }
  0xa9   : >> { %452 = vst.msk [vmem:[#allocation2 + $0x4] sm:$0xf] %vm281_vm11, %v450_v3 }
  0xaa   : >> { %v279_v4 = vpop.permute.xlu0 %278 }
  0xab   : >> { %282 = vst.msk [vmem:[#allocation2] sm:$0xf] %vm281_vm11, %v279_v4 }
  0xac   : >> { %v725_v5 = vpop.permute.xlu1 %724 }
  0xad   : >> { %727 = vst.msk [vmem:[#allocation2 + $0xc] sm:$0xf] %vm258_vm10, %v725_v5 }
  0xae   : >> { %v562_v6 = vpop.permute.xlu0 %561 }
  0xaf   : >> { %564 = vst.msk [vmem:[#allocation2 + $0x8] sm:$0xf] %vm258_vm10, %v562_v6 }
  0xb0   : >> { %v462_v7 = vpop.permute.xlu1 %461 }
  0xb1   : >> { %464 = vst.msk [vmem:[#allocation2 + $0x4] sm:$0xf] %vm302_vm12, %v462_v7 }
  0xb2   : >> { %v300_v8 = vpop.permute.xlu0 %299 }
  0xb3   : >> { %303 = vst.msk [vmem:[#allocation2] sm:$0xf] %vm302_vm12, %v300_v8 }
  0xb4   : >> { %v745_v9 = vpop.permute.xlu1 %744 }
  0xb5   : >> { %747 = vst.msk [vmem:[#allocation2 + $0xc] sm:$0xf] %vm281_vm11, %v745_v9 }
  0xb6   : >> { %v582_v10 = vpop.permute.xlu0 %581 }
  0xb7   : >> { %584 = vst.msk [vmem:[#allocation2 + $0x8] sm:$0xf] %vm281_vm11, %v582_v10 }
  0xb8   : >> { %v482_v11 = vpop.permute.xlu1 %481 }
  0xb9   : >> { %484 = vst.msk [vmem:[#allocation2 + $0x4] sm:$0xf] %vm314_vm13, %v482_v11 }
  0xba   : >> { %v312_v12 = vpop.permute.xlu0 %311 }
  0xbb   : >> { %315 = vst.msk [vmem:[#allocation2] sm:$0xf] %vm314_vm13, %v312_v12 }
  0xbc   : >> { %v757_v13 = vpop.permute.xlu1 %756 }
  0xbd   : >> { %759 = vst.msk [vmem:[#allocation2 + $0xc] sm:$0xf] %vm302_vm12, %v757_v13 }
  0xbe   : >> { %v602_v14 = vpop.permute.xlu0 %601 }
  0xbf   : >> { %604 = vst.msk [vmem:[#allocation2 + $0x8] sm:$0xf] %vm302_vm12, %v602_v14 }
  0xc0   : >> { %v502_v15 = vpop.permute.xlu1 %501 }
  0xc1   : >> { %504 = vst.msk [vmem:[#allocation2 + $0x4] sm:$0xf] %vm337_vm14, %v502_v15 }
  0xc2   : >> { %v335_v16 = vpop.permute.xlu0 %334 }
  0xc3   : >> { %338 = vst.msk [vmem:[#allocation2] sm:$0xf] %vm337_vm14, %v335_v16 }
  0xc4   : >> { %v777_v17 = vpop.permute.xlu1 %776 }
  0xc5   : >> { %779 = vst.msk [vmem:[#allocation2 + $0xc] sm:$0xf] %vm314_vm13, %v777_v17 }
  0xc6   : >> { %v613_v18 = vpop.permute.xlu0 %612 }
  0xc7   : >> { %615 = vst.msk [vmem:[#allocation2 + $0x8] sm:$0xf] %vm314_vm13, %v613_v18 }
  0xc8   : >> { %v514_v19 = vpop.permute.xlu1 %513 }
  0xc9   : >> { %516 = vst.msk [vmem:[#allocation2 + $0x4] sm:$0xf] %vm358_vm15, %v514_v19 }
  0xca   : >> { %v356_v20 = vpop.permute.xlu0 %355 }
  0xcb   : >> { %359 = vst.msk [vmem:[#allocation2] sm:$0xf] %vm358_vm15, %v356_v20 }
  0xcc   : >> { %v797_v21 = vpop.permute.xlu1 %796 }
  0xcd   : >> { %799 = vst.msk [vmem:[#allocation2 + $0xc] sm:$0xf] %vm337_vm14, %v797_v21 }
  0xce   : >> { %v635_v22 = vpop.permute.xlu0 %634 }
  0xcf   : >> { %637 = vst.msk [vmem:[#allocation2 + $0x8] sm:$0xf] %vm337_vm14, %v635_v22 }
  0xd0   : >> { %v809_v23 = vpop.permute.xlu1 %808 }
  0xd1   : >> { %811 = vst.msk [vmem:[#allocation2 + $0xc] sm:$0xf] %vm358_vm15, %v809_v23 }
  0xd2   : >> { %v655_v24 = vpop.permute.xlu0 %654  ;;  %v1279_v25 = vld [vmem:[#allocation2] sm:$0xff]  }
  0xd3   : >> { %657 = vst.msk [vmem:[#allocation2 + $0x8] sm:$0xf] %vm358_vm15, %v655_v24  ;;  %1198 = vmatprep.mubr.msk.bf16.mxu0 %vm846_vm0, %v1279_v25 }
  0xda   : >> { %v1281_v26 = vld [vmem:[#allocation2 + $0x8] sm:$0xff]  }
  0xdb   : >> { %1199 = vmatmul.mubr.msk.bf16.vlgmr.msra.gmra.mxu0 %vm846_vm0, %v1281_v26 }
 0x19b   : >> { %v1200_v27 = vpop.f32.mrf.mxu0 }
 0x19d   : >> { %v891_v28 = vpop.f32.mrf.mxu0 }
 0x19f   : >> { %v1201_v29 = vpop.f32.mrf.mxu0 }
 0x1a1   : >> { %v894_v30 = vpop.f32.mrf.mxu0 }
 0x1a2   : >> { %v906_v31 = vmax.f32 %v891_v28, %v894_v30 }
 0x1a4   : >> { %v907_v33 = vmax.f32 %v906_v31, %v1200_v27 }
 0x1a6   : >> { %v908_v35 = vmax.f32 %v907_v33, %v1201_v29 }
 0x1a8   : >> { %v916_v36 = vadd.f32 %v1167_v34, %v908_v35  ;;  %189 = sbr.rel (!%p187_p12) target bundleno = 25 (0x19), region = 83 }
 0x1aa   : >> { %v917_v37 = vmax.f32 %v916_v36, 0.0 }
 0x1ac   : >> { %921 = vst.msk [vmem:[%s919_s23] sm:$0xff] %vm920_vm1, %v917_v37 }
 0x1ad   : > { %1295 = shalt.err (!%p1292_p6)
}
 0x1ae   : > { %s1296_s26 = scalar_lea.hbm %s1704_s4, 1024  ;;  %s1300_s11 = scalar_lea.hbm %s1760_s3, 2048 }
 0x1af   : > { %p1297_p7 = scmp.ne.s32.totalorder %s1704_s4, %s1296_s26  ;;  %p1301_p11 = scmp.lt.s32.totalorder %s1704_s4, %s1760_s3 }
 0x1b0   : > { %p1302_p12 = scmp.lt.s32.totalorder %s1300_s11, %s1296_s26 }
 0x1b1   : > { %p1298_p9 = pnand %p1297_p7, %p1439_p4 }
 0x1b2   : > { %p1303_p13 = por %p1302_p12, %p1301_p11 }
 0x1b3   : > { %p1299_p10 = pneg %p1298_p9 }
 0x1b5   : > { %p1304_p0 = pnand %p1303_p13, %p1299_p10 }
 0x1b7   : > { %1307 = shalt.err (!%p1304_p0)
}
 0x1b8   : > { %s1377_s21 = smov 128   ;;  %s1378_s23 = smov 8  }
 0x1b9   : > { %1204 = dma.vmem_to_hbm [thread:$0]  (%p1439_p4), %s1708_s8, 1024, %s1704_s4, %s1712_s7, %s1377_s21, %s1377_s21, %s1378_s23  }
 0x1ba PF: > { %p1210_p1 = scmp.ge.s32.totalorder %s1362_s17, 2  ;;  %s953_s28 = sand.u32 1, %s1342_s12  }
 0x1bb   : > { %s954_s29 = scalar_lea.sflag [#allocation4], %s953_s28 }
 0x1bc   : > { %p1207_p2 = pnand %p1210_p1, %p1446_p8 }
 0x1be   : > { %p1208_p3 = pneg %p1207_p2 }
 0x1c0   : > { %1337 = dma.done.wait (%p1208_p3), %s954_s29, 1024  }
 0x1c1   : > { %1339 = vsyncadd (%p1208_p3), %s954_s29, 4294966272  ;;  %s16_s17 = sadd.s32 1, %s1362_s17   ;;  %s1767_s12 = smov %s1346_s13 }
 0x1c2   : > { %p13_p5 = scmp.ge.s32.totalorder %s16_s17, 4   ;;  %s1768_s13 = smov %s1350_s14 }
 0x1c3   : > { %s1769_s14 = smov %s1452_s25  ;;  %s1770_s15 = smov %s1358_s16 }
 0x1c4   : > { %s1771_s16 = smov %s1773_s20  ;;  %15 = sbr.rel (!%p13_p5) target bundleno = 4 (0x4), region = 94 }
 0x1c9   :  { %959 = vsyncpa [#allocation4], 1 }
 0x1ca   :  { %961 = vsyncpa [#allocation4 + $0x1], 1 }

// kernel: tpu_custom_call.1
= control target key start
LH: loop header
LB: loop body
LE: loop exit
PB: predicated region body
PF: predicated region fallthrough
CT: control target
= control target key end

     0   :  { %8 = vsyncpa [#allocation4], 0  ;;  %s1757_s0 = inlined_call_operand.vmem [shape: bf16[2,2,18,10,4], index: 0, kind: input, shape index: {}]   ;;  %s1758_s1 = inlined_call_operand.vmem [shape: bf16[36,8], index: 1, kind: input, shape index: {}]   ;;  %s1759_s2 = inlined_call_operand.vmem [shape: f32[1,8], index: 2, kind: input, shape index: {}]   ;;  %s1760_s3 = inlined_call_operand.hbm [shape: f32[2,8,8,8], index: 3, kind: output, shape index: {}]  }
   0x1   :  { %10 = vsyncpa [#allocation4 + $0x1], 0  ;;  %s1399_s12 = smov 0   ;;  %s1401_s13 = smov 0  }
   0x2   :  { %s1403_s14 = smov 0   ;;  %s1405_s15 = smov 0  }
   0x3   :  { %s1407_s16 = smov 0   ;;  %s1409_s17 = smov 0  }
   0x4 LB: > { %s1067_s18 = sadd.s32 4294967295, %s1362_s17   ;;  %s1068_s19 = sadd.s32 4294967294, %s1362_s17   ;;  %s1362_s17 = sphi %s1409_s17, %s16_s17   ;;  %s1358_s16 = sphi %s1407_s16, %s1771_s16   ;;  %s1354_s15 = sphi %s1405_s15, %s1770_s15   ;;  %s1350_s14 = sphi %s1403_s14, %s1769_s14   ;;  %s1346_s13 = sphi %s1401_s13, %s1768_s13   ;;  %s1342_s12 = sphi %s1399_s12, %s1767_s12  }
   0x5   : > { %s28_s20 = sadd.s32 1, %s1358_s16  ;;  %s105_s21 = sadd.s32 1, %s1350_s14 }
   0x6   : > { %p30_p0 = scmp.ge.s32.totalorder %s28_s20, 2  ;;  %p115_p1 = scmp.ne.s32.totalorder %s1350_s14, %s1346_s13 }
   0x7   : > { %p116_p2 = scmp.eq.s32.totalorder %s1067_s18, 1  ;;  %p121_p3 = scmp.ne.s32.totalorder %s1346_s13, %s1342_s12 }
   0x8   : > { %s1773_s20 = smov (%p30_p0, %s28_s20), 0  ;;  %p122_p5 = scmp.eq.s32.totalorder %s1068_s19, 1 }
   0x9   : > { %p1439_p4 = por %p116_p2, %p115_p1  ;;  %s100_s23 = ssub.s32 %s1358_s16, %s1773_s20 }
   0xa   : > { %p1071_p6 = scmp.ge.s32.totalorder %s1362_s17, 1  ;;  %p103_p7 = scmp.eq.s32.totalorder %s100_s23, 0 }
   0xb   : > { %p1446_p8 = por %p122_p5, %p121_p3  ;;  %p154_p9 = scmp.lt.s32.totalorder %s1362_s17, 3 }
   0xc   : > { %s1452_s25 = scalar_select %p103_p7, %s1350_s14, %s105_s21  }
   0xd   : > { %p155_p10 = pnand %p1071_p6, %p154_p9 }
   0xe   : > { %s175_s26 = sand.u32 (!%p155_p10), 1, %s1346_s13   ;;  %p178_p11 = scmp.lt.s32.totalorder (!%p155_p10), %s1354_s15, 1 }
   0xf   : > { %158 = sbr.rel (%p155_p10) target bundleno = 442 (0x1ba), region = 32  ;;  %s1458_s27 = sshll.u32 (!%p155_p10), %s175_s26, 6 }
  0x10   : > { %s177_s6 = scalar_lea.vmem (!%p155_p10), [#allocation3], %s1458_s27  ;;  %s1467_s7 = smov (!%p155_p10), 0  }
  0x14   : > { %s179_s28 = scalar_select %p178_p11, %s1354_s15, 1 }
  0x16   : > { %s1203_s29 = smul.u32 288, %s179_s28 }
  0x18   : > { %s1464_s5 = scalar_lea.vmem %s1757_s0, %s1203_s29 }
  0x19 LB: >> { %vm402_vm0 = vcmask 1042432   ;;  %vm403_vm1 = vcmask 1046532   ;;  %vm205_vm2 = vsmask.f32 3328  ;;  %s1175_s8 = sshll.u32 %s1366_s7, 4  ;;  %s1368_s10 = smov 12   ;;  %s1366_s7 = sphi %s1467_s7, %s190_s7  }
  0x1a   : >> { %s1474_s9 = scalar_lea.vmem %s1464_s5, %s1175_s8  ;;  %vm1476_vm3 = vmor %vm402_vm0, %vm403_vm1  ;;  %vm206_vm4 = vsmask.f32 7440  ;;  %s1369_s11 = smov 8   ;;  %vm199_vm6 = vcmask 27648   ;;  %vm853_vm7 = vcmask 1041408   ;;  %vm225_vm8 = vcmask 60448  }
  0x1b   : >> { %v398_v1 = vld [vmem:[%s1474_s9] sm:$0xe]  ;;  %v399_v2 = vld [vmem:[%s1474_s9 + $0x4] sm:$0x1]  ;;  %v1085_v3 = vld [vmem:[%s1474_s9 + $0x98] sm:$0xf] }
  0x1c   : >> { %v1104_v4 = vrot.slane %v398_v1, 9  ;;  %v407_v5 = vrot.slane %v399_v2, 5  ;;  %255 = vrot.lane.b32.xlu0 %v1085_v3, %s1368_s10  ;;  %v1080_v6 = vld [vmem:[%s1474_s9 + $0x90] sm:$0xf]  ;;  %v1081_v7 = vld [vmem:[%s1474_s9 + $0x94] sm:$0x1]  ;;  %vm1497_vm5 = vmor %vm205_vm2, %vm206_vm4 }
  0x1d   : >> { %v230_v8 = vshrl.u32 %v1080_v6, 16  ;;  %v233_v9 = vshll.u32 %v1080_v6, 16  ;;  %v239_v10 = vshll.u32 %v1081_v7, 16  ;;  %v203_v11 = vld [vmem:[%s1474_s9] sm:$0xf]  ;;  %s1370_s18 = smov 4  }
  0x1e   : >> { %v408_v12 = vsel %vm1476_vm3, %v1104_v4, %v407_v5  ;;  %v204_v13 = vld [vmem:[%s1474_s9 + $0x4] sm:$0x1]  ;;  %v209_v14 = vshrl.u32 %v203_v11, 16  ;;  %v212_v15 = vshll.u32 %v203_v11, 16  ;;  %v1141_v16 = vld [vmem:[%s1474_s9 + $0x98] sm:$0xf] }
  0x1f   : >> { %409 = vrot.lane.b32.xlu1 %v408_v12, %s1369_s11  ;;  %v232_v17 = vrot.slane %v230_v8, 4  ;;  %v235_v18 = vrot.slane %v233_v9, 5  ;;  %v241_v19 = vrot.slane %v239_v10, 5  ;;  %v218_v20 = vshll.u32 %v204_v13, 16  ;;  %v1142_v21 = vld [vmem:[%s1474_s9 + $0x9c] sm:$0x1] }
  0x20   : >> { %v211_v22 = vrot.slane %v209_v14, 4  ;;  %v214_v23 = vrot.slane %v212_v15, 5  ;;  %v679_v24 = vshrl.u32 %v1141_v16, 16  ;;  %v682_v25 = vshll.u32 %v1141_v16, 16  ;;  %v1102_v26 = vld [vmem:[%s1474_s9 + $0x90] sm:$0xf] }
  0x21   : >> { %v236_v27 = vor.u32 %v235_v18, %v232_v17  ;;  %v220_v28 = vrot.slane %v218_v20, 5  ;;  %v688_v29 = vshll.u32 %v1142_v21, 16  ;;  %v1103_v30 = vld [vmem:[%s1474_s9 + $0x94] sm:$0x1]  ;;  %v381_v31 = vshrl.u32 %v1102_v26, 16  ;;  %s1371_s19 = smov 16  }
  0x22   : >> { %v215_v33 = vor.u32 %v214_v23, %v211_v22  ;;  %v681_v34 = vrot.slane %v679_v24, 4  ;;  %v684_v35 = vrot.slane %v682_v25, 5  ;;  %v384_v36 = vshll.u32 %v1102_v26, 16  ;;  %v1105_v37 = vld [vmem:[%s1474_s9 + $0x8] sm:$0xf]  ;;  %s1372_s21 = smov 20  }
  0x23   : >> { %v237_v38 = vrot.slane %v236_v27, 4  ;;  %v690_v39 = vrot.slane %v688_v29, 5  ;;  %v383_v40 = vrot.slane %v381_v31, 4  ;;  %v390_v41 = vshll.u32 %v1103_v30, 16  ;;  %v1106_v42 = vld [vmem:[%s1474_s9 + $0xc] sm:$0x1] }
  0x24   : >> { %v216_v43 = vrot.slane %v215_v33, 4  ;;  %v685_v44 = vor.u32 %v684_v35, %v681_v34  ;;  %v386_v45 = vrot.slane %v384_v36, 5  ;;  %v416_v46 = vshrl.u32 %v1105_v37, 16  ;;  %v1120_v47 = vld [vmem:[%s1474_s9 + $0x8] sm:$0xf]  ;;  %s1373_s23 = smov 24  }
  0x25   : >> { %v242_v48 = vsel %vm1497_vm5, %v237_v38, %v241_v19  ;;  %v392_v49 = vrot.slane %v390_v41, 5  ;;  %v419_v50 = vshll.u32 %v1105_v37, 16  ;;  %v425_v51 = vshll.u32 %v1106_v42, 16  ;;  %v1121_v52 = vld [vmem:[%s1474_s9 + $0xc] sm:$0x1]  ;;  %s1374_s28 = smov 28  }
  0x26   : >> { %243 = vrot.lane.b32.xlu1 %v242_v48, %s1369_s11  ;;  %v221_v53 = vsel %vm1497_vm5, %v216_v43, %v220_v28  ;;  %v686_v54 = vrot.slane %v685_v44, 4  ;;  %v387_v55 = vor.u32 %v386_v45, %v383_v40  ;;  %v418_v56 = vrot.slane %v416_v46, 4  ;;  %v1143_v57 = vld [vmem:[%s1474_s9 + $0x8] sm:$0xe]  ;;  %v1144_v58 = vld [vmem:[%s1474_s9 + $0xc] sm:$0x1] }
  0x27   : >> { %222 = vrot.lane.b32.xlu0 %v221_v53, %s1370_s18  ;;  %v421_v59 = vrot.slane %v419_v50, 5  ;;  %v427_v60 = vrot.slane %v425_v51, 5  ;;  %v522_v61 = vshrl.u32 %v1120_v47, 16  ;;  %v525_v62 = vshll.u32 %v1120_v47, 16  ;;  %v1122_v63 = vld [vmem:[%s1474_s9 + $0x98] sm:$0xf] }
  0x28   : >> { %v691_v1 = vsel %vm1497_vm5, %v686_v54, %v690_v39  ;;  %v388_v2 = vrot.slane %v387_v55, 4  ;;  %v531_v3 = vshll.u32 %v1121_v52, 16  ;;  %v1145_v4 = vrot.slane %v1143_v57, 9  ;;  %v1123_v5 = vld [vmem:[%s1474_s9 + $0x9c] sm:$0x1]  ;;  %s1375_s4 = smov 32  }
  0x29   : >> { %v422_v6 = vor.u32 %v421_v59, %v418_v56  ;;  %v524_v7 = vrot.slane %v522_v61, 4  ;;  %v527_v8 = vrot.slane %v525_v62, 5  ;;  %v702_v9 = vrot.slane %v1144_v58, 5  ;;  %v1107_v10 = vld [vmem:[%s1474_s9 + $0x98] sm:$0xf] }
  0x2a   : >> { %692 = vrot.lane.b32.xlu1 %v691_v1, %s1370_s18  ;;  %v393_v11 = vsel %vm1497_vm5, %v388_v2, %v392_v49  ;;  %v533_v12 = vrot.slane %v531_v3, 5  ;;  %v542_v13 = vshrl.u32 %v1122_v63, 16  ;;  %v545_v14 = vshll.u32 %v1122_v63, 16  ;;  %v1108_v15 = vld [vmem:[%s1474_s9 + $0x9c] sm:$0x1] }
  0x2b   : >> { %394 = vrot.lane.b32.xlu0 %v393_v11, %s1370_s18  ;;  %v423_v16 = vrot.slane %v422_v6, 4  ;;  %v528_v17 = vor.u32 %v527_v8, %v524_v7  ;;  %v703_v18 = vsel %vm1476_vm3, %v1145_v4, %v702_v9  ;;  %v551_v19 = vshll.u32 %v1123_v5, 16  ;;  %v1088_v20 = vld [vmem:[%s1474_s9 + $0x8] sm:$0xf]  ;;  %v1089_v25 = vld [vmem:[%s1474_s9 + $0xc] sm:$0x1] }
  0x2c   : >> { %v544_v21 = vrot.slane %v542_v13, 4  ;;  %v547_v22 = vrot.slane %v545_v14, 5  ;;  %v436_v23 = vshrl.u32 %v1107_v10, 16  ;;  %v439_v24 = vshll.u32 %v1107_v10, 16  ;;  %v1146_v30 = vld [vmem:[%s1474_s9 + $0x10] sm:$0xf] }
  0x2d   : >> { %v428_v26 = vsel %vm1497_vm5, %v423_v16, %v427_v60  ;;  %v529_v27 = vrot.slane %v528_v17, 4  ;;  %v553_v28 = vrot.slane %v551_v19, 5  ;;  %v445_v29 = vshll.u32 %v1108_v15, 16  ;;  %v1147_v36 = vld [vmem:[%s1474_s9 + $0x14] sm:$0x1] }
  0x2e   : >> { %429 = vrot.lane.b32.xlu1 %v428_v26, %s1368_s10  ;;  %v548_v31 = vor.u32 %v547_v22, %v544_v21  ;;  %v438_v33 = vrot.slane %v436_v23, 4  ;;  %v441_v34 = vrot.slane %v439_v24, 5  ;;  %v265_v35 = vshrl.u32 %v1088_v20, 16  ;;  %v1535_v41 = vld [vmem:[%s1474_s9 + $0x8] sm:$0xe] }
  0x2f   : >> { %v534_v37 = vsel %vm1497_vm5, %v529_v27, %v533_v12  ;;  %v447_v38 = vrot.slane %v445_v29, 5  ;;  %v268_v39 = vshll.u32 %v1088_v20, 16  ;;  %v274_v40 = vshll.u32 %v1089_v25, 16  ;;  %v1110_v46 = vld [vmem:[%s1474_s9 + $0xc] sm:$0x1] }
  0x30   : >> { %535 = vrot.lane.b32.xlu0 %v534_v37, %s1370_s18  ;;  %v549_v42 = vrot.slane %v548_v31, 4  ;;  %v442_v43 = vor.u32 %v441_v34, %v438_v33  ;;  %v267_v44 = vrot.slane %v265_v35, 4  ;;  %v711_v45 = vshrl.u32 %v1146_v30, 16  ;;  %v1090_v51 = vld [vmem:[%s1474_s9 + $0x98] sm:$0xf] }
  0x31   : >> { %v270_v47 = vrot.slane %v268_v39, 5  ;;  %v276_v48 = vrot.slane %v274_v40, 5  ;;  %v714_v49 = vshll.u32 %v1146_v30, 16  ;;  %v720_v50 = vshll.u32 %v1147_v36, 16  ;;  %v1091_v56 = vld [vmem:[%s1474_s9 + $0x9c] sm:$0x1] }
  0x32   : >> { %704 = vrot.lane.b32.xlu1 %v703_v18, %s1369_s11  ;;  %v554_v52 = vsel %vm1497_vm5, %v549_v42, %v553_v28  ;;  %v443_v53 = vrot.slane %v442_v43, 4  ;;  %v713_v54 = vrot.slane %v711_v45, 4  ;;  %v1111_v55 = vrot.slane %v1535_v41, 9  ;;  %v1148_v61 = vld [vmem:[%s1474_s9 + $0xa0] sm:$0xf] }
  0x33   : >> { %v271_v57 = vor.u32 %v270_v47, %v267_v44  ;;  %v716_v58 = vrot.slane %v714_v49, 5  ;;  %v722_v59 = vrot.slane %v720_v50, 5  ;;  %v459_v60 = vrot.slane %v1110_v46, 5  ;;  %v1149_v3 = vld [vmem:[%s1474_s9 + $0xa4] sm:$0x1] }
  0x34   : >> { %555 = vrot.lane.b32.xlu0 %v554_v52, %s1369_s11  ;;  %v448_v62 = vsel %vm1497_vm5, %v443_v53, %v447_v38  ;;  %v286_v63 = vshrl.u32 %v1090_v51, 16  ;;  %v289_v1 = vshll.u32 %v1090_v51, 16  ;;  %v295_v2 = vshll.u32 %v1091_v56, 16  ;;  %v1125_v7 = vld [vmem:[%s1474_s9 + $0x10] sm:$0xf] }
  0x35   : >> { %v272_v4 = vrot.slane %v271_v57, 4  ;;  %v717_v5 = vor.u32 %v716_v58, %v713_v54  ;;  %v731_v6 = vshrl.u32 %v1148_v61, 16  ;;  %v1126_v8 = vld [vmem:[%s1474_s9 + $0x14] sm:$0x1]  ;;  %v734_v12 = vshll.u32 %v1148_v61, 16 }
  0x36   : >> { %449 = vrot.lane.b32.xlu1 %v448_v62, %s1371_s19  ;;  %v288_v9 = vrot.slane %v286_v63, 4  ;;  %v291_v10 = vrot.slane %v289_v1, 5  ;;  %v297_v11 = vrot.slane %v295_v2, 5  ;;  %v1112_v13 = vld [vmem:[%s1474_s9 + $0x10] sm:$0xf]  ;;  %v740_v18 = vshll.u32 %v1149_v3, 16 }
  0x37   : >> { %v277_v14 = vsel %vm1497_vm5, %v272_v4, %v276_v48  ;;  %v718_v15 = vrot.slane %v717_v5, 4  ;;  %v1124_v16 = vld [vmem:[%s1474_s9 + $0xa0] sm:$0xf]  ;;  %v733_v17 = vrot.slane %v731_v6, 4  ;;  %v736_v20 = vrot.slane %v734_v12, 5 }
  0x38   : >> { %278 = vrot.lane.b32.xlu0 %v277_v14, %s1371_s19  ;;  %v292_v19 = vor.u32 %v291_v10, %v288_v9  ;;  %v568_v21 = vshrl.u32 %v1125_v7, 16  ;;  %v571_v22 = vshll.u32 %v1125_v7, 16  ;;  %v1113_v23 = vld [vmem:[%s1474_s9 + $0x14] sm:$0x1]  ;;  %v742_v25 = vrot.slane %v740_v18, 5 }
  0x39   : >> { %v723_v24 = vsel %vm1497_vm5, %v718_v15, %v722_v59  ;;  %v577_v26 = vshll.u32 %v1126_v8, 16  ;;  %v468_v27 = vshrl.u32 %v1112_v13, 16  ;;  %v1562_v28 = vld [vmem:[%s1474_s9 + $0x10] sm:$0xe]  ;;  %v737_v30 = vor.u32 %v736_v20, %v733_v17  ;;  %v1151_v34 = vld [vmem:[%s1474_s9 + $0x14] sm:$0x1] }
  0x3a   : >> { %724 = vrot.lane.b32.xlu1 %v723_v24, %s1368_s10  ;;  %v293_v29 = vrot.slane %v292_v19, 4  ;;  %v570_v31 = vrot.slane %v568_v21, 4  ;;  %v573_v33 = vrot.slane %v571_v22, 5  ;;  %v460_v35 = vsel %vm1476_vm3, %v1111_v55, %v459_v60  ;;  %v1127_v39 = vld [vmem:[%s1474_s9 + $0xa0] sm:$0xf] }
  0x3b   : >> { %v470_v36 = vrot.slane %v468_v27, 4  ;;  %v471_v37 = vshll.u32 %v1112_v13, 16  ;;  %v477_v38 = vshll.u32 %v1113_v23, 16  ;;  %v738_v41 = vrot.slane %v737_v30, 4  ;;  %v1128_v44 = vld [vmem:[%s1474_s9 + $0xa4] sm:$0x1] }
  0x3c   : >> { %561 = vrot.lane.b32.xlu0 %v1124_v16, %s1368_s10  ;;  %v298_v40 = vsel %vm1497_vm5, %v293_v29, %v297_v11  ;;  %v574_v42 = vor.u32 %v573_v33, %v570_v31  ;;  %v579_v43 = vrot.slane %v577_v26, 5  ;;  %v1114_v45 = vld [vmem:[%s1474_s9 + $0xa0] sm:$0xf]  ;;  %v1152_v48 = vrot.slane %v1562_v28, 9  ;;  %v1098_v54 = vld [vmem:[%s1474_s9 + $0x10] sm:$0xf] }
  0x3d   : >> { %v473_v46 = vrot.slane %v471_v37, 5  ;;  %v479_v47 = vrot.slane %v477_v38, 5  ;;  %v588_v49 = vshrl.u32 %v1127_v39, 16  ;;  %v743_v50 = vsel %vm1497_vm5, %v738_v41, %v742_v25  ;;  %v1115_v58 = vld [vmem:[%s1474_s9 + $0xa4] sm:$0x1] }
  0x3e   : >> { %461 = vrot.lane.b32.xlu1 %v460_v35, %s1372_s21  ;;  %v575_v51 = vrot.slane %v574_v42, 4  ;;  %v754_v52 = vrot.slane %v1151_v34, 5  ;;  %v591_v53 = vshll.u32 %v1127_v39, 16  ;;  %v597_v57 = vshll.u32 %v1128_v44, 16  ;;  %v1099_v62 = vld [vmem:[%s1474_s9 + $0x14] sm:$0x1] }
  0x3f   : >> { %v474_v55 = vor.u32 %v473_v46, %v470_v36  ;;  %v590_v56 = vrot.slane %v588_v49, 4  ;;  %v488_v59 = vshrl.u32 %v1114_v45, 16  ;;  %v491_v61 = vshll.u32 %v1114_v45, 16  ;;  %v1153_v63 = vld [vmem:[%s1474_s9 + $0x18] sm:$0xf] }
  0x40   : >> { %299 = vrot.lane.b32.xlu0 %v298_v40, %s1372_s21  ;;  %v593_v60 = vrot.slane %v591_v53, 5  ;;  %v580_v1 = vsel %vm1497_vm5, %v575_v51, %v579_v43  ;;  %v321_v4 = vshrl.u32 %v1098_v54, 16  ;;  %v497_v7 = vshll.u32 %v1115_v58, 16  ;;  %v1095_v10 = vld [vmem:[%s1474_s9 + $0xa0] sm:$0xf] }
  0x41   : >> { %v475_v2 = vrot.slane %v474_v55, 4  ;;  %v490_v3 = vrot.slane %v488_v59, 4  ;;  %v493_v6 = vrot.slane %v491_v61, 5  ;;  %v324_v8 = vshll.u32 %v1098_v54, 16  ;;  %v1154_v13 = vld [vmem:[%s1474_s9 + $0x1c] sm:$0x1] }
  0x42   : >> { %744 = vrot.lane.b32.xlu1 %v743_v50, %s1371_s19  ;;  %v594_v5 = vor.u32 %v593_v60, %v590_v56  ;;  %v323_v11 = vrot.slane %v321_v4, 4  ;;  %v330_v12 = vshll.u32 %v1099_v62, 16  ;;  %v763_v14 = vshrl.u32 %v1153_v63, 16  ;;  %v1100_v19 = vld [vmem:[%s1474_s9 + $0xa0] sm:$0xf] }
  0x43   : >> { %v480_v9 = vsel %vm1497_vm5, %v475_v2, %v479_v47  ;;  %v599_v16 = vrot.slane %v597_v57, 5  ;;  %v494_v17 = vor.u32 %v493_v6, %v490_v3  ;;  %v326_v18 = vrot.slane %v324_v8, 5  ;;  %v1116_v23 = vld [vmem:[%s1474_s9 + $0x10] sm:$0xe]  ;;  %v1117_v24 = vld [vmem:[%s1474_s9 + $0x14] sm:$0x1] }
  0x44   : >> { %581 = vrot.lane.b32.xlu0 %v580_v1, %s1371_s19  ;;  %v595_v15 = vrot.slane %v594_v5, 4  ;;  %v755_v20 = vsel %vm1476_vm3, %v1152_v48, %v754_v52  ;;  %v765_v21 = vrot.slane %v763_v14, 4  ;;  %v766_v22 = vshll.u32 %v1153_v63, 16  ;;  %v1155_v29 = vld [vmem:[%s1474_s9 + $0xa8] sm:$0xf] }
  0x45   : >> { %v495_v25 = vrot.slane %v494_v17, 4  ;;  %v499_v26 = vrot.slane %v497_v7, 5  ;;  %v327_v27 = vor.u32 %v326_v18, %v323_v11  ;;  %v772_v28 = vshll.u32 %v1154_v13, 16  ;;  %v1101_v33 = vld [vmem:[%s1474_s9 + $0xa4] sm:$0x1] }
  0x46   : >> { %481 = vrot.lane.b32.xlu1 %v480_v9, %s1373_s23  ;;  %v332_v30 = vrot.slane %v330_v12, 5  ;;  %v768_v31 = vrot.slane %v766_v22, 5  ;;  %v342_v34 = vshrl.u32 %v1100_v19, 16  ;;  %v345_v35 = vshll.u32 %v1100_v19, 16  ;;  %v1135_v40 = vld [vmem:[%s1474_s9 + $0x18] sm:$0xf] }
  0x47   : >> { %v600_v36 = vsel %vm1497_vm5, %v595_v15, %v599_v16  ;;  %v328_v37 = vrot.slane %v327_v27, 4  ;;  %v1118_v38 = vrot.slane %v1116_v23, 9  ;;  %v511_v39 = vrot.slane %v1117_v24, 5  ;;  %v1156_v48 = vld [vmem:[%s1474_s9 + $0xac] sm:$0x1] }
  0x48   : >> { %311 = vrot.lane.b32.xlu0 %v1095_v10, %s1373_s23  ;;  %v769_v41 = vor.u32 %v768_v31, %v765_v21  ;;  %v344_v42 = vrot.slane %v342_v34, 4  ;;  %v347_v43 = vrot.slane %v345_v35, 5  ;;  %v783_v44 = vshrl.u32 %v1155_v29, 16  ;;  %v1136_v53 = vld [vmem:[%s1474_s9 + $0x1c] sm:$0x1] }
  0x49   : >> { %v500_v45 = vsel %vm1497_vm5, %v495_v25, %v499_v26  ;;  %v774_v46 = vrot.slane %v772_v28, 5  ;;  %v351_v47 = vshll.u32 %v1101_v33, 16  ;;  %v786_v49 = vshll.u32 %v1155_v29, 16  ;;  %v1137_v57 = vld [vmem:[%s1474_s9 + $0xa8] sm:$0xf] }
  0x4a   : >> { %756 = vrot.lane.b32.xlu1 %v755_v20, %s1372_s21  ;;  %v770_v50 = vrot.slane %v769_v41, 4  ;;  %v348_v51 = vor.u32 %v347_v43, %v344_v42  ;;  %v785_v52 = vrot.slane %v783_v44, 4  ;;  %v621_v54 = vshrl.u32 %v1135_v40, 16  ;;  %v1078_v58 = vld [vmem:[%s1474_s9 + $0x90] sm:$0xf] }
  0x4b   : >> { %v788_v55 = vrot.slane %v786_v49, 5  ;;  %v624_v56 = vshll.u32 %v1135_v40, 16  ;;  %v333_v59 = vsel %vm1497_vm5, %v328_v37, %v332_v30  ;;  %v792_v60 = vshll.u32 %v1156_v48, 16  ;;  %200 = vst.msk [vmem:[#allocation2] sm:$0xf] %vm199_vm6, %v1078_v58 }
  0x4c   : >> { %601 = vrot.lane.b32.xlu0 %v600_v36, %s1372_s21  ;;  %v623_v61 = vrot.slane %v621_v54, 4  ;;  %v1139_v62 = vld [vmem:[%s1474_s9 + $0x8] sm:$0xf]  ;;  %v349_v63 = vrot.slane %v348_v51, 4  ;;  %v353_v1 = vrot.slane %v351_v47, 5  ;;  %v630_v3 = vshll.u32 %v1136_v53, 16 }
  0x4d   : >> { %v626_v2 = vrot.slane %v624_v56, 5  ;;  %v775_v4 = vsel %vm1497_vm5, %v770_v50, %v774_v46  ;;  %v1132_v5 = vld [vmem:[%s1474_s9 + $0xa8] sm:$0xf]  ;;  %v789_v6 = vor.u32 %v788_v55, %v785_v52  ;;  %v1138_v7 = vld [vmem:[%s1474_s9 + $0xac] sm:$0x1]  ;;  %v641_v8 = vshrl.u32 %v1137_v57, 16 }
  0x4e   : >> { %501 = vrot.lane.b32.xlu1 %v500_v45, %s1374_s28  ;;  %v644_v9 = vshll.u32 %v1137_v57, 16  ;;  %v1140_v10 = vld [vmem:[%s1474_s9 + $0xc] sm:$0x1]  ;;  %v360_v11 = vld [vmem:[%s1474_s9] sm:$0xf]  ;;  %v512_v12 = vsel %vm1476_vm3, %v1118_v38, %v511_v39  ;;  %v661_v14 = vshrl.u32 %v1139_v62, 16  ;;  %v354_v21 = vsel %vm1497_vm5, %v349_v63, %v353_v1 }
  0x4f   : >> { %v627_v13 = vor.u32 %v626_v2, %v623_v61  ;;  %v361_v15 = vld [vmem:[%s1474_s9 + $0x4] sm:$0x1]  ;;  %v1119_v16 = vld [vmem:[%s1474_s9 + $0x98] sm:$0xf]  ;;  %v794_v17 = vrot.slane %v792_v60, 5  ;;  %v643_v18 = vrot.slane %v641_v8, 4 }
  0x50   : >> { %334 = vrot.lane.b32.xlu0 %v333_v59, %s1374_s28  ;;  %v646_v19 = vrot.slane %v644_v9, 5  ;;  %v664_v20 = vshll.u32 %v1139_v62, 16  ;;  %518 = vst.msk [vmem:[#allocation2 + $0x8] sm:$0xf] %vm199_vm6, %v1119_v16  ;;  %v632_v22 = vrot.slane %v630_v3, 5  ;;  %v663_v24 = vrot.slane %v661_v14, 4 }
  0x51   : >> { %v1157_v23 = vld [vmem:[%s1474_s9 + $0x18] sm:$0xe]  ;;  %v670_v25 = vshll.u32 %v1140_v10, 16  ;;  %v790_v26 = vrot.slane %v789_v6, 4  ;;  %v1158_v27 = vld [vmem:[%s1474_s9 + $0x1c] sm:$0x1] }
  0x52   : >> { %776 = vrot.lane.b32.xlu1 %v775_v4, %s1373_s23  ;;  %v666_v28 = vrot.slane %v664_v20, 5  ;;  %v363_v29 = vshrl.u32 %v360_v11, 16  ;;  %v366_v30 = vshll.u32 %v360_v11, 16  ;;  %v628_v31 = vrot.slane %v627_v13, 4  ;;  %v1278_v47 = vld [vmem:[%s1758_s1 + $0x8] sm:$0xff]   ;;  %v1280_v56 = vld [vmem:[%s1758_s1] sm:$0xff]  }
  0x53   : >> { %v647_v33 = vor.u32 %v646_v19, %v643_v18  ;;  %v650_v34 = vshll.u32 %v1138_v7, 16  ;;  %v372_v35 = vshll.u32 %v361_v15, 16  ;;  %v672_v37 = vrot.slane %v670_v25, 5  ;;  %v1277_v40 = vld [vmem:[%s1758_s1 + $0x10] ss:$0 sps:$4 sm:$0x33]  }
  0x54   : >> { %612 = vrot.lane.b32.xlu0 %v1132_v5, %s1373_s23  ;;  %v667_v36 = vor.u32 %v666_v28, %v663_v24  ;;  %v365_v38 = vrot.slane %v363_v29, 4  ;;  %v368_v39 = vrot.slane %v366_v30, 5  ;;  %v1159_v41 = vrot.slane %v1157_v23, 9  ;;  %1202 = vmatprep.subr.msk.bf16.mxu0 %vm853_vm7, %v1277_v40  ;;  %s1168_s21 = sshll.u32 %s1366_s7, 3  ;;  %s190_s7 = sadd.s32 1, %s1366_s7  }
  0x55   : >> { %v806_v42 = vrot.slane %v1158_v27, 5  ;;  %v795_v43 = vsel %vm1497_vm5, %v790_v26, %v794_v17  ;;  %v374_v46 = vrot.slane %v372_v35, 5  ;;  %v633_v48 = vsel %vm1497_vm5, %v628_v31, %v632_v22  ;;  %s919_s23 = scalar_lea.vmem %s177_s6, %s1168_s21 [#allocation3]  ;;  %p187_p12 = scmp.ge.s32.totalorder %s190_s7, 8  }
  0x56   : >> { %513 = vrot.lane.b32.xlu1 %v512_v12, %s1375_s4  ;;  %v668_v44 = vrot.slane %v667_v36, 4  ;;  %v369_v45 = vor.u32 %v368_v39, %v365_v38  ;;  %v652_v49 = vrot.slane %v650_v34, 5  ;;  %v648_v50 = vrot.slane %v647_v33, 4  ;;  %v1167_v34 = vld [vmem:[%s1759_s2] ss:$0 sm:$0xff]  ;;  %s938_s8 = sshll.u32 (%p187_p12), %s177_s6, 4  ;;  %s1708_s8 = int_to_ptr.vmem [resolvable:$true] %s938_s8 }
  0x57   : >> { %v855_v53 = vsel %vm853_vm7, %v1277_v40, 0  ;;  %v807_v54 = vsel %vm1476_vm3, %v1159_v41, %v806_v42  ;;  %vm246_vm9 = vcmask 93248   ;;  %vm258_vm10 = vcmask 126048   ;;  %s1712_s7 = scalar_lea.sflag (%p187_p12), [#allocation4], %s175_s26  ;;  %s1282_s5 = scalar_lea.vmem (%p187_p12), %s1708_s8, 1024 }
  0x58   : >> { %355 = vrot.lane.b32.xlu0 %v354_v21, %s1375_s4  ;;  %v673_v51 = vsel %vm1497_vm5, %v668_v44, %v672_v37  ;;  %v370_v52 = vrot.slane %v369_v45, 4  ;;  %1193 = vmatpush3.bf16.msra.mxu0 %v855_v53  ;;  %v653_v57 = vsel %vm1497_vm5, %v648_v50, %v652_v49  ;;  %vm281_vm11 = vcmask 158848   ;;  %p1283_p13 = scmp.ne.s32.totalorder (%p187_p12), %s1708_s8, %s1282_s5 }
  0x59   : >> { %675 = vst.msk [vmem:[#allocation2 + $0xc] sm:$0xf] %vm199_vm6, %v673_v51  ;;  %1194 = vmatprep.subr.bf16.mxu0 %v1278_v47  ;;  %vm302_vm12 = vcmask 191648   ;;  %vm314_vm13 = vcmask 224448   ;;  %vm337_vm14 = vcmask 257248   ;;  %vm358_vm15 = vcmask 290048  }
  0x5a   : >> { %796 = vrot.lane.b32.xlu1 %v795_v43, %s1374_s28  ;;  %v375_v55 = vsel %vm1497_vm5, %v370_v52, %v374_v46  ;;  %vm846_vm0 = vcmask 293888   ;;  %vm920_vm1 = vcmask 64512   ;;  %p1284_p0 = pnand (%p187_p12), %p1283_p13, %p1439_p4 }
  0x5b   : >> { %377 = vst.msk [vmem:[#allocation2 + $0x4] sm:$0xf] %vm199_vm6, %v375_v55 }
  0x5c   : >> { %634 = vrot.lane.b32.xlu0 %v633_v48, %s1374_s28  ;;  %1195 = vmatpush3.bf16.msra.mxu0 %v1278_v47  ;;  %s1186_s28 = sshll.u32 (%p187_p12), %s1354_s15, 10  ;;  %p1285_p1 = pneg (%p187_p12), %p1284_p0 }
  0x5d   : >> { %1196 = vmatprep.subr.bf16.mxu0 %v1280_v56  ;;  %s1376_s15 = smov (%p187_p12), [#allocation3]  }
  0x5e   : >> { %808 = vrot.lane.b32.xlu1 %v807_v54, %s1375_s4  ;;  %s1286_s9 = sshll.u32 (%p187_p12), %s1376_s15, 4  ;;  %s1287_s9 = int_to_ptr.vmem [resolvable:$false] %s1286_s9 }
  0x5f   : > { %s1288_s10 = scalar_lea.vmem (%p187_p12), %s1287_s9, 2048  ;;  %p1289_p2 = scmp.lt.s32.totalorder (%p187_p12), %s1708_s8, %s1287_s9 }
  0x60   : >> { %654 = vrot.lane.b32.xlu0 %v653_v57, %s1375_s4  ;;  %1197 = vmatpush3.bf16.msra.mxu0 %v1280_v56  ;;  %s1704_s4 = scalar_lea.hbm (%p187_p12), %s1760_s3, %s1186_s28  ;;  %p1290_p3 = scmp.lt.s32.totalorder (%p187_p12), %s1288_s10, %s1282_s5 }
  0x62   : > { %p1291_p5 = por (%p187_p12), %p1290_p3, %p1289_p2 }
  0x64   : > { %p1292_p6 = pnand (%p187_p12), %p1291_p5, %p1285_p1 }
  0x8e   : >> { %v256_v58 = vpop.permute.xlu0 %255 }
  0x91   : >> { %v410_v0 = vpop.permute.xlu1 %409 }
  0x98   : >> { %v244_v59 = vpop.permute.xlu1 %243 }
  0x99   : >> { %v223_v60 = vpop.permute.xlu0 %222 }
  0x9a   : >> { %226 = vst.msk [vmem:[#allocation2] sm:$0xf] %vm225_vm8, %v223_v60 }
  0x9b   : >> { %247 = vst.msk [vmem:[#allocation2] sm:$0xf] %vm246_vm9, %v244_v59 }
  0x9c   : >> { %v693_v32 = vpop.permute.xlu1 %692  ;;  %259 = vst.msk [vmem:[#allocation2] sm:$0xf] %vm258_vm10, %v256_v58 }
  0x9d   : >> { %695 = vst.msk [vmem:[#allocation2 + $0xc] sm:$0xf] %vm225_vm8, %v693_v32  ;;  %v395_v61 = vpop.permute.xlu0 %394 }
  0x9e   : >> { %397 = vst.msk [vmem:[#allocation2 + $0x4] sm:$0xf] %vm225_vm8, %v395_v61 }
  0x9f   : >> { %412 = vst.msk [vmem:[#allocation2 + $0x4] sm:$0xf] %vm246_vm9, %v410_v0 }
  0xa0   : >> { %v430_v62 = vpop.permute.xlu1 %429 }
  0xa1   : >> { %432 = vst.msk [vmem:[#allocation2 + $0x4] sm:$0xf] %vm258_vm10, %v430_v62 }
  0xa2   : >> { %v536_v63 = vpop.permute.xlu0 %535 }
  0xa3   : >> { %538 = vst.msk [vmem:[#allocation2 + $0x8] sm:$0xf] %vm225_vm8, %v536_v63 }
  0xa4   : >> { %v705_v1 = vpop.permute.xlu1 %704 }
  0xa5   : >> { %707 = vst.msk [vmem:[#allocation2 + $0xc] sm:$0xf] %vm246_vm9, %v705_v1 }
  0xa6   : >> { %v556_v2 = vpop.permute.xlu0 %555 }
  0xa7   : >> { %558 = vst.msk [vmem:[#allocation2 + $0x8] sm:$0xf] %vm246_vm9, %v556_v2 }
  0xa8   : >> { %v450_v3 = vpop.permute.xlu1 %449 }
  0xa9   : >> { %452 = vst.msk [vmem:[#allocation2 + $0x4] sm:$0xf] %vm281_vm11, %v450_v3 }
  0xaa   : >> { %v279_v4 = vpop.permute.xlu0 %278 }
  0xab   : >> { %282 = vst.msk [vmem:[#allocation2] sm:$0xf] %vm281_vm11, %v279_v4 }
  0xac   : >> { %v725_v5 = vpop.permute.xlu1 %724 }
  0xad   : >> { %727 = vst.msk [vmem:[#allocation2 + $0xc] sm:$0xf] %vm258_vm10, %v725_v5 }
  0xae   : >> { %v562_v6 = vpop.permute.xlu0 %561 }
  0xaf   : >> { %564 = vst.msk [vmem:[#allocation2 + $0x8] sm:$0xf] %vm258_vm10, %v562_v6 }
  0xb0   : >> { %v462_v7 = vpop.permute.xlu1 %461 }
  0xb1   : >> { %464 = vst.msk [vmem:[#allocation2 + $0x4] sm:$0xf] %vm302_vm12, %v462_v7 }
  0xb2   : >> { %v300_v8 = vpop.permute.xlu0 %299 }
  0xb3   : >> { %303 = vst.msk [vmem:[#allocation2] sm:$0xf] %vm302_vm12, %v300_v8 }
  0xb4   : >> { %v745_v9 = vpop.permute.xlu1 %744 }
  0xb5   : >> { %747 = vst.msk [vmem:[#allocation2 + $0xc] sm:$0xf] %vm281_vm11, %v745_v9 }
  0xb6   : >> { %v582_v10 = vpop.permute.xlu0 %581 }
  0xb7   : >> { %584 = vst.msk [vmem:[#allocation2 + $0x8] sm:$0xf] %vm281_vm11, %v582_v10 }
  0xb8   : >> { %v482_v11 = vpop.permute.xlu1 %481 }
  0xb9   : >> { %484 = vst.msk [vmem:[#allocation2 + $0x4] sm:$0xf] %vm314_vm13, %v482_v11 }
  0xba   : >> { %v312_v12 = vpop.permute.xlu0 %311 }
  0xbb   : >> { %315 = vst.msk [vmem:[#allocation2] sm:$0xf] %vm314_vm13, %v312_v12 }
  0xbc   : >> { %v757_v13 = vpop.permute.xlu1 %756 }
  0xbd   : >> { %759 = vst.msk [vmem:[#allocation2 + $0xc] sm:$0xf] %vm302_vm12, %v757_v13 }
  0xbe   : >> { %v602_v14 = vpop.permute.xlu0 %601 }
  0xbf   : >> { %604 = vst.msk [vmem:[#allocation2 + $0x8] sm:$0xf] %vm302_vm12, %v602_v14 }
  0xc0   : >> { %v502_v15 = vpop.permute.xlu1 %501 }
  0xc1   : >> { %504 = vst.msk [vmem:[#allocation2 + $0x4] sm:$0xf] %vm337_vm14, %v502_v15 }
  0xc2   : >> { %v335_v16 = vpop.permute.xlu0 %334 }
  0xc3   : >> { %338 = vst.msk [vmem:[#allocation2] sm:$0xf] %vm337_vm14, %v335_v16 }
  0xc4   : >> { %v777_v17 = vpop.permute.xlu1 %776 }
  0xc5   : >> { %779 = vst.msk [vmem:[#allocation2 + $0xc] sm:$0xf] %vm314_vm13, %v777_v17 }
  0xc6   : >> { %v613_v18 = vpop.permute.xlu0 %612 }
  0xc7   : >> { %615 = vst.msk [vmem:[#allocation2 + $0x8] sm:$0xf] %vm314_vm13, %v613_v18 }
  0xc8   : >> { %v514_v19 = vpop.permute.xlu1 %513 }
  0xc9   : >> { %516 = vst.msk [vmem:[#allocation2 + $0x4] sm:$0xf] %vm358_vm15, %v514_v19 }
  0xca   : >> { %v356_v20 = vpop.permute.xlu0 %355 }
  0xcb   : >> { %359 = vst.msk [vmem:[#allocation2] sm:$0xf] %vm358_vm15, %v356_v20 }
  0xcc   : >> { %v797_v21 = vpop.permute.xlu1 %796 }
  0xcd   : >> { %799 = vst.msk [vmem:[#allocation2 + $0xc] sm:$0xf] %vm337_vm14, %v797_v21 }
  0xce   : >> { %v635_v22 = vpop.permute.xlu0 %634 }
  0xcf   : >> { %637 = vst.msk [vmem:[#allocation2 + $0x8] sm:$0xf] %vm337_vm14, %v635_v22 }
  0xd0   : >> { %v809_v23 = vpop.permute.xlu1 %808 }
  0xd1   : >> { %811 = vst.msk [vmem:[#allocation2 + $0xc] sm:$0xf] %vm358_vm15, %v809_v23 }
  0xd2   : >> { %v655_v24 = vpop.permute.xlu0 %654  ;;  %v1279_v25 = vld [vmem:[#allocation2] sm:$0xff]  }
  0xd3   : >> { %657 = vst.msk [vmem:[#allocation2 + $0x8] sm:$0xf] %vm358_vm15, %v655_v24  ;;  %1198 = vmatprep.mubr.msk.bf16.mxu0 %vm846_vm0, %v1279_v25 }
  0xda   : >> { %v1281_v26 = vld [vmem:[#allocation2 + $0x8] sm:$0xff]  }
  0xdb   : >> { %1199 = vmatmul.mubr.msk.bf16.vlgmr.msra.gmra.mxu0 %vm846_vm0, %v1281_v26 }
 0x19b   : >> { %v1200_v27 = vpop.f32.mrf.mxu0 }
 0x19d   : >> { %v891_v28 = vpop.f32.mrf.mxu0 }
 0x19f   : >> { %v1201_v29 = vpop.f32.mrf.mxu0 }
 0x1a1   : >> { %v894_v30 = vpop.f32.mrf.mxu0 }
 0x1a2   : >> { %v906_v31 = vmax.f32 %v891_v28, %v894_v30 }
 0x1a4   : >> { %v907_v33 = vmax.f32 %v906_v31, %v1200_v27 }
 0x1a6   : >> { %v908_v35 = vmax.f32 %v907_v33, %v1201_v29 }
 0x1a8   : >> { %v916_v36 = vadd.f32 %v1167_v34, %v908_v35  ;;  %189 = sbr.rel (!%p187_p12) target bundleno = 25 (0x19), region = 83 }
 0x1aa   : >> { %v917_v37 = vmax.f32 %v916_v36, 0.0 }
 0x1ac   : >> { %921 = vst.msk [vmem:[%s919_s23] sm:$0xff] %vm920_vm1, %v917_v37 }
 0x1ad   : > { %1295 = shalt.err (!%p1292_p6)
}
 0x1ae   : > { %s1296_s26 = scalar_lea.hbm %s1704_s4, 1024  ;;  %s1300_s11 = scalar_lea.hbm %s1760_s3, 2048 }
 0x1af   : > { %p1297_p7 = scmp.ne.s32.totalorder %s1704_s4, %s1296_s26  ;;  %p1301_p11 = scmp.lt.s32.totalorder %s1704_s4, %s1760_s3 }
 0x1b0   : > { %p1302_p12 = scmp.lt.s32.totalorder %s1300_s11, %s1296_s26 }
 0x1b1   : > { %p1298_p9 = pnand %p1297_p7, %p1439_p4 }
 0x1b2   : > { %p1303_p13 = por %p1302_p12, %p1301_p11 }
 0x1b3   : > { %p1299_p10 = pneg %p1298_p9 }
 0x1b5   : > { %p1304_p0 = pnand %p1303_p13, %p1299_p10 }
 0x1b7   : > { %1307 = shalt.err (!%p1304_p0)
}
 0x1b8   : > { %s1377_s21 = smov 128   ;;  %s1378_s23 = smov 8  }
 0x1b9   : > { %1204 = dma.vmem_to_hbm [thread:$0]  (%p1439_p4), %s1708_s8, 1024, %s1704_s4, %s1712_s7, %s1377_s21, %s1377_s21, %s1378_s23  }
 0x1ba PF: > { %p1210_p1 = scmp.ge.s32.totalorder %s1362_s17, 2  ;;  %s953_s28 = sand.u32 1, %s1342_s12  }
 0x1bb   : > { %s954_s29 = scalar_lea.sflag [#allocation4], %s953_s28 }
 0x1bc   : > { %p1207_p2 = pnand %p1210_p1, %p1446_p8 }
 0x1be   : > { %p1208_p3 = pneg %p1207_p2 }
 0x1c0   : > { %1337 = dma.done.wait (%p1208_p3), %s954_s29, 1024  }
 0x1c1   : > { %1339 = vsyncadd (%p1208_p3), %s954_s29, 4294966272  ;;  %s16_s17 = sadd.s32 1, %s1362_s17   ;;  %s1767_s12 = smov %s1346_s13 }
 0x1c2   : > { %p13_p5 = scmp.ge.s32.totalorder %s16_s17, 4   ;;  %s1768_s13 = smov %s1350_s14 }
 0x1c3   : > { %s1769_s14 = smov %s1452_s25  ;;  %s1770_s15 = smov %s1358_s16 }
 0x1c4   : > { %s1771_s16 = smov %s1773_s20  ;;  %15 = sbr.rel (!%p13_p5) target bundleno = 4 (0x4), region = 94 }
 0x1c9   :  { %959 = vsyncpa [#allocation4], 1 }
 0x1ca   :  { %961 = vsyncpa [#allocation4 + $0x1], 1 }

</bundles_post_ra>
